<compile_context>
chip_gen: v6e
topology: v6e:2x2x1
jax: 0.10.0
libtpu: 0.0.40
codegen_flags: <defaults>
</compile_context>

<pallas_src>
import jax
import jax.numpy as jnp
from jax import lax
from jax.experimental import pallas as pl
from jax.experimental.pallas import tpu as pltpu

# ---- small GPTNeoXConfig-like constants (TPU-friendly: lane-dense hidden) ----
SEQ_LEN = 128
HIDDEN_SIZE = 128
NUM_HEADS = 4
HEAD_SIZE = HIDDEN_SIZE // NUM_HEADS            # 32
ROTARY_PCT = 0.25
ROTARY_DIM = int(HEAD_SIZE * ROTARY_PCT)        # 8 (even, as asserted in the module)
ROTARY_HALF = ROTARY_DIM // 2                   # 4
ROPE_THETA = 10000.0
SCALING = HEAD_SIZE ** -0.5

TOKEN_TILE = 64     # rows per grid step in the QKV+RoPE kernel
Q_TILE = 64         # query rows per flash tile
K_TILE = 64         # key rows per flash tile (must equal Q_TILE, see finalize)
assert Q_TILE == K_TILE


# -----------------------------------------------------------------------------
# Kernel 1: QKV projection + NeoX rotary embedding (token-tiled, weight-resident)
# -----------------------------------------------------------------------------
def _qkv_rope_kernel(x_ref, wqkv_ref, bqkv_ref, cos_ref, sin_ref, qkv_ref):
    # bf16 MXU matmul, f32 accumulation (weights passed in bf16).
    x = x_ref[...].astype(jnp.bfloat16)                                   # [T, H]
    qkv = jnp.dot(x, wqkv_ref[...],
                  preferred_element_type=jnp.float32) + bqkv_ref[...]     # [T, 3H] f32

    cos = cos_ref[...]     # [T, H], full-width tables: 1.0 outside rotary lanes
    sin = sin_ref[...]     # [T, H], 0.0 outside rotary lanes

    lane = lax.broadcasted_iota(jnp.int32, (TOKEN_TILE, HIDDEN_SIZE), 1)
    is_lo = (lane % HEAD_SIZE) < ROTARY_HALF       # first rotary half of each head

    def rope(u):
        # NeoX rotate_half via two XLU lane rotations + masked select
        # (no lane-axis concatenates).  Non-rotary lanes have sin == 0, so the
        # garbage the rolls place there is multiplied away.  pltpu.roll needs a
        # non-negative axis index: the lane axis of a 2-D tile is axis=1.
        up = pltpu.roll(u, shift=HIDDEN_SIZE - ROTARY_HALF, axis=1)     # up[j]   = u[j + half]
        down = pltpu.roll(u, shift=ROTARY_HALF, axis=1)                 # down[j] = u[j - half]
        rotated = jnp.where(is_lo, -up, down)
        return u * cos + rotated * sin

    q = rope(qkv[:, 0:HIDDEN_SIZE]) * SCALING      # fold softmax scale into q (O(T*D))
    k = rope(qkv[:, HIDDEN_SIZE:2 * HIDDEN_SIZE])
    v = qkv[:, 2 * HIDDEN_SIZE:3 * HIDDEN_SIZE]

    # lane-aligned 128-wide stores (no masked partial stores)
    qkv_ref[:, 0:HIDDEN_SIZE] = q.astype(jnp.bfloat16)
    qkv_ref[:, HIDDEN_SIZE:2 * HIDDEN_SIZE] = k.astype(jnp.bfloat16)
    qkv_ref[:, 2 * HIDDEN_SIZE:3 * HIDDEN_SIZE] = v.astype(jnp.bfloat16)


# -----------------------------------------------------------------------------
# Kernel 2: flash-style causal attention + fused output projection
# -----------------------------------------------------------------------------
def _flash_attn_dense_kernel(q_ref, k_ref, v_ref, wd_ref, bd_ref, o_ref,
                             m_scr, l_scr, acc_scr):
    qi = pl.program_id(0)
    ki = pl.program_id(1)

    @pl.when(ki == 0)
    def _init():
        m_scr[...] = jnp.full(m_scr.shape, -1e30, dtype=m_scr.dtype)
        l_scr[...] = jnp.zeros(l_scr.shape, dtype=l_scr.dtype)
        acc_scr[...] = jnp.zeros(acc_scr.shape, dtype=acc_scr.dtype)

    # Causal: key tiles strictly above the diagonal contribute nothing -> skip.
    @pl.when(ki <= qi)
    def _update():
        q = q_ref[...]                               # [NH, TQ, HD] bf16 (roped, pre-scaled)
        k = k_ref[...]                               # [NH, TK, HD] bf16
        v = v_ref[...]                               # [NH, TK, HD] bf16

        # all heads in one batched MXU matmul
        s = jnp.einsum("hqd,hkd->hqk", q, k,
                       preferred_element_type=jnp.float32)      # [NH, TQ, TK] f32

        # causal mask derived from program_id offsets; it only bites on the
        # diagonal tile (for ki < qi every entry is already below the diagonal).
        row = qi * Q_TILE + lax.broadcasted_iota(jnp.int32, (Q_TILE, K_TILE), 0)
        col = ki * K_TILE + lax.broadcasted_iota(jnp.int32, (Q_TILE, K_TILE), 1)
        s = jnp.where((row >= col)[None, :, :], s, -1e30)

        m_prev = m_scr[...]
        m_new = jnp.maximum(m_prev, jnp.max(s, axis=-1, keepdims=True))
        alpha = jnp.exp(m_prev - m_new)              # softmax math kept in f32 (v5e VPU/EUP)
        p = jnp.exp(s - m_new)
        l_scr[...] = alpha * l_scr[...] + jnp.sum(p, axis=-1, keepdims=True)
        acc_scr[...] = alpha * acc_scr[...] + jnp.einsum(
            "hqk,hkd->hqd", p.astype(jnp.bfloat16), v,
            preferred_element_type=jnp.float32)
        m_scr[...] = m_new

    # The diagonal tile (ki == qi) is the last key tile contributing to this query
    # tile, so normalize and apply the fused output dense projection there.
    @pl.when(ki == qi)
    def _finalize():
        inv_l = pl.reciprocal(l_scr[...], approx=True)          # EUP slot, frees VPU
        out = jnp.zeros((Q_TILE, HIDDEN_SIZE), dtype=jnp.float32)
        # attn_flat @ W_dense == sum_h attn_h @ W_dense[h*HD:(h+1)*HD, :]
        # (avoids a lane concatenate / [NH,TQ,HD]->[TQ,H] relayout in-kernel).
        for h in range(NUM_HEADS):
            attn_h = (acc_scr[h] * inv_l[h]).astype(jnp.bfloat16)        # [TQ, HD]
            w_h = wd_ref[h * HEAD_SIZE:(h + 1) * HEAD_SIZE, :]           # [HD, H] bf16
            out = out + jnp.dot(attn_h, w_h, preferred_element_type=jnp.float32)
        o_ref[...] = out + bd_ref[...]


# -----------------------------------------------------------------------------
# Wrapper
# -----------------------------------------------------------------------------
def _rotary_tables(position_ids):
    """cos/sin widened to the full hidden width (1.0 / 0.0 outside the rotary
    lanes) and tiled across heads, so the kernel avoids 1-lane-wide broadcasts."""
    t = position_ids.shape[0]
    inv_freq = 1.0 / (ROPE_THETA ** (jnp.arange(0, ROTARY_DIM, 2,
                                                dtype=jnp.float32) / ROTARY_DIM))
    freqs = position_ids.astype(jnp.float32)[:, None] * inv_freq[None, :]   # [T, half]
    cos_h, sin_h = jnp.cos(freqs), jnp.sin(freqs)
    pass_c = jnp.ones((t, HEAD_SIZE - ROTARY_DIM), jnp.float32)
    pass_s = jnp.zeros((t, HEAD_SIZE - ROTARY_DIM), jnp.float32)
    cos_head = jnp.concatenate([cos_h, cos_h, pass_c], axis=-1)             # [T, HEAD_SIZE]
    sin_head = jnp.concatenate([sin_h, sin_h, pass_s], axis=-1)
    return jnp.tile(cos_head, (1, NUM_HEADS)), jnp.tile(sin_head, (1, NUM_HEADS))


@jax.jit
def gpt_neox_attention(position_ids, hidden_states, w_qkv, b_qkv, w_dense, b_dense):
    t, h = hidden_states.shape
    assert h == HIDDEN_SIZE and t % TOKEN_TILE == 0 and t % Q_TILE == 0
    cos_full, sin_full = _rotary_tables(position_ids)

    # ---- kernel 1: token-tiled QKV projection + rotary -----------------------
    qkv = pl.pallas_call(
        _qkv_rope_kernel,
        out_shape=jax.ShapeDtypeStruct((t, 3 * h), jnp.bfloat16),
        grid_spec=pltpu.PrefetchScalarGridSpec(
            num_scalar_prefetch=0,
            grid=(t // TOKEN_TILE,),
            in_specs=[
                pl.BlockSpec((TOKEN_TILE, h), lambda i: (i, 0)),
                pl.BlockSpec((h, 3 * h), lambda i: (0, 0)),      # weight resident
                pl.BlockSpec((1, 3 * h), lambda i: (0, 0)),      # bias resident
                pl.BlockSpec((TOKEN_TILE, h), lambda i: (i, 0)),
                pl.BlockSpec((TOKEN_TILE, h), lambda i: (i, 0)),
            ],
            out_specs=pl.BlockSpec((TOKEN_TILE, 3 * h), lambda i: (i, 0)),
        ),
        compiler_params=pltpu.CompilerParams(
            dimension_semantics=("parallel",),
            vmem_limit_bytes=32 * 1024 * 1024),
    )(hidden_states, w_qkv.astype(jnp.bfloat16), b_qkv[None, :], cos_full, sin_full)

    # Layout plumbing (plain-XLA glue): split heads -> [NUM_HEADS, T, HEAD_SIZE]
    # so the flash kernel uses the documented batched-einsum layout directly.
    def split_heads(x2d):
        return x2d.reshape(t, NUM_HEADS, HEAD_SIZE).transpose(1, 0, 2)

    q_heads = split_heads(qkv[:, 0:h])
    k_heads = split_heads(qkv[:, h:2 * h])
    v_heads = split_heads(qkv[:, 2 * h:3 * h])

    # ---- kernel 2: flash causal attention + fused output dense ---------------
    out = pl.pallas_call(
        _flash_attn_dense_kernel,
        out_shape=jax.ShapeDtypeStruct((t, h), jnp.float32),
        grid_spec=pltpu.PrefetchScalarGridSpec(
            num_scalar_prefetch=0,
            grid=(t // Q_TILE, t // K_TILE),
            in_specs=[
                pl.BlockSpec((NUM_HEADS, Q_TILE, HEAD_SIZE), lambda qi, ki: (0, qi, 0)),
                pl.BlockSpec((NUM_HEADS, K_TILE, HEAD_SIZE), lambda qi, ki: (0, ki, 0)),
                pl.BlockSpec((NUM_HEADS, K_TILE, HEAD_SIZE), lambda qi, ki: (0, ki, 0)),
                pl.BlockSpec((h, h), lambda qi, ki: (0, 0)),     # dense weight resident
                pl.BlockSpec((1, h), lambda qi, ki: (0, 0)),     # dense bias resident
            ],
            out_specs=pl.BlockSpec((Q_TILE, h), lambda qi, ki: (qi, 0)),
            scratch_shapes=[
                pltpu.VMEM((NUM_HEADS, Q_TILE, 1), jnp.float32),          # running max
                pltpu.VMEM((NUM_HEADS, Q_TILE, 1), jnp.float32),          # running sum
                pltpu.VMEM((NUM_HEADS, Q_TILE, HEAD_SIZE), jnp.float32),  # running acc
            ],
        ),
        compiler_params=pltpu.CompilerParams(
            dimension_semantics=("parallel", "arbitrary"),
            vmem_limit_bytes=32 * 1024 * 1024),
    )(q_heads, k_heads, v_heads, w_dense.astype(jnp.bfloat16), b_dense[None, :])
    return out


# -----------------------------------------------------------------------------
# Pure-JAX f32 reference (same forward semantics) for a correctness check
# -----------------------------------------------------------------------------
def _reference(position_ids, hidden_states, w_qkv, b_qkv, w_dense, b_dense):
    t, hdim = hidden_states.shape
    half = ROTARY_HALF
    inv_freq = 1.0 / (ROPE_THETA ** (jnp.arange(0, ROTARY_DIM, 2,
                                                dtype=jnp.float32) / ROTARY_DIM))
    freqs = position_ids.astype(jnp.float32)[:, None] * inv_freq[None, :]
    cos, sin = jnp.cos(freqs), jnp.sin(freqs)

    qkv = hidden_states @ w_qkv + b_qkv
    q, k, v = jnp.split(qkv, 3, axis=-1)

    def rope(x):
        xh = x.reshape(t, NUM_HEADS, HEAD_SIZE)
        x1, x2, xp = xh[..., :half], xh[..., half:ROTARY_DIM], xh[..., ROTARY_DIM:]
        c, s = cos[:, None, :], sin[:, None, :]
        return jnp.concatenate([x1 * c - x2 * s, x2 * c + x1 * s, xp],
                               axis=-1).reshape(t, hdim)

    q, k = rope(q), rope(k)
    qh = q.reshape(t, NUM_HEADS, HEAD_SIZE).transpose(1, 0, 2)
    kh = k.reshape(t, NUM_HEADS, HEAD_SIZE).transpose(1, 0, 2)
    vh = v.reshape(t, NUM_HEADS, HEAD_SIZE).transpose(1, 0, 2)
    s = jnp.einsum("hqd,hkd->hqk", qh, kh) * SCALING
    mask = jnp.tril(jnp.ones((t, t), dtype=bool))
    s = jnp.where(mask[None], s, -1e30)
    p = jax.nn.softmax(s, axis=-1)
    attn = jnp.einsum("hqk,hkd->hqd", p, vh).transpose(1, 0, 2).reshape(t, hdim)
    return attn @ w_dense + b_dense


if __name__ == "__main__":
    key = jax.random.PRNGKey(0)
    k_x, k_wqkv, k_bqkv, k_wd, k_bd = jax.random.split(key, 5)

    hidden_states = jax.random.normal(k_x, (SEQ_LEN, HIDDEN_SIZE), dtype=jnp.float32)
    position_ids = jnp.arange(SEQ_LEN, dtype=jnp.int32)

    # deterministic synthetic parameters (shapes from the module's __init__)
    w_qkv = 0.02 * jax.random.normal(k_wqkv, (HIDDEN_SIZE, 3 * HIDDEN_SIZE), jnp.float32)
    b_qkv = 0.01 * jax.random.normal(k_bqkv, (3 * HIDDEN_SIZE,), jnp.float32)
    w_dense = 0.02 * jax.random.normal(k_wd, (HIDDEN_SIZE, HIDDEN_SIZE), jnp.float32)
    b_dense = 0.01 * jax.random.normal(k_bd, (HIDDEN_SIZE,), jnp.float32)

    out = gpt_neox_attention(position_ids, hidden_states, w_qkv, b_qkv, w_dense, b_dense)
    out = jax.block_until_ready(out)

    ref = _reference(position_ids, hidden_states, w_qkv, b_qkv, w_dense, b_dense)
    assert out.shape == (SEQ_LEN, HIDDEN_SIZE)
    max_err = float(jnp.max(jnp.abs(out - ref)))
    assert jnp.allclose(out, ref, atol=2e-2, rtol=2e-2), f"mismatch vs reference (max|err|={max_err})"

    print("KERNEL_OK")
</pallas_src>

<mosaic_0001>
module attributes {stable_mosaic.version = 11 : i64} {
  func.func @_qkv_rope_kernel(%arg0: i32, %arg1: memref<64x128xf32, #tpu.memory_space<vmem>>, %arg2: memref<128x384xbf16, #tpu.memory_space<vmem>>, %arg3: memref<1x384xf32, #tpu.memory_space<vmem>>, %arg4: memref<64x128xf32, #tpu.memory_space<vmem>>, %arg5: memref<64x128xf32, #tpu.memory_space<vmem>>, %arg6: memref<64x384xbf16, #tpu.memory_space<vmem>>) attributes {dimension_semantics = [#tpu.dimension_semantics<parallel>], iteration_bounds = array<i64: 2>, scalar_prefetch = 0 : i64, scratch_operands = 0 : i64, tpu.core_type = #tpu.core_type<tc>, window_params = [{transform_indices = @transform_0, window_bounds = array<i64: 64, 128>}, {pipeline_mode = #tpu.pipeline_mode<synchronous>, transform_indices = @transform_1, window_bounds = array<i64: 128, 384>}, {pipeline_mode = #tpu.pipeline_mode<synchronous>, transform_indices = @transform_2, window_bounds = array<i64: 1, 384>}, {transform_indices = @transform_3, window_bounds = array<i64: 64, 128>}, {transform_indices = @transform_4, window_bounds = array<i64: 64, 128>}, {transform_indices = @transform_5, window_bounds = array<i64: 64, 384>}]} {
    %c0 = arith.constant 0 : index
    %c0_0 = arith.constant 0 : index
    %0 = vector.load %arg1[%c0, %c0_0] : memref<64x128xf32, #tpu.memory_space<vmem>>, vector<64x128xf32>
    %1 = arith.truncf %0 : vector<64x128xf32> to vector<64x128xbf16>
    %c0_1 = arith.constant 0 : index
    %c0_2 = arith.constant 0 : index
    %2 = vector.load %arg2[%c0_1, %c0_2] : memref<128x384xbf16, #tpu.memory_space<vmem>>, vector<128x384xbf16>
    %cst = arith.constant dense<0.000000e+00> : vector<64x384xf32>
    %3 = tpu.matmul %1, %2, %cst {dimension_numbers = #tpu.dot_dimension_numbers<[1], [0], [0], [1], [0, 0, 1, 1], [], []>} : vector<64x128xbf16>, vector<128x384xbf16>, vector<64x384xf32> -> vector<64x384xf32>
    %c0_3 = arith.constant 0 : index
    %c0_4 = arith.constant 0 : index
    %4 = vector.load %arg3[%c0_3, %c0_4] : memref<1x384xf32, #tpu.memory_space<vmem>>, vector<1x384xf32>
    %5 = vector.broadcast %4 : vector<1x384xf32> to vector<64x384xf32>
    %6 = arith.addf %3, %5 : vector<64x384xf32>
    %c0_5 = arith.constant 0 : index
    %c0_6 = arith.constant 0 : index
    %7 = vector.load %arg4[%c0_5, %c0_6] : memref<64x128xf32, #tpu.memory_space<vmem>>, vector<64x128xf32>
    %c0_7 = arith.constant 0 : index
    %c0_8 = arith.constant 0 : index
    %8 = vector.load %arg5[%c0_7, %c0_8] : memref<64x128xf32, #tpu.memory_space<vmem>>, vector<64x128xf32>
    %9 = tpu.iota {dimensions = array<i32: 1>} : vector<64x128xi32>
    %c32_i32 = arith.constant 32 : i32
    %c0_i32 = arith.constant 0 : i32
    %10 = arith.cmpi eq, %c32_i32, %c0_i32 : i32
    %c1_i32 = arith.constant 1 : i32
    %11 = arith.select %10, %c1_i32, %c32_i32 : i32
    %12 = vector.broadcast %11 : i32 to vector<64x128xi32>
    %13 = arith.remsi %9, %12 : vector<64x128xi32>
    %c0_i32_9 = arith.constant 0 : i32
    %14 = vector.broadcast %c0_i32_9 : i32 to vector<64x128xi32>
    %15 = arith.cmpi ne, %13, %14 : vector<64x128xi32>
    %c0_i32_10 = arith.constant 0 : i32
    %16 = vector.broadcast %c0_i32_10 : i32 to vector<64x128xi32>
    %17 = arith.cmpi slt, %13, %16 : vector<64x128xi32>
    %c0_i32_11 = arith.constant 0 : i32
    %18 = arith.cmpi slt, %11, %c0_i32_11 : i32
    %19 = vector.broadcast %18 : i1 to vector<64x128xi1>
    %20 = vector.broadcast %19 : vector<64x128xi1> to vector<64x128xi1>
    %21 = arith.xori %17, %20 : vector<64x128xi1>
    %22 = arith.andi %21, %15 : vector<64x128xi1>
    %23 = vector.broadcast %11 : i32 to vector<64x128xi32>
    %24 = arith.addi %13, %23 : vector<64x128xi32>
    %25 = arith.select %22, %24, %13 : vector<64x128xi1>, vector<64x128xi32>
    %c4_i32 = arith.constant 4 : i32
    %26 = vector.broadcast %c4_i32 : i32 to vector<64x128xi32>
    %27 = arith.cmpi slt, %25, %26 : vector<64x128xi32>
    %28 = vector.extract_strided_slice %6 {offsets = [0, 0], sizes = [64, 128], strides = [1, 1]} : vector<64x384xf32> to vector<64x128xf32>
    %c124_i32 = arith.constant 124 : i32
    %29 = tpu.dynamic_rotate %28 by %c124_i32 dim 1 : vector<64x128xf32>, i32 -> vector<64x128xf32>
    %c4_i32_12 = arith.constant 4 : i32
    %30 = tpu.dynamic_rotate %28 by %c4_i32_12 dim 1 : vector<64x128xf32>, i32 -> vector<64x128xf32>
    %cst_13 = arith.constant 0.000000e+00 : f32
    %31 = vector.broadcast %cst_13 : f32 to vector<64x128xf32>
    %32 = arith.subf %31, %29 : vector<64x128xf32>
    %33 = arith.select %27, %32, %30 : vector<64x128xi1>, vector<64x128xf32>
    %34 = arith.mulf %28, %7 : vector<64x128xf32>
    %35 = arith.mulf %33, %8 : vector<64x128xf32>
    %36 = arith.addf %34, %35 : vector<64x128xf32>
    %cst_14 = arith.constant 0.176776692 : f32
    %37 = vector.broadcast %cst_14 : f32 to vector<64x128xf32>
    %38 = arith.mulf %36, %37 : vector<64x128xf32>
    %39 = vector.extract_strided_slice %6 {offsets = [0, 128], sizes = [64, 128], strides = [1, 1]} : vector<64x384xf32> to vector<64x128xf32>
    %c124_i32_15 = arith.constant 124 : i32
    %40 = tpu.dynamic_rotate %39 by %c124_i32_15 dim 1 : vector<64x128xf32>, i32 -> vector<64x128xf32>
    %c4_i32_16 = arith.constant 4 : i32
    %41 = tpu.dynamic_rotate %39 by %c4_i32_16 dim 1 : vector<64x128xf32>, i32 -> vector<64x128xf32>
    %cst_17 = arith.constant 0.000000e+00 : f32
    %42 = vector.broadcast %cst_17 : f32 to vector<64x128xf32>
    %43 = arith.subf %42, %40 : vector<64x128xf32>
    %44 = arith.select %27, %43, %41 : vector<64x128xi1>, vector<64x128xf32>
    %45 = arith.mulf %39, %7 : vector<64x128xf32>
    %46 = arith.mulf %44, %8 : vector<64x128xf32>
    %47 = arith.addf %45, %46 : vector<64x128xf32>
    %48 = vector.extract_strided_slice %6 {offsets = [0, 256], sizes = [64, 128], strides = [1, 1]} : vector<64x384xf32> to vector<64x128xf32>
    %49 = arith.truncf %38 : vector<64x128xf32> to vector<64x128xbf16>
    %c0_18 = arith.constant 0 : index
    %c0_19 = arith.constant 0 : index
    %50 = vector.load %arg6[%c0_18, %c0_19] : memref<64x384xbf16, #tpu.memory_space<vmem>>, vector<64x128xbf16>
    tpu.vector_store %arg6[%c0_18, %c0_19], %49 {strides = array<i32>} : memref<64x384xbf16, #tpu.memory_space<vmem>>, vector<64x128xbf16>,
    %51 = arith.truncf %47 : vector<64x128xf32> to vector<64x128xbf16>
    %c0_20 = arith.constant 0 : index
    %c128 = arith.constant 128 : index
    %52 = vector.load %arg6[%c0_20, %c128] : memref<64x384xbf16, #tpu.memory_space<vmem>>, vector<64x128xbf16>
    tpu.vector_store %arg6[%c0_20, %c128], %51 {strides = array<i32>} : memref<64x384xbf16, #tpu.memory_space<vmem>>, vector<64x128xbf16>,
    %53 = arith.truncf %48 : vector<64x128xf32> to vector<64x128xbf16>
    %c0_21 = arith.constant 0 : index
    %c256 = arith.constant 256 : index
    %54 = vector.load %arg6[%c0_21, %c256] : memref<64x384xbf16, #tpu.memory_space<vmem>>, vector<64x128xbf16>
    tpu.vector_store %arg6[%c0_21, %c256], %53 {strides = array<i32>} : memref<64x384xbf16, #tpu.memory_space<vmem>>, vector<64x128xbf16>,
    return
  }
  func.func @transform_0(%arg0: i32) -> (i32, i32) {
    %c0_i32 = arith.constant 0 : i32
    %c0_i32_0 = arith.constant 0 : i32
    return %arg0, %c0_i32 : i32, i32
  }
  func.func @transform_1(%arg0: i32) -> (i32, i32) {
    %c0_i32 = arith.constant 0 : i32
    %c0_i32_0 = arith.constant 0 : i32
    %c0_i32_1 = arith.constant 0 : i32
    return %c0_i32, %c0_i32_0 : i32, i32
  }
  func.func @transform_2(%arg0: i32) -> (i32, i32) {
    %c0_i32 = arith.constant 0 : i32
    %c0_i32_0 = arith.constant 0 : i32
    %c0_i32_1 = arith.constant 0 : i32
    return %c0_i32, %c0_i32_0 : i32, i32
  }
  func.func @transform_3(%arg0: i32) -> (i32, i32) {
    %c0_i32 = arith.constant 0 : i32
    %c0_i32_0 = arith.constant 0 : i32
    return %arg0, %c0_i32 : i32, i32
  }
  func.func @transform_4(%arg0: i32) -> (i32, i32) {
    %c0_i32 = arith.constant 0 : i32
    %c0_i32_0 = arith.constant 0 : i32
    return %arg0, %c0_i32 : i32, i32
  }
  func.func @transform_5(%arg0: i32) -> (i32, i32) {
    %c0_i32 = arith.constant 0 : i32
    %c0_i32_0 = arith.constant 0 : i32
    return %arg0, %c0_i32 : i32, i32
  }
}

module attributes {stable_mosaic.version = 11 : i64} {
  func.func @_flash_attn_dense_kernel(%arg0: i32, %arg1: i32, %arg2: memref<4x64x32xbf16, #tpu.memory_space<vmem>>, %arg3: memref<4x64x32xbf16, #tpu.memory_space<vmem>>, %arg4: memref<4x64x32xbf16, #tpu.memory_space<vmem>>, %arg5: memref<128x128xbf16, #tpu.memory_space<vmem>>, %arg6: memref<1x128xf32, #tpu.memory_space<vmem>>, %arg7: memref<64x128xf32, #tpu.memory_space<vmem>>, %arg8: memref<4x64x1xf32, #tpu.memory_space<vmem>>, %arg9: memref<4x64x1xf32, #tpu.memory_space<vmem>>, %arg10: memref<4x64x32xf32, #tpu.memory_space<vmem>>) attributes {dimension_semantics = [#tpu.dimension_semantics<parallel>, #tpu.dimension_semantics<arbitrary>], iteration_bounds = array<i64: 2, 2>, scalar_prefetch = 0 : i64, scratch_operands = 3 : i64, tpu.core_type = #tpu.core_type<tc>, window_params = [{transform_indices = @transform_0, window_bounds = array<i64: 4, 64, 32>}, {transform_indices = @transform_1, window_bounds = array<i64: 4, 64, 32>}, {transform_indices = @transform_2, window_bounds = array<i64: 4, 64, 32>}, {pipeline_mode = #tpu.pipeline_mode<synchronous>, transform_indices = @transform_3, window_bounds = array<i64: 128, 128>}, {pipeline_mode = #tpu.pipeline_mode<synchronous>, transform_indices = @transform_4, window_bounds = array<i64: 1, 128>}, {transform_indices = @transform_5, window_bounds = array<i64: 64, 128>}]} {
    %c0_i32 = arith.constant 0 : i32
    %0 = arith.cmpi eq, %arg1, %c0_i32 : i32
    %1 = arith.extui %0 : i1 to i32
    %c0_i32_0 = arith.constant 0 : i32
    %2 = arith.cmpi ne, %1, %c0_i32_0 : i32
    scf.if %2 {
      %cst = arith.constant -1.000000e+30 : f32
      %9 = vector.broadcast %cst : f32 to vector<4x64x1xf32>
      %c0 = arith.constant 0 : index
      %c0_3 = arith.constant 0 : index
      %c0_4 = arith.constant 0 : index
      %10 = vector.load %arg8[%c0, %c0_3, %c0_4] : memref<4x64x1xf32, #tpu.memory_space<vmem>>, vector<4x64x1xf32>
      tpu.vector_store %arg8[%c0, %c0_3, %c0_4], %9 {strides = array<i32>} : memref<4x64x1xf32, #tpu.memory_space<vmem>>, vector<4x64x1xf32>,
      %cst_5 = arith.constant 0.000000e+00 : f32
      %11 = vector.broadcast %cst_5 : f32 to vector<4x64x1xf32>
      %c0_6 = arith.constant 0 : index
      %c0_7 = arith.constant 0 : index
      %c0_8 = arith.constant 0 : index
      %12 = vector.load %arg9[%c0_6, %c0_7, %c0_8] : memref<4x64x1xf32, #tpu.memory_space<vmem>>, vector<4x64x1xf32>
      tpu.vector_store %arg9[%c0_6, %c0_7, %c0_8], %11 {strides = array<i32>} : memref<4x64x1xf32, #tpu.memory_space<vmem>>, vector<4x64x1xf32>,
      %cst_9 = arith.constant 0.000000e+00 : f32
      %13 = vector.broadcast %cst_9 : f32 to vector<4x64x32xf32>
      %c0_10 = arith.constant 0 : index
      %c0_11 = arith.constant 0 : index
      %c0_12 = arith.constant 0 : index
      %14 = vector.load %arg10[%c0_10, %c0_11, %c0_12] : memref<4x64x32xf32, #tpu.memory_space<vmem>>, vector<4x64x32xf32>
      tpu.vector_store %arg10[%c0_10, %c0_11, %c0_12], %13 {strides = array<i32>} : memref<4x64x32xf32, #tpu.memory_space<vmem>>, vector<4x64x32xf32>,
    } else {
    }
    %3 = arith.cmpi sle, %arg1, %arg0 : i32
    %4 = arith.extui %3 : i1 to i32
    %c0_i32_1 = arith.constant 0 : i32
    %5 = arith.cmpi ne, %4, %c0_i32_1 : i32
    scf.if %5 {
      %c0 = arith.constant 0 : index
      %c0_3 = arith.constant 0 : index
      %c0_4 = arith.constant 0 : index
      %9 = vector.load %arg2[%c0, %c0_3, %c0_4] : memref<4x64x32xbf16, #tpu.memory_space<vmem>>, vector<4x64x32xbf16>
      %c0_5 = arith.constant 0 : index
      %c0_6 = arith.constant 0 : index
      %c0_7 = arith.constant 0 : index
      %10 = vector.load %arg3[%c0_5, %c0_6, %c0_7] : memref<4x64x32xbf16, #tpu.memory_space<vmem>>, vector<4x64x32xbf16>
      %c0_8 = arith.constant 0 : index
      %c0_9 = arith.constant 0 : index
      %c0_10 = arith.constant 0 : index
      %11 = vector.load %arg4[%c0_8, %c0_9, %c0_10] : memref<4x64x32xbf16, #tpu.memory_space<vmem>>, vector<4x64x32xbf16>
      "tpu.trace_start"() <{level = 10 : i32, message = "hqd,hkd->hqk"}> : () -> ()
      %cst = arith.constant dense<0.000000e+00> : vector<4x64x64xf32>
      %12 = tpu.matmul %9, %10, %cst {dimension_numbers = #tpu.dot_dimension_numbers<[2], [2], [1], [1], [0, 0, 0, 1, 1, 1], [0], [0]>} : vector<4x64x32xbf16>, vector<4x64x32xbf16>, vector<4x64x64xf32> -> vector<4x64x64xf32>
      "tpu.trace_stop"() : () -> ()
      %c64_i32 = arith.constant 64 : i32
      %13 = arith.muli %arg0, %c64_i32 : i32
      %14 = tpu.iota {dimensions = array<i32: 0>} : vector<64x64xi32>
      %15 = vector.broadcast %13 : i32 to vector<64x64xi32>
      %16 = arith.addi %15, %14 : vector<64x64xi32>
      %c64_i32_11 = arith.constant 64 : i32
      %17 = arith.muli %arg1, %c64_i32_11 : i32
      %18 = tpu.iota {dimensions = array<i32: 1>} : vector<64x64xi32>
      %19 = vector.broadcast %17 : i32 to vector<64x64xi32>
      %20 = arith.addi %19, %18 : vector<64x64xi32>
      %21 = arith.cmpi sge, %16, %20 : vector<64x64xi32>
      %22 = vector.shape_cast %21 : vector<64x64xi1> to vector<1x64x64xi1>
      %cst_12 = arith.constant -1.000000e+30 : f32
      %23 = vector.shape_cast %22 : vector<1x64x64xi1> to vector<1x64x64xi1>
      %24 = vector.broadcast %23 : vector<1x64x64xi1> to vector<4x64x64xi1>
      %25 = vector.broadcast %cst_12 : f32 to vector<4x64x64xf32>
      %26 = arith.select %24, %12, %25 : vector<4x64x64xi1>, vector<4x64x64xf32>
      %c0_13 = arith.constant 0 : index
      %c0_14 = arith.constant 0 : index
      %c0_15 = arith.constant 0 : index
      %27 = vector.load %arg8[%c0_13, %c0_14, %c0_15] : memref<4x64x1xf32, #tpu.memory_space<vmem>>, vector<4x64x1xf32>
      %cst_16 = arith.constant dense<0xFF800000> : vector<4x64xf32>
      %28 = vector.multi_reduction <maximumf>, %26, %cst_16 [2] : vector<4x64x64xf32> to vector<4x64xf32>
      %29 = vector.shape_cast %28 : vector<4x64xf32> to vector<4x64x1xf32>
      %30 = arith.maximumf %27, %29 : vector<4x64x1xf32>
      %31 = arith.subf %27, %30 : vector<4x64x1xf32>
      %32 = math.exp %31 : vector<4x64x1xf32>
      %33 = vector.broadcast %30 : vector<4x64x1xf32> to vector<4x64x64xf32>
      %34 = arith.subf %26, %33 : vector<4x64x64xf32>
      %35 = math.exp %34 : vector<4x64x64xf32>
      %c0_17 = arith.constant 0 : index
      %c0_18 = arith.constant 0 : index
      %c0_19 = arith.constant 0 : index
      %36 = vector.load %arg9[%c0_17, %c0_18, %c0_19] : memref<4x64x1xf32, #tpu.memory_space<vmem>>, vector<4x64x1xf32>
      %37 = arith.mulf %32, %36 : vector<4x64x1xf32>
      %cst_20 = arith.constant dense<0.000000e+00> : vector<4x64xf32>
      %38 = vector.multi_reduction <add>, %35, %cst_20 [2] : vector<4x64x64xf32> to vector<4x64xf32>
      %39 = vector.shape_cast %38 : vector<4x64xf32> to vector<4x64x1xf32>
      %40 = arith.addf %37, %39 : vector<4x64x1xf32>
      %c0_21 = arith.constant 0 : index
      %c0_22 = arith.constant 0 : index
      %c0_23 = arith.constant 0 : index
      %41 = vector.load %arg9[%c0_21, %c0_22, %c0_23] : memref<4x64x1xf32, #tpu.memory_space<vmem>>, vector<4x64x1xf32>
      tpu.vector_store %arg9[%c0_21, %c0_22, %c0_23], %40 {strides = array<i32>} : memref<4x64x1xf32, #tpu.memory_space<vmem>>, vector<4x64x1xf32>,
      %c0_24 = arith.constant 0 : index
      %c0_25 = arith.constant 0 : index
      %c0_26 = arith.constant 0 : index
      %42 = vector.load %arg10[%c0_24, %c0_25, %c0_26] : memref<4x64x32xf32, #tpu.memory_space<vmem>>, vector<4x64x32xf32>
      %43 = vector.broadcast %32 : vector<4x64x1xf32> to vector<4x64x32xf32>
      %44 = arith.mulf %43, %42 : vector<4x64x32xf32>
      %45 = arith.truncf %35 : vector<4x64x64xf32> to vector<4x64x64xbf16>
      "tpu.trace_start"() <{level = 10 : i32, message = "hqk,hkd->hqd"}> : () -> ()
      %cst_27 = arith.constant dense<0.000000e+00> : vector<4x64x32xf32>
      %46 = tpu.matmul %45, %11, %cst_27 {dimension_numbers = #tpu.dot_dimension_numbers<[2], [1], [1], [2], [0, 0, 0, 1, 1, 2], [0], [0]>} : vector<4x64x64xbf16>, vector<4x64x32xbf16>, vector<4x64x32xf32> -> vector<4x64x32xf32>
      "tpu.trace_stop"() : () -> ()
      %47 = arith.addf %44, %46 : vector<4x64x32xf32>
      %c0_28 = arith.constant 0 : index
      %c0_29 = arith.constant 0 : index
      %c0_30 = arith.constant 0 : index
      %48 = vector.load %arg10[%c0_28, %c0_29, %c0_30] : memref<4x64x32xf32, #tpu.memory_space<vmem>>, vector<4x64x32xf32>
      tpu.vector_store %arg10[%c0_28, %c0_29, %c0_30], %47 {strides = array<i32>} : memref<4x64x32xf32, #tpu.memory_space<vmem>>, vector<4x64x32xf32>,
      %c0_31 = arith.constant 0 : index
      %c0_32 = arith.constant 0 : index
      %c0_33 = arith.constant 0 : index
      %49 = vector.load %arg8[%c0_31, %c0_32, %c0_33] : memref<4x64x1xf32, #tpu.memory_space<vmem>>, vector<4x64x1xf32>
      tpu.vector_store %arg8[%c0_31, %c0_32, %c0_33], %30 {strides = array<i32>} : memref<4x64x1xf32, #tpu.memory_space<vmem>>, vector<4x64x1xf32>,
    } else {
    }
    %6 = arith.cmpi eq, %arg1, %arg0 : i32
    %7 = arith.extui %6 : i1 to i32
    %c0_i32_2 = arith.constant 0 : i32
    %8 = arith.cmpi ne, %7, %c0_i32_2 : i32
    scf.if %8 {
      %c0 = arith.constant 0 : index
      %c0_3 = arith.constant 0 : index
      %c0_4 = arith.constant 0 : index
      %9 = vector.load %arg9[%c0, %c0_3, %c0_4] : memref<4x64x1xf32, #tpu.memory_space<vmem>>, vector<4x64x1xf32>
      %10 = tpu.reciprocal %9 {approx = true} : vector<4x64x1xf32> -> vector<4x64x1xf32>
      %cst = arith.constant 0.000000e+00 : f32
      %11 = vector.broadcast %cst : f32 to vector<64x128xf32>
      %c0_5 = arith.constant 0 : index
      %c0_6 = arith.constant 0 : index
      %c0_7 = arith.constant 0 : index
      %12 = vector.load %arg10[%c0_5, %c0_6, %c0_7] : memref<4x64x32xf32, #tpu.memory_space<vmem>>, vector<1x64x32xf32>
      %13 = vector.shape_cast %12 : vector<1x64x32xf32> to vector<64x32xf32>
      %14 = vector.extract_strided_slice %10 {offsets = [0, 0, 0], sizes = [1, 64, 1], strides = [1, 1, 1]} : vector<4x64x1xf32> to vector<1x64x1xf32>
      %15 = vector.shape_cast %14 : vector<1x64x1xf32> to vector<64x1xf32>
      %16 = vector.broadcast %15 : vector<64x1xf32> to vector<64x32xf32>
      %17 = arith.mulf %13, %16 : vector<64x32xf32>
      %18 = arith.truncf %17 : vector<64x32xf32> to vector<64x32xbf16>
      %c0_8 = arith.constant 0 : index
      %c0_9 = arith.constant 0 : index
      %19 = vector.load %arg5[%c0_8, %c0_9] : memref<128x128xbf16, #tpu.memory_space<vmem>>, vector<32x128xbf16>
      %cst_10 = arith.constant dense<0.000000e+00> : vector<64x128xf32>
      %20 = tpu.matmul %18, %19, %cst_10 {dimension_numbers = #tpu.dot_dimension_numbers<[1], [0], [0], [1], [0, 0, 1, 1], [], []>} : vector<64x32xbf16>, vector<32x128xbf16>, vector<64x128xf32> -> vector<64x128xf32>
      %21 = arith.addf %11, %20 : vector<64x128xf32>
      %c1 = arith.constant 1 : index
      %c0_11 = arith.constant 0 : index
      %c0_12 = arith.constant 0 : index
      %22 = vector.load %arg10[%c1, %c0_11, %c0_12] : memref<4x64x32xf32, #tpu.memory_space<vmem>>, vector<1x64x32xf32>
      %23 = vector.shape_cast %22 : vector<1x64x32xf32> to vector<64x32xf32>
      %24 = vector.extract_strided_slice %10 {offsets = [1, 0, 0], sizes = [1, 64, 1], strides = [1, 1, 1]} : vector<4x64x1xf32> to vector<1x64x1xf32>
      %25 = vector.shape_cast %24 : vector<1x64x1xf32> to vector<64x1xf32>
      %26 = vector.broadcast %25 : vector<64x1xf32> to vector<64x32xf32>
      %27 = arith.mulf %23, %26 : vector<64x32xf32>
      %28 = arith.truncf %27 : vector<64x32xf32> to vector<64x32xbf16>
      %c32 = arith.constant 32 : index
      %c0_13 = arith.constant 0 : index
      %29 = vector.load %arg5[%c32, %c0_13] : memref<128x128xbf16, #tpu.memory_space<vmem>>, vector<32x128xbf16>
      %cst_14 = arith.constant dense<0.000000e+00> : vector<64x128xf32>
      %30 = tpu.matmul %28, %29, %cst_14 {dimension_numbers = #tpu.dot_dimension_numbers<[1], [0], [0], [1], [0, 0, 1, 1], [], []>} : vector<64x32xbf16>, vector<32x128xbf16>, vector<64x128xf32> -> vector<64x128xf32>
      %31 = arith.addf %21, %30 : vector<64x128xf32>
      %c2 = arith.constant 2 : index
      %c0_15 = arith.constant 0 : index
      %c0_16 = arith.constant 0 : index
      %32 = vector.load %arg10[%c2, %c0_15, %c0_16] : memref<4x64x32xf32, #tpu.memory_space<vmem>>, vector<1x64x32xf32>
      %33 = vector.shape_cast %32 : vector<1x64x32xf32> to vector<64x32xf32>
      %34 = vector.extract_strided_slice %10 {offsets = [2, 0, 0], sizes = [1, 64, 1], strides = [1, 1, 1]} : vector<4x64x1xf32> to vector<1x64x1xf32>
      %35 = vector.shape_cast %34 : vector<1x64x1xf32> to vector<64x1xf32>
      %36 = vector.broadcast %35 : vector<64x1xf32> to vector<64x32xf32>
      %37 = arith.mulf %33, %36 : vector<64x32xf32>
      %38 = arith.truncf %37 : vector<64x32xf32> to vector<64x32xbf16>
      %c64 = arith.constant 64 : index
      %c0_17 = arith.constant 0 : index
      %39 = vector.load %arg5[%c64, %c0_17] : memref<128x128xbf16, #tpu.memory_space<vmem>>, vector<32x128xbf16>
      %cst_18 = arith.constant dense<0.000000e+00> : vector<64x128xf32>
      %40 = tpu.matmul %38, %39, %cst_18 {dimension_numbers = #tpu.dot_dimension_numbers<[1], [0], [0], [1], [0, 0, 1, 1], [], []>} : vector<64x32xbf16>, vector<32x128xbf16>, vector<64x128xf32> -> vector<64x128xf32>
      %41 = arith.addf %31, %40 : vector<64x128xf32>
      %c3 = arith.constant 3 : index
      %c0_19 = arith.constant 0 : index
      %c0_20 = arith.constant 0 : index
      %42 = vector.load %arg10[%c3, %c0_19, %c0_20] : memref<4x64x32xf32, #tpu.memory_space<vmem>>, vector<1x64x32xf32>
      %43 = vector.shape_cast %42 : vector<1x64x32xf32> to vector<64x32xf32>
      %44 = vector.extract_strided_slice %10 {offsets = [3, 0, 0], sizes = [1, 64, 1], strides = [1, 1, 1]} : vector<4x64x1xf32> to vector<1x64x1xf32>
      %45 = vector.shape_cast %44 : vector<1x64x1xf32> to vector<64x1xf32>
      %46 = vector.broadcast %45 : vector<64x1xf32> to vector<64x32xf32>
      %47 = arith.mulf %43, %46 : vector<64x32xf32>
      %48 = arith.truncf %47 : vector<64x32xf32> to vector<64x32xbf16>
      %c96 = arith.constant 96 : index
      %c0_21 = arith.constant 0 : index
      %49 = vector.load %arg5[%c96, %c0_21] : memref<128x128xbf16, #tpu.memory_space<vmem>>, vector<32x128xbf16>
      %cst_22 = arith.constant dense<0.000000e+00> : vector<64x128xf32>
      %50 = tpu.matmul %48, %49, %cst_22 {dimension_numbers = #tpu.dot_dimension_numbers<[1], [0], [0], [1], [0, 0, 1, 1], [], []>} : vector<64x32xbf16>, vector<32x128xbf16>, vector<64x128xf32> -> vector<64x128xf32>
      %51 = arith.addf %41, %50 : vector<64x128xf32>
      %c0_23 = arith.constant 0 : index
      %c0_24 = arith.constant 0 : index
      %52 = vector.load %arg6[%c0_23, %c0_24] : memref<1x128xf32, #tpu.memory_space<vmem>>, vector<1x128xf32>
      %53 = vector.broadcast %52 : vector<1x128xf32> to vector<64x128xf32>
      %54 = arith.addf %51, %53 : vector<64x128xf32>
      %c0_25 = arith.constant 0 : index
      %c0_26 = arith.constant 0 : index
      %55 = vector.load %arg7[%c0_25, %c0_26] : memref<64x128xf32, #tpu.memory_space<vmem>>, vector<64x128xf32>
      tpu.vector_store %arg7[%c0_25, %c0_26], %54 {strides = array<i32>} : memref<64x128xf32, #tpu.memory_space<vmem>>, vector<64x128xf32>,
    } else {
    }
    return
  }
  func.func @transform_0(%arg0: i32, %arg1: i32) -> (i32, i32, i32) {
    %c0_i32 = arith.constant 0 : i32
    %c0_i32_0 = arith.constant 0 : i32
    %c0_i32_1 = arith.constant 0 : i32
    return %c0_i32, %arg0, %c0_i32_0 : i32, i32, i32
  }
  func.func @transform_1(%arg0: i32, %arg1: i32) -> (i32, i32, i32) {
    %c0_i32 = arith.constant 0 : i32
    %c0_i32_0 = arith.constant 0 : i32
    %c0_i32_1 = arith.constant 0 : i32
    return %c0_i32, %arg1, %c0_i32_0 : i32, i32, i32
  }
  func.func @transform_2(%arg0: i32, %arg1: i32) -> (i32, i32, i32) {
    %c0_i32 = arith.constant 0 : i32
    %c0_i32_0 = arith.constant 0 : i32
    %c0_i32_1 = arith.constant 0 : i32
    return %c0_i32, %arg1, %c0_i32_0 : i32, i32, i32
  }
  func.func @transform_3(%arg0: i32, %arg1: i32) -> (i32, i32) {
    %c0_i32 = arith.constant 0 : i32
    %c0_i32_0 = arith.constant 0 : i32
    %c0_i32_1 = arith.constant 0 : i32
    return %c0_i32, %c0_i32_0 : i32, i32
  }
  func.func @transform_4(%arg0: i32, %arg1: i32) -> (i32, i32) {
    %c0_i32 = arith.constant 0 : i32
    %c0_i32_0 = arith.constant 0 : i32
    %c0_i32_1 = arith.constant 0 : i32
    return %c0_i32, %c0_i32_0 : i32, i32
  }
  func.func @transform_5(%arg0: i32, %arg1: i32) -> (i32, i32) {
    %c0_i32 = arith.constant 0 : i32
    %c0_i32_0 = arith.constant 0 : i32
    return %arg0, %c0_i32 : i32, i32
  }
}

</mosaic_0001>

<bundles_post_ra>
// kernel: gpt_neox_attention.2
= control target key start
LH: loop header
LB: loop body
LE: loop exit
PB: predicated region body
PF: predicated region fallthrough
CT: control target
= control target key end

     0   :  { %s1195_s18 = smov 0   ;;  %s1532_s0 = inlined_call_operand.vmem [shape: f32[128,128], index: 0, kind: input, shape index: {}]   ;;  %s1533_s1 = inlined_call_operand.vmem [shape: bf16[128,384], index: 1, kind: input, shape index: {}]   ;;  %s1534_s2 = inlined_call_operand.vmem [shape: f32[1,384], index: 2, kind: input, shape index: {}]   ;;  %s1535_s3 = inlined_call_operand.vmem [shape: f32[128,128], index: 3, kind: input, shape index: {}]   ;;  %s1536_s4 = inlined_call_operand.vmem [shape: f32[128,128], index: 4, kind: input, shape index: {}]   ;;  %s1537_s5 = inlined_call_operand.vmem [shape: bf16[128,384], index: 5, kind: output, shape index: {}]  }
   0x1 LB: > { %s987_s19 = sadd.s32 4294967295, %s1160_s18   ;;  %p991_p0 = scmp.ge.s32.totalorder %s1160_s18, 1  ;;  %s1160_s18 = sphi %s1195_s18, %s15_s18  }
   0x2   : > { %p210_p1 = scmp.lt.s32.totalorder %s1160_s18, 3 }
   0x4   : > { %p211_p2 = pnand %p991_p0, %p210_p1 }
   0x5   : > { %s992_s22 = sshll.u32 (!%p211_p2), %s987_s19, 3  ;;  %s1164_s7 = smov (!%p211_p2), 4  }
   0x6   : > { %214 = sbr.rel (%p211_p2) target bundleno = 426 (0x1aa), region = 40  ;;  %p250_p3 = scmp.lt.s32.totalorder (!%p211_p2), %s992_s22, 15 }
   0xb   : > { %v1122_v0 = vld [vmem:[%s1533_s1 + $0xac] ss:$12 sps:$4 sm:$0xff]   ;;  %v1124_v1 = vld [vmem:[%s1533_s1 + $0xa8] ss:$12 sps:$4 sm:$0xff]   ;;  %v1162_v2 = vmov 0   ;;  %s1541_s22 = smov (!%p250_p3, %s992_s22), 15  ;;  %v321_v37 = vlaneseq }
   0xc   : > { %496 = vmatprep.mubr.bf16.mxu0 %v1162_v2  ;;  %464 = vmatprep.subr.bf16.mxu0 %v1122_v0  ;;  %v1125_v3 = vld [vmem:[%s1533_s1 + $0x94] ss:$12 sps:$4 sm:$0xff]   ;;  %v1127_v4 = vld [vmem:[%s1533_s1 + $0x90] ss:$12 sps:$4 sm:$0xff]   ;;  %s1222_s6 = sshll.u32 %s1541_s22, 3  ;;  %s1110_s8 = smul.u32 12, %s1541_s22 }
   0xd   : > { %465 = vmatpush1.bf16.msra.mxu0 %v1124_v1  ;;  %v1128_v5 = vld [vmem:[%s1533_s1 + $0x7c] ss:$12 sps:$4 sm:$0xff]   ;;  %v1130_v6 = vld [vmem:[%s1533_s1 + $0x78] ss:$12 sps:$4 sm:$0xff]   ;;  %s1231_s11 = scalar_lea.vmem %s1532_s0, %s1222_s6  ;;  %v1133_v9 = vld [vmem:[%s1533_s1 + $0x60] ss:$12 sps:$4 sm:$0xff]   ;;  %s1437_s14 = scalar_lea.vmem %s1535_s3, %s1222_s6 }
   0xe   : > { %466 = vmatprep.subr.bf16.mxu0 %v1125_v3  ;;  %v1131_v7 = vld [vmem:[%s1533_s1 + $0x64] ss:$12 sps:$4 sm:$0xff]   ;;  %v276_v10 = vld [vmem:[%s1231_s11 + $0x8] sm:$0xff]  ;;  %v1137_v16 = vld [vmem:[%s1533_s1 + $0x34] ss:$12 sps:$4 sm:$0xff]   ;;  %v322_v38 = vshrl.u32 %v321_v37, 7  ;;  %s1388_s10 = scalar_lea.vmem %s1537_s5, %s1110_s8  ;;  %s1443_s17 = scalar_lea.vmem %s1536_s4, %s1222_s6 }
   0xf   : > { %v275_v8 = vld [vmem:[%s1231_s11] sm:$0xff]  ;;  %v1134_v11 = vld [vmem:[%s1533_s1 + $0x4c] ss:$12 sps:$4 sm:$0xff]   ;;  %v1136_v13 = vld [vmem:[%s1533_s1 + $0x48] ss:$12 sps:$4 sm:$0xff]  }
  0x10   : > { %v283_v12 = vpack.c.bf16 %v276_v10, %v275_v8  ;;  %v1146_v14 = vld [vmem:[%s1533_s1 + $0xb0] ss:$12 sps:$4 sm:$0xff]   ;;  %v1147_v15 = vld [vmem:[%s1533_s1 + $0x98] ss:$12 sps:$4 sm:$0xff]   ;;  %v1148_v17 = vld [vmem:[%s1533_s1 + $0x80] ss:$12 sps:$4 sm:$0xff]  }
  0x11   : > { %467 = vmatpush1.bf16.msra.mxu0 %v1127_v4  ;;  %1086 = vmatprep.subr.bf16.mxu1 %v1146_v14  ;;  %v1139_v18 = vld [vmem:[%s1533_s1 + $0x30] ss:$12 sps:$4 sm:$0xff]   ;;  %v1149_v20 = vld [vmem:[%s1533_s1 + $0x68] ss:$12 sps:$4 sm:$0xff]   ;;  %v1142_v21 = vld [vmem:[%s1533_s1 + $0x18] ss:$12 sps:$4 sm:$0xff]  }
  0x12   : > { %468 = vmatprep.subr.bf16.mxu0 %v1128_v5  ;;  %1102 = vmatprep.mubr.bf16.mxu1 %v283_v12  ;;  %v1140_v19 = vld [vmem:[%s1533_s1 + $0x1c] ss:$12 sps:$4 sm:$0xff]   ;;  %v1143_v22 = vld [vmem:[%s1533_s1 + $0x4] ss:$12 sps:$4 sm:$0xff]   ;;  %v1145_v24 = vld [vmem:[%s1533_s1] ss:$12 sps:$4 sm:$0xff]  }
  0x13   : > { %1087 = vmatpush3.bf16.msra.mxu1 %v1146_v14  ;;  %v1150_v23 = vld [vmem:[%s1533_s1 + $0x50] ss:$12 sps:$4 sm:$0xff]   ;;  %v1151_v25 = vld [vmem:[%s1533_s1 + $0x38] ss:$12 sps:$4 sm:$0xff]   ;;  %v1152_v26 = vld [vmem:[%s1533_s1 + $0x20] ss:$12 sps:$4 sm:$0xff]  }
  0x14   : > { %1088 = vmatprep.subr.bf16.mxu1 %v1147_v15  ;;  %v277_v27 = vld [vmem:[%s1231_s11 + $0x10] sm:$0xff]  ;;  %v278_v28 = vld [vmem:[%s1231_s11 + $0x18] sm:$0xff]  ;;  %v279_v31 = vld [vmem:[%s1231_s11 + $0x20] sm:$0xff]  ;;  %v323_v39 = vsub.s32 0, %v322_v38  ;;  %v327_v44 = vsub.s32 1, %v322_v38  ;;  %v331_v3 = vsub.s32 2, %v322_v38 }
  0x15   : > { %469 = vmatpush1.bf16.msra.mxu0 %v1130_v6  ;;  %v284_v29 = vpack.c.bf16 %v278_v28, %v277_v27  ;;  %v1153_v30 = vld [vmem:[%s1533_s1 + $0x8] ss:$12 sps:$4 sm:$0xff]   ;;  %v282_v35 = vld [vmem:[%s1231_s11 + $0x38] sm:$0xff]  ;;  %v319_v40 = vld [vmem:[%s1534_s2] sm:$0x7] }
  0x16   : > { %470 = vmatprep.subr.bf16.mxu0 %v1131_v7  ;;  %v280_v32 = vld [vmem:[%s1231_s11 + $0x28] sm:$0xff]  ;;  %v281_v34 = vld [vmem:[%s1231_s11 + $0x30] sm:$0xff]  ;;  %v1302_v41 = vrot.slane %v319_v40, %v323_v39  ;;  %s1163_s11 = smov 124   ;;  %v1309_v47 = vrot.slane %v319_v40, %v327_v44  ;;  %v332_v6 = vrot.slane %v319_v40, %v331_v3  ;;  %v619_v39 = vand.u32 127, %v321_v37  ;;  %v602_v37 = vld [vmem:[%s1437_s14] sm:$0xff] }
  0x17   : > { %1089 = vmatpush3.bf16.msra.mxu1 %v1147_v15  ;;  %v285_v33 = vpack.c.bf16 %v280_v32, %v279_v31  ;;  %v286_v36 = vpack.c.bf16 %v282_v35, %v281_v34 }
  0x18   : > { %1090 = vmatprep.subr.bf16.mxu1 %v1148_v17  ;;  %v624_v40 = vand.u32 31, %v619_v39 }
  0x19   : > { %471 = vmatpush1.bf16.msra.mxu0 %v1133_v9 }
  0x1a   : > { %472 = vmatprep.subr.bf16.mxu0 %v1134_v11  ;;  %vm1445_vm0 = vcmp.lt.s32.totalorder %v624_v40, 4 }
  0x1b   : > { %1091 = vmatpush3.bf16.msra.mxu1 %v1148_v17 }
  0x1c   : > { %1092 = vmatprep.subr.bf16.mxu1 %v1149_v20 }
  0x1d   : > { %473 = vmatpush1.bf16.msra.mxu0 %v1136_v13 }
  0x1e   : > { %474 = vmatprep.subr.bf16.mxu0 %v1137_v16 }
  0x1f   : > { %1093 = vmatpush3.bf16.msra.mxu1 %v1149_v20 }
  0x20   : > { %1094 = vmatprep.subr.bf16.mxu1 %v1150_v23 }
  0x21   : > { %475 = vmatpush1.bf16.msra.mxu0 %v1139_v18 }
  0x22   : > { %476 = vmatprep.subr.bf16.mxu0 %v1140_v19 }
  0x23   : > { %1095 = vmatpush3.bf16.msra.mxu1 %v1150_v23 }
  0x24   : > { %1096 = vmatprep.subr.bf16.mxu1 %v1151_v25 }
  0x25   : > { %477 = vmatpush1.bf16.msra.mxu0 %v1142_v21 }
  0x26   : > { %478 = vmatprep.subr.bf16.mxu0 %v1143_v22 }
  0x27   : > { %1097 = vmatpush3.bf16.msra.mxu1 %v1151_v25 }
  0x28   : > { %1098 = vmatprep.subr.bf16.mxu1 %v1152_v26 }
  0x29   : > { %479 = vmatpush1.bf16.msra.mxu0 %v1145_v24 }
  0x2b   : > { %1099 = vmatpush3.bf16.msra.mxu1 %v1152_v26 }
  0x2c   : > { %497 = vmatmul.mubr.bf16.vlgmr.msra.gmra.mxu0 %v283_v12  ;;  %1100 = vmatprep.subr.bf16.mxu1 %v1153_v30 }
  0x2d   : > { %506 = vmatprep.mubr.bf16.mxu0 %v1162_v2 }
  0x2f   : > { %1101 = vmatpush3.bf16.msra.mxu1 %v1153_v30 }
  0x32   : > { %1103 = vmatmul.mubr.bf16.vlgmr.msra.gmra.mxu1 %v284_v29 }
  0x33   : > { %1106 = vmatprep.mubr.bf16.mxu1 %v285_v33 }
  0x34   : > { %507 = vmatmul.mubr.bf16.gmra.mxu0 %v284_v29 }
  0x35   : > { %516 = vmatprep.mubr.bf16.mxu0 %v1162_v2 }
  0x3a   : > { %1107 = vmatmul.mubr.bf16.gmra.mxu1 %v286_v36 }
  0x3c   : > { %517 = vmatmul.mubr.bf16.gmra.mxu0 %v285_v33 }
  0x3d   : > { %526 = vmatprep.mubr.bf16.mxu0 %v1162_v2 }
  0x44   : > { %527 = vmatmul.mubr.bf16.gmra.mxu0 %v286_v36 }
  0xec   : > { %v498_v42 = vpop.f32.mrf.mxu0 }
  0xed   : > { %v1305_v43 = vadd.f32 %v498_v42, %v1302_v41 }
  0xee   : > { %v500_v45 = vpop.f32.mrf.mxu0 }
  0xef   : > { %633 = vrot.lane.b32.xlu0 %v1305_v43, %s1163_s11  ;;  %v1319_v50 = vadd.f32 %v500_v45, %v1309_v47  ;;  %v610_v45 = vld [vmem:[%s1443_s17] sm:$0xff] }
  0xf0   : > { %v502_v46 = vpop.f32.mrf.mxu0 }
  0xf1   : > { %v1312_v48 = vadd.f32 %v502_v46, %v1302_v41 }
  0xf2   : > { %v504_v49 = vpop.f32.mrf.mxu0  ;;  %v1104_v0 = vpop.f32.mrf.mxu1 }
  0xf3   : > { %651 = vrot.lane.b32.xlu1 %v1312_v48, %s1164_s7  ;;  %649 = vrot.lane.b32.xlu0 %v1305_v43, %s1164_s7  ;;  %v1322_v51 = vadd.f32 %v504_v49, %v1309_v47  ;;  %v580_v9 = vadd.f32 %v1104_v0, %v332_v6 }
  0xf4   : > { %v508_v52 = vpop.f32.mrf.mxu0  ;;  %v571_v2 = vpop.f32.mrf.mxu1 }
  0xf5   : > { %v1329_v53 = vadd.f32 %v508_v52, %v1302_v41  ;;  %v572_v10 = vadd.f32 %v571_v2, %v332_v6  ;;  %v1068_v16 = vpack.c.bf16 %v580_v9, %v580_v9  ;;  %v681_v52 = vmul.f32 %v602_v37, %v1305_v43  ;;  %v611_v2 = vld [vmem:[%s1443_s17 + $0x8] sm:$0xff] }
  0xf6   : > { %v510_v54 = vpop.f32.mrf.mxu0  ;;  %v1105_v4 = vpop.f32.mrf.mxu1  ;;  %v761_v9 = vmul.f32 %v602_v37, %v1319_v50 }
  0xf7   : > { %715 = vrot.lane.b32.xlu1 %v1322_v51, %s1163_s11  ;;  %713 = vrot.lane.b32.xlu0 %v1319_v50, %s1163_s11  ;;  %v1347_v57 = vadd.f32 %v510_v54, %v1309_v47  ;;  %v583_v11 = vadd.f32 %v1105_v4, %v332_v6  ;;  %v1066_v17 = vpack.c.bf16 %v572_v10, %v572_v10 }
  0xf8   : > { %v512_v55 = vpop.f32.mrf.mxu0  ;;  %v574_v8 = vpop.f32.mrf.mxu1  ;;  %899 = vst [vmem:[%s1388_s10 + $0x20] sm:$0xf] %v1068_v16 }
  0xf9   : > { %v1340_v56 = vadd.f32 %v512_v55, %v1302_v41  ;;  %v575_v13 = vadd.f32 %v574_v8, %v332_v6  ;;  %v1069_v18 = vpack.c.bf16 %v583_v11, %v583_v11  ;;  %897 = vst [vmem:[%s1388_s10 + $0x8] sm:$0xf] %v1066_v17 }
  0xfa   : > { %v514_v58 = vpop.f32.mrf.mxu0  ;;  %v1108_v14 = vpop.f32.mrf.mxu1 }
  0xfb   : > { %731 = vrot.lane.b32.xlu1 %v1322_v51, %s1164_s7  ;;  %729 = vrot.lane.b32.xlu0 %v1319_v50, %s1164_s7  ;;  %v1354_v60 = vadd.f32 %v514_v58, %v1309_v47  ;;  %v1067_v19 = vpack.c.bf16 %v575_v13, %v575_v13  ;;  %900 = vst [vmem:[%s1388_s10 + $0x2c] sm:$0xf] %v1069_v18 }
  0xfc   : > { %v518_v59 = vpop.f32.mrf.mxu0  ;;  %v587_v20 = vpop.f32.mrf.mxu1  ;;  %v596_v25 = vadd.f32 %v1108_v14, %v332_v6 }
  0xfd   : > { %v1357_v61 = vadd.f32 %v518_v59, %v1302_v41  ;;  %898 = vst [vmem:[%s1388_s10 + $0x14] sm:$0xf] %v1067_v19  ;;  %v588_v26 = vadd.f32 %v587_v20, %v332_v6 }
  0xfe   : > { %v520_v62 = vpop.f32.mrf.mxu0  ;;  %v1109_v23 = vpop.f32.mrf.mxu1  ;;  %v1072_v31 = vpack.c.bf16 %v596_v25, %v596_v25 }
  0xff   : > { %637 = vrot.lane.b32.xlu1 %v1329_v53, %s1163_s11  ;;  %635 = vrot.lane.b32.xlu0 %v1312_v48, %s1163_s11  ;;  %v1375_v5 = vadd.f32 %v520_v62, %v1309_v47  ;;  %v599_v27 = vadd.f32 %v1109_v23, %v332_v6  ;;  %v1070_v32 = vpack.c.bf16 %v588_v26, %v588_v26 }
 0x100   : > { %v522_v63 = vpop.f32.mrf.mxu0  ;;  %v590_v24 = vpop.f32.mrf.mxu1  ;;  %903 = vst [vmem:[%s1388_s10 + $0x50] sm:$0xf] %v1072_v31 }
 0x101   : > { %v1368_v1 = vadd.f32 %v522_v63, %v1302_v41  ;;  %v591_v29 = vadd.f32 %v590_v24, %v332_v6  ;;  %v1073_v33 = vpack.c.bf16 %v599_v27, %v599_v27  ;;  %901 = vst [vmem:[%s1388_s10 + $0x38] sm:$0xf] %v1070_v32 }
 0x102   : > { %v524_v7 = vpop.f32.mrf.mxu0 }
 0x103   : > { %639 = vrot.lane.b32.xlu1 %v1340_v56, %s1163_s11  ;;  %653 = vrot.lane.b32.xlu0 %v1329_v53, %s1164_s7  ;;  %v1383_v15 = vadd.f32 %v524_v7, %v1309_v47  ;;  %v1071_v34 = vpack.c.bf16 %v591_v29, %v591_v29  ;;  %904 = vst [vmem:[%s1388_s10 + $0x5c] sm:$0xf] %v1073_v33  ;;  %v603_v7 = vld [vmem:[%s1437_s14 + $0x8] sm:$0xff] }
 0x104   : > { %v528_v12 = vpop.f32.mrf.mxu0  ;;  %v762_v10 = vmul.f32 %v603_v7, %v1322_v51  ;;  %v612_v51 = vld [vmem:[%s1443_s17 + $0x10] sm:$0xff]  ;;  %v682_v24 = vmul.f32 %v603_v7, %v1312_v48  ;;  %v605_v33 = vld [vmem:[%s1437_s14 + $0x18] sm:$0xff] }
 0x105   : > { %v1391_v21 = vadd.f32 %v528_v12, %v1302_v41  ;;  %902 = vst [vmem:[%s1388_s10 + $0x44] sm:$0xf] %v1071_v34  ;;  %v764_v7 = vmul.f32 %v605_v33, %v1354_v60 }
 0x106   : > { %v530_v22 = vpop.f32.mrf.mxu0 }
 0x107   : > { %655 = vrot.lane.b32.xlu1 %v1340_v56, %s1164_s7  ;;  %717 = vrot.lane.b32.xlu0 %v1347_v57, %s1163_s11  ;;  %v1417_v35 = vadd.f32 %v530_v22, %v1309_v47  ;;  %v604_v22 = vld [vmem:[%s1437_s14 + $0x10] sm:$0xff] }
 0x108   : > { %v532_v28 = vpop.f32.mrf.mxu0  ;;  %v683_v29 = vmul.f32 %v604_v22, %v1329_v53 }
 0x109   : > { %v1406_v30 = vadd.f32 %v532_v28, %v1302_v41 }
 0x10a   : > { %v534_v36 = vpop.f32.mrf.mxu0 }
 0x10b   : > { %719 = vrot.lane.b32.xlu1 %v1354_v60, %s1163_s11  ;;  %733 = vrot.lane.b32.xlu0 %v1347_v57, %s1164_s7  ;;  %v1424_v38 = vadd.f32 %v534_v36, %v1309_v47  ;;  %v613_v36 = vld [vmem:[%s1443_s17 + $0x18] sm:$0xff] }
 0x10f   : > { %735 = vrot.lane.b32.xlu1 %v1354_v60, %s1164_s7  ;;  %641 = vrot.lane.b32.xlu0 %v1357_v61, %s1163_s11  ;;  %v607_v60 = vld [vmem:[%s1437_s14 + $0x28] sm:$0xff] }
 0x113   : > { %643 = vrot.lane.b32.xlu1 %v1368_v1, %s1163_s11  ;;  %657 = vrot.lane.b32.xlu0 %v1357_v61, %s1164_s7 }
 0x117   : > { %659 = vrot.lane.b32.xlu1 %v1368_v1, %s1164_s7  ;;  %721 = vrot.lane.b32.xlu0 %v1375_v5, %s1163_s11 }
 0x11b   : > { %723 = vrot.lane.b32.xlu1 %v1383_v15, %s1163_s11  ;;  %737 = vrot.lane.b32.xlu0 %v1375_v5, %s1164_s7 }
 0x11f   : > { %739 = vrot.lane.b32.xlu1 %v1383_v15, %s1164_s7  ;;  %645 = vrot.lane.b32.xlu0 %v1391_v21, %s1163_s11 }
 0x123   : > { %647 = vrot.lane.b32.xlu1 %v1406_v30, %s1163_s11  ;;  %661 = vrot.lane.b32.xlu0 %v1391_v21, %s1164_s7 }
 0x127   : > { %663 = vrot.lane.b32.xlu1 %v1406_v30, %s1164_s7  ;;  %725 = vrot.lane.b32.xlu0 %v1417_v35, %s1163_s11 }
 0x12b   : > { %727 = vrot.lane.b32.xlu1 %v1424_v38, %s1163_s11  ;;  %741 = vrot.lane.b32.xlu0 %v1417_v35, %s1164_s7 }
 0x12f   : > { %743 = vrot.lane.b32.xlu1 %v1424_v38, %s1164_s7 }
 0x161   : > { %v634_v41 = vpop.permute.xlu0 %633 }
 0x162   : > { %v665_v44 = vsub.f32 0.0, %v634_v41 }
 0x165   : > { %v652_v46 = vpop.permute.xlu1 %651  ;;  %v650_v47 = vpop.permute.xlu0 %649 }
 0x166   : > { %v673_v49 = vsel %vm1445_vm0, %v665_v44, %v650_v47  ;;  %v684_v44 = vmul.f32 %v605_v33, %v1340_v56 }
 0x167   : > { %v689_v54 = vmul.f32 %v673_v49, %v610_v45 }
 0x169   : > { %v697_v55 = vadd.f32 %v689_v54, %v681_v52  ;;  %v716_v58 = vpop.permute.xlu1 %715  ;;  %v714_v59 = vpop.permute.xlu0 %713 }
 0x16a   : > { %v746_v63 = vsub.f32 0.0, %v716_v58  ;;  %v745_v0 = vsub.f32 0.0, %v714_v59  ;;  %v763_v59 = vmul.f32 %v604_v22, %v1347_v57 }
 0x16b   : > { %v705_v62 = vmul.f32 0.17677669, %v697_v55 }
 0x16d   : > { %v1050_v3 = vpack.c.bf16 %v705_v62, %v705_v62  ;;  %v732_v4 = vpop.permute.xlu1 %731  ;;  %v730_v6 = vpop.permute.xlu0 %729 }
 0x16e   : > { %v754_v8 = vsel %vm1445_vm0, %v746_v63, %v732_v4  ;;  %v753_v43 = vsel %vm1445_vm0, %v745_v0, %v730_v6 }
 0x16f   : > { %817 = vst [vmem:[%s1388_s10] sm:$0xf] %v1050_v3  ;;  %v770_v11 = vmul.f32 %v754_v8, %v611_v2  ;;  %v769_v12 = vmul.f32 %v753_v43, %v610_v45  ;;  %v606_v43 = vld [vmem:[%s1437_s14 + $0x20] sm:$0xff] }
 0x170   : > { %v765_v33 = vmul.f32 %v606_v43, %v1375_v5 }
 0x171   : > { %v778_v13 = vadd.f32 %v770_v11, %v762_v10  ;;  %v777_v14 = vadd.f32 %v769_v12, %v761_v9  ;;  %v638_v16 = vpop.permute.xlu1 %637  ;;  %v636_v17 = vpop.permute.xlu0 %635  ;;  %v614_v10 = vld [vmem:[%s1443_s17 + $0x20] sm:$0xff] }
 0x172   : > { %v666_v18 = vsub.f32 0.0, %v636_v17  ;;  %v667_v23 = vsub.f32 0.0, %v638_v16  ;;  %v685_v16 = vmul.f32 %v606_v43, %v1357_v61 }
 0x173   : > { %v1059_v19 = vpack.c.bf16 %v778_v13, %v778_v13  ;;  %v1058_v20 = vpack.c.bf16 %v777_v14, %v777_v14 }
 0x174   : > { %v674_v50 = vsel %vm1445_vm0, %v666_v18, %v652_v46 }
 0x175   : > { %858 = vst [vmem:[%s1388_s10 + $0x10] sm:$0xf] %v1059_v19  ;;  %857 = vst [vmem:[%s1388_s10 + $0x4] sm:$0xf] %v1058_v20  ;;  %v690_v25 = vmul.f32 %v674_v50, %v611_v2  ;;  %v640_v26 = vpop.permute.xlu1 %639  ;;  %v654_v27 = vpop.permute.xlu0 %653  ;;  %v615_v20 = vld [vmem:[%s1443_s17 + $0x28] sm:$0xff] }
 0x176   : > { %v675_v28 = vsel %vm1445_vm0, %v667_v23, %v654_v27  ;;  %v668_v34 = vsub.f32 0.0, %v640_v26 }
 0x177   : > { %v698_v31 = vadd.f32 %v690_v25, %v682_v24  ;;  %v691_v32 = vmul.f32 %v675_v28, %v612_v51  ;;  %v686_v24 = vmul.f32 %v607_v60, %v1368_v1 }
 0x179   : > { %v706_v39 = vmul.f32 0.17677669, %v698_v31  ;;  %v699_v40 = vadd.f32 %v691_v32, %v683_v29  ;;  %v656_v48 = vpop.permute.xlu1 %655  ;;  %v718_v41 = vpop.permute.xlu0 %717 }
 0x17a   : > { %v676_v37 = vsel %vm1445_vm0, %v668_v34, %v656_v48  ;;  %v747_v53 = vsub.f32 0.0, %v718_v41 }
 0x17b   : > { %v1051_v45 = vpack.c.bf16 %v706_v39, %v706_v39  ;;  %v707_v46 = vmul.f32 0.17677669, %v699_v40  ;;  %v692_v47 = vmul.f32 %v676_v37, %v613_v36 }
 0x17d   : > { %818 = vst [vmem:[%s1388_s10 + $0xc] sm:$0xf] %v1051_v45  ;;  %v1052_v49 = vpack.c.bf16 %v707_v46, %v707_v46  ;;  %v700_v52 = vadd.f32 %v692_v47, %v684_v44  ;;  %v720_v54 = vpop.permute.xlu1 %719  ;;  %v734_v55 = vpop.permute.xlu0 %733  ;;  %v766_v44 = vmul.f32 %v607_v60, %v1383_v15  ;;  %v608_v46 = vld [vmem:[%s1437_s14 + $0x30] sm:$0xff]  ;;  %v609_v15 = vld [vmem:[%s1437_s14 + $0x38] sm:$0xff] }
 0x17e   : > { %v755_v58 = vsel %vm1445_vm0, %v747_v53, %v734_v55  ;;  %v748_v63 = vsub.f32 0.0, %v720_v54  ;;  %v616_v53 = vld [vmem:[%s1443_s17 + $0x30] sm:$0xff] }
 0x17f   : > { %819 = vst [vmem:[%s1388_s10 + $0x18] sm:$0xf] %v1052_v49  ;;  %v708_v56 = vmul.f32 0.17677669, %v700_v52  ;;  %v771_v62 = vmul.f32 %v755_v58, %v612_v51  ;;  %v687_v58 = vmul.f32 %v608_v46, %v1391_v21 }
 0x181   : > { %v1053_v0 = vpack.c.bf16 %v708_v56, %v708_v56  ;;  %v779_v2 = vadd.f32 %v771_v62, %v763_v59  ;;  %v736_v3 = vpop.permute.xlu1 %735  ;;  %v642_v4 = vpop.permute.xlu0 %641 }
 0x182   : > { %v756_v6 = vsel %vm1445_vm0, %v748_v63, %v736_v3  ;;  %v669_v9 = vsub.f32 0.0, %v642_v4  ;;  %v617_v63 = vld [vmem:[%s1443_s17 + $0x38] sm:$0xff] }
 0x183   : > { %820 = vst [vmem:[%s1388_s10 + $0x24] sm:$0xf] %v1053_v0  ;;  %v1060_v8 = vpack.c.bf16 %v779_v2, %v779_v2  ;;  %v772_v57 = vmul.f32 %v756_v6, %v613_v36  ;;  %v688_v6 = vmul.f32 %v609_v15, %v1406_v30 }
 0x185   : > { %859 = vst [vmem:[%s1388_s10 + $0x1c] sm:$0xf] %v1060_v8  ;;  %v780_v11 = vadd.f32 %v772_v57, %v764_v7  ;;  %v644_v12 = vpop.permute.xlu1 %643  ;;  %v658_v13 = vpop.permute.xlu0 %657 }
 0x186   : > { %v677_v14 = vsel %vm1445_vm0, %v669_v9, %v658_v13  ;;  %v670_v19 = vsub.f32 0.0, %v644_v12  ;;  %v767_v12 = vmul.f32 %v608_v46, %v1417_v35 }
 0x187   : > { %v1061_v17 = vpack.c.bf16 %v780_v11, %v780_v11  ;;  %v693_v18 = vmul.f32 %v677_v14, %v614_v10 }
 0x189   : > { %860 = vst [vmem:[%s1388_s10 + $0x28] sm:$0xf] %v1061_v17  ;;  %v701_v22 = vadd.f32 %v693_v18, %v685_v16  ;;  %v660_v23 = vpop.permute.xlu1 %659  ;;  %v722_v50 = vpop.permute.xlu0 %721 }
 0x18a   : > { %v678_v51 = vsel %vm1445_vm0, %v670_v19, %v660_v23  ;;  %v749_v27 = vsub.f32 0.0, %v722_v50  ;;  %v768_v19 = vmul.f32 %v609_v15, %v1424_v38 }
 0x18b   : > { %v709_v25 = vmul.f32 0.17677669, %v701_v22  ;;  %v694_v26 = vmul.f32 %v678_v51, %v615_v20 }
 0x18d   : > { %v1054_v28 = vpack.c.bf16 %v709_v25, %v709_v25  ;;  %v702_v61 = vadd.f32 %v694_v26, %v686_v24  ;;  %v724_v29 = vpop.permute.xlu1 %723  ;;  %v738_v31 = vpop.permute.xlu0 %737 }
 0x18e   : > { %v757_v32 = vsel %vm1445_vm0, %v749_v27, %v738_v31  ;;  %v750_v1 = vsub.f32 0.0, %v724_v29 }
 0x18f   : > { %821 = vst [vmem:[%s1388_s10 + $0x30] sm:$0xf] %v1054_v28  ;;  %v710_v34 = vmul.f32 0.17677669, %v702_v61  ;;  %v773_v36 = vmul.f32 %v757_v32, %v614_v10 }
 0x191   : > { %v1055_v39 = vpack.c.bf16 %v710_v34, %v710_v34  ;;  %v781_v40 = vadd.f32 %v773_v36, %v765_v33  ;;  %v740_v48 = vpop.permute.xlu1 %739  ;;  %v646_v41 = vpop.permute.xlu0 %645 }
 0x192   : > { %v758_v37 = vsel %vm1445_vm0, %v750_v1, %v740_v48  ;;  %v671_v47 = vsub.f32 0.0, %v646_v41 }
 0x193   : > { %822 = vst [vmem:[%s1388_s10 + $0x3c] sm:$0xf] %v1055_v39  ;;  %v1062_v45 = vpack.c.bf16 %v781_v40, %v781_v40  ;;  %v774_v5 = vmul.f32 %v758_v37, %v615_v20 }
 0x195   : > { %861 = vst [vmem:[%s1388_s10 + $0x34] sm:$0xf] %v1062_v45  ;;  %v782_v49 = vadd.f32 %v774_v5, %v766_v44  ;;  %v648_v52 = vpop.permute.xlu1 %647  ;;  %v662_v54 = vpop.permute.xlu0 %661 }
 0x196   : > { %v679_v55 = vsel %vm1445_vm0, %v671_v47, %v662_v54  ;;  %v672_v62 = vsub.f32 0.0, %v648_v52 }
 0x197   : > { %v1063_v59 = vpack.c.bf16 %v782_v49, %v782_v49  ;;  %v695_v56 = vmul.f32 %v679_v55, %v616_v53 }
 0x199   : > { %862 = vst [vmem:[%s1388_s10 + $0x40] sm:$0xf] %v1063_v59  ;;  %v703_v0 = vadd.f32 %v695_v56, %v687_v58  ;;  %v664_v2 = vpop.permute.xlu1 %663  ;;  %v726_v3 = vpop.permute.xlu0 %725 }
 0x19a   : > { %v680_v4 = vsel %vm1445_vm0, %v672_v62, %v664_v2  ;;  %v751_v57 = vsub.f32 0.0, %v726_v3 }
 0x19b   : > { %v711_v7 = vmul.f32 0.17677669, %v703_v0  ;;  %v696_v8 = vmul.f32 %v680_v4, %v617_v63 }
 0x19d   : > { %v1056_v21 = vpack.c.bf16 %v711_v7, %v711_v7  ;;  %v704_v43 = vadd.f32 %v696_v8, %v688_v6  ;;  %v728_v9 = vpop.permute.xlu1 %727  ;;  %v742_v10 = vpop.permute.xlu0 %741 }
 0x19e   : > { %v759_v11 = vsel %vm1445_vm0, %v751_v57, %v742_v10  ;;  %v752_v16 = vsub.f32 0.0, %v728_v9 }
 0x19f   : > { %823 = vst [vmem:[%s1388_s10 + $0x48] sm:$0xf] %v1056_v21  ;;  %v712_v13 = vmul.f32 0.17677669, %v704_v43  ;;  %v775_v14 = vmul.f32 %v759_v11, %v616_v53 }
 0x1a1   : > { %v1057_v30 = vpack.c.bf16 %v712_v13, %v712_v13  ;;  %v783_v17 = vadd.f32 %v775_v14, %v767_v12  ;;  %v744_v18 = vpop.permute.xlu1 %743 }
 0x1a2   : > { %v760_v60 = vsel %vm1445_vm0, %v752_v16, %v744_v18 }
 0x1a3   : > { %824 = vst [vmem:[%s1388_s10 + $0x54] sm:$0xf] %v1057_v30  ;;  %v1064_v20 = vpack.c.bf16 %v783_v17, %v783_v17  ;;  %v776_v22 = vmul.f32 %v760_v60, %v617_v63 }
 0x1a5   : > { %863 = vst [vmem:[%s1388_s10 + $0x4c] sm:$0xf] %v1064_v20  ;;  %v784_v23 = vadd.f32 %v776_v22, %v768_v19 }
 0x1a7   : > { %v1065_v50 = vpack.c.bf16 %v784_v23, %v784_v23 }
 0x1a9   : > { %864 = vst [vmem:[%s1388_s10 + $0x58] sm:$0xf] %v1065_v50 }
 0x1aa PF: > { %s15_s18 = sadd.s32 1, %s1160_s18  }
 0x1ab   : > { %p12_p4 = scmp.ge.s32.totalorder %s15_s18, 4  }
 0x1ad   :  { %14 = sbr.rel (!%p12_p4) target bundleno = 1 (0x1), region = 76 }

// kernel: gpt_neox_attention.3
= control target key start
LH: loop header
LB: loop body
LE: loop exit
PB: predicated region body
PF: predicated region fallthrough
CT: control target
= control target key end

     0   :  { %10 = vsyncpa [#allocation9], 0  ;;  %s6407_s0 = inlined_call_operand.vmem [shape: bf16[4,128,32], index: 0, kind: input, shape index: {}]   ;;  %s6408_s1 = inlined_call_operand.vmem [shape: bf16[4,128,32], index: 1, kind: input, shape index: {}]   ;;  %s6409_s2 = inlined_call_operand.vmem [shape: bf16[4,128,32], index: 2, kind: input, shape index: {}]   ;;  %s6410_s3 = inlined_call_operand.vmem [shape: bf16[128,128], index: 3, kind: input, shape index: {}]   ;;  %s6411_s4 = inlined_call_operand.vmem [shape: f32[1,128], index: 4, kind: input, shape index: {}]   ;;  %s6412_s5 = inlined_call_operand.hbm [shape: f32[128,128], index: 5, kind: output, shape index: {}]  }
   0x1   :  { %12 = vsyncpa [#allocation9 + $0x1], 0  ;;  %s4822_s18 = smov 0   ;;  %s4824_s19 = smov 0  }
   0x2   :  { %s4826_s20 = smov 0   ;;  %s4828_s21 = smov 0  }
   0x3   :  { %s4830_s22 = smov 0   ;;  %s4832_s23 = smov 0  }
   0x4   :  { %s4834_s24 = smov 0   ;;  %s4836_s25 = smov 0  }
   0x5   :  { %s4838_s26 = smov 0   ;;  %s4840_s27 = smov 0  }
   0x6 LB: > { %s3913_s28 = sadd.s32 4294967295, %s4783_s27   ;;  %s3914_s29 = sadd.s32 4294967294, %s4783_s27   ;;  %s4783_s27 = sphi %s4840_s27, %s18_s27   ;;  %s4779_s26 = sphi %s4838_s26, %s6560_s26   ;;  %s4775_s25 = sphi %s4836_s25, %s6559_s25   ;;  %s4771_s24 = sphi %s4834_s24, %s6558_s24   ;;  %s4767_s23 = sphi %s4832_s23, %s6557_s23   ;;  %s4763_s22 = sphi %s4830_s22, %s6556_s22   ;;  %s4759_s21 = sphi %s4828_s21, %s6555_s21   ;;  %s4755_s20 = sphi %s4826_s20, %s6554_s20   ;;  %s4751_s19 = sphi %s4824_s19, %s6553_s19   ;;  %s4747_s18 = sphi %s4822_s18, %s6552_s18  }
   0x7   : > { %s27_s30 = sadd.s32 1, %s4775_s25  ;;  %s30_s6 = sadd.s32 1, %s4779_s26 }
   0x8   : > { %p28_p0 = scmp.ge.s32.totalorder %s27_s30, 2  ;;  %s37_s7 = sadd.s32 1, %s4763_s22 }
   0x9   : > { %p44_p1 = scmp.ne.s32.totalorder %s4763_s22, %s4759_s21  ;;  %p45_p2 = scmp.eq.s32.totalorder %s4783_s27, 0 }
   0xa   : > { %s6562_s30 = smov (%p28_p0, %s27_s30), 0  ;;  %s6564_s6 = smov (!%p28_p0, %s30_s6), %s4779_s26 }
   0xb   : > { %p4886_p3 = por %p45_p2, %p44_p1  ;;  %s60_s9 = ssub.s32 %s4775_s25, %s6562_s30 }
   0xc   : > { %p32_p4 = scmp.ge.s32.totalorder %s6564_s6, 2  ;;  %p61_p5 = scmp.eq.s32.totalorder %s60_s9, 0 }
   0xd   : > { %s63_s10 = sadd.s32 1, %s4755_s20  ;;  %p70_p6 = scmp.ne.s32.totalorder %s4755_s20, %s4751_s19 }
   0xe   : > { %s6566_s6 = smov (%p32_p4, %s6564_s6), 0  ;;  %p168_p9 = scmp.eq.s32.totalorder %s3913_s28, 3 }
   0xf   : > { %s4898_s11 = scalar_select %p61_p5, %s4755_s20, %s63_s10  }
  0x10   : > { %s34_s12 = ssub.s32 %s4779_s26, %s6566_s6  ;;  %p4902_p7 = por %p70_p6, %p45_p2 }
  0x11   : > { %p35_p8 = scmp.eq.s32.totalorder %s34_s12, 0  ;;  %p173_p10 = scmp.ne.s32.totalorder %s4759_s21, %s4747_s18 }
  0x12   : > { %p174_p11 = scmp.eq.s32.totalorder %s3914_s29, 3  ;;  %p4914_p12 = por %p168_p9, %p44_p1 }
  0x13   : > { %s4909_s14 = scalar_select %p35_p8, %s4763_s22, %s37_s7  }
  0x14   : > { %p4918_p13 = por %p174_p11, %p173_p10  ;;  %p3916_p0 = scmp.ge.s32.totalorder %s4783_s27, 4 }
  0x16   : > { %196 = sbr.rel (%p3916_p0) target bundleno = 63 (0x3f), region = 24 }
  0x1b   : > { %199 = sbr.rel (!%p4886_p3) target bundleno = 39 (0x27), region = 28  ;;  %s201_s17 = sand.u32 (%p4886_p3), 1, %s4763_s22  }
  0x1c   : > { %s4046_s28 = sshll.u32 (%p4886_p3), %s4779_s26, 5  ;;  %s3917_s29 = sshll.u32 (%p4886_p3), %s201_s17, 7 }
  0x1d   : > { %s4930_s10 = scalar_lea.vmem (%p4886_p3), %s6407_s0, %s4046_s28  ;;  %s203_s8 = scalar_lea.vmem (%p4886_p3), [#allocation5], %s3917_s29 }
  0x1e   : > { %v223_v0 = vld [vmem:[%s4930_s10] sm:$0xff] (%p4886_p3)   ;;  %v227_v1 = vld [vmem:[%s4930_s10 + $0x8] sm:$0xff] (%p4886_p3)   ;;  %v231_v2 = vld [vmem:[%s4930_s10 + $0x10] sm:$0xff] (%p4886_p3)  }
  0x1f   : > { %224 = vst [vmem:[%s203_s8] sm:$0xff] (%p4886_p3), %v223_v0   ;;  %228 = vst [vmem:[%s203_s8 + $0x8] sm:$0xff] (%p4886_p3), %v227_v1   ;;  %v235_v3 = vld [vmem:[%s4930_s10 + $0x18] sm:$0xff] (%p4886_p3)   ;;  %v239_v4 = vld [vmem:[%s4930_s10 + $0x40] sm:$0xff] (%p4886_p3)  }
  0x20   : > { %232 = vst [vmem:[%s203_s8 + $0x10] sm:$0xff] %v231_v2   ;;  %v243_v5 = vld [vmem:[%s4930_s10 + $0x48] sm:$0xff]   ;;  %236 = vst [vmem:[%s203_s8 + $0x18] sm:$0xff] %v235_v3   ;;  %v247_v6 = vld [vmem:[%s4930_s10 + $0x50] sm:$0xff]  }
  0x21   : > { %240 = vst [vmem:[%s203_s8 + $0x20] sm:$0xff] %v239_v4   ;;  %244 = vst [vmem:[%s203_s8 + $0x28] sm:$0xff] %v243_v5   ;;  %v251_v7 = vld [vmem:[%s4930_s10 + $0x58] sm:$0xff]   ;;  %v255_v8 = vld [vmem:[%s4930_s10 + $0x80] sm:$0xff]  }
  0x22   : > { %248 = vst [vmem:[%s203_s8 + $0x30] sm:$0xff] %v247_v6   ;;  %252 = vst [vmem:[%s203_s8 + $0x38] sm:$0xff] %v251_v7   ;;  %v259_v9 = vld [vmem:[%s4930_s10 + $0x88] sm:$0xff]   ;;  %v263_v10 = vld [vmem:[%s4930_s10 + $0x90] sm:$0xff]  }
  0x23   : > { %256 = vst [vmem:[%s203_s8 + $0x40] sm:$0xff] %v255_v8   ;;  %v267_v11 = vld [vmem:[%s4930_s10 + $0x98] sm:$0xff]   ;;  %260 = vst [vmem:[%s203_s8 + $0x48] sm:$0xff] %v259_v9   ;;  %v271_v12 = vld [vmem:[%s4930_s10 + $0xc0] sm:$0xff]  }
  0x24   : > { %264 = vst [vmem:[%s203_s8 + $0x50] sm:$0xff] %v263_v10   ;;  %268 = vst [vmem:[%s203_s8 + $0x58] sm:$0xff] %v267_v11   ;;  %v275_v13 = vld [vmem:[%s4930_s10 + $0xc8] sm:$0xff]   ;;  %v279_v14 = vld [vmem:[%s4930_s10 + $0xd0] sm:$0xff]  }
  0x25   : > { %272 = vst [vmem:[%s203_s8 + $0x60] sm:$0xff] %v271_v12   ;;  %276 = vst [vmem:[%s203_s8 + $0x68] sm:$0xff] %v275_v13   ;;  %v283_v15 = vld [vmem:[%s4930_s10 + $0xd8] sm:$0xff]  }
  0x26   : > { %280 = vst [vmem:[%s203_s8 + $0x70] sm:$0xff] %v279_v14   ;;  %284 = vst [vmem:[%s203_s8 + $0x78] sm:$0xff] %v283_v15  }
  0x27 PF: > { %374 = sbr.rel (!%p4902_p7) target bundleno = 51 (0x33), region = 69  ;;  %s376_s12 = sand.u32 (%p4902_p7), 1, %s4755_s20  }
  0x28   : > { %s4047_s17 = sshll.u32 (%p4902_p7), %s4775_s25, 5  ;;  %s3920_s28 = sshll.u32 (%p4902_p7), %s376_s12, 7 }
  0x29   : > { %s4955_s9 = scalar_lea.vmem (%p4902_p7), %s6408_s1, %s4047_s17  ;;  %s378_s10 = scalar_lea.vmem (%p4902_p7), [#allocation6], %s3920_s28 }
  0x2a   : > { %v398_v16 = vld [vmem:[%s4955_s9] sm:$0xff] (%p4902_p7)   ;;  %v402_v17 = vld [vmem:[%s4955_s9 + $0x8] sm:$0xff] (%p4902_p7)   ;;  %v406_v18 = vld [vmem:[%s4955_s9 + $0x10] sm:$0xff] (%p4902_p7)  }
  0x2b   : > { %399 = vst [vmem:[%s378_s10] sm:$0xff] (%p4902_p7), %v398_v16   ;;  %403 = vst [vmem:[%s378_s10 + $0x8] sm:$0xff] (%p4902_p7), %v402_v17   ;;  %v410_v19 = vld [vmem:[%s4955_s9 + $0x18] sm:$0xff] (%p4902_p7)   ;;  %v414_v20 = vld [vmem:[%s4955_s9 + $0x40] sm:$0xff] (%p4902_p7)  }
  0x2c   : > { %407 = vst [vmem:[%s378_s10 + $0x10] sm:$0xff] %v406_v18   ;;  %v418_v21 = vld [vmem:[%s4955_s9 + $0x48] sm:$0xff]   ;;  %411 = vst [vmem:[%s378_s10 + $0x18] sm:$0xff] %v410_v19   ;;  %v422_v22 = vld [vmem:[%s4955_s9 + $0x50] sm:$0xff]  }
  0x2d   : > { %415 = vst [vmem:[%s378_s10 + $0x20] sm:$0xff] %v414_v20   ;;  %419 = vst [vmem:[%s378_s10 + $0x28] sm:$0xff] %v418_v21   ;;  %v426_v23 = vld [vmem:[%s4955_s9 + $0x58] sm:$0xff]   ;;  %v430_v24 = vld [vmem:[%s4955_s9 + $0x80] sm:$0xff]  }
  0x2e   : > { %423 = vst [vmem:[%s378_s10 + $0x30] sm:$0xff] %v422_v22   ;;  %427 = vst [vmem:[%s378_s10 + $0x38] sm:$0xff] %v426_v23   ;;  %v434_v25 = vld [vmem:[%s4955_s9 + $0x88] sm:$0xff]   ;;  %v438_v26 = vld [vmem:[%s4955_s9 + $0x90] sm:$0xff]  }
  0x2f   : > { %431 = vst [vmem:[%s378_s10 + $0x40] sm:$0xff] %v430_v24   ;;  %v442_v27 = vld [vmem:[%s4955_s9 + $0x98] sm:$0xff]   ;;  %435 = vst [vmem:[%s378_s10 + $0x48] sm:$0xff] %v434_v25   ;;  %v446_v28 = vld [vmem:[%s4955_s9 + $0xc0] sm:$0xff]  }
  0x30   : > { %439 = vst [vmem:[%s378_s10 + $0x50] sm:$0xff] %v438_v26   ;;  %443 = vst [vmem:[%s378_s10 + $0x58] sm:$0xff] %v442_v27   ;;  %v450_v29 = vld [vmem:[%s4955_s9 + $0xc8] sm:$0xff]   ;;  %v454_v30 = vld [vmem:[%s4955_s9 + $0xd0] sm:$0xff]  }
  0x31   : > { %447 = vst [vmem:[%s378_s10 + $0x60] sm:$0xff] %v446_v28   ;;  %451 = vst [vmem:[%s378_s10 + $0x68] sm:$0xff] %v450_v29   ;;  %v458_v31 = vld [vmem:[%s4955_s9 + $0xd8] sm:$0xff]  }
  0x32   : > { %455 = vst [vmem:[%s378_s10 + $0x70] sm:$0xff] %v454_v30   ;;  %459 = vst [vmem:[%s378_s10 + $0x78] sm:$0xff] %v458_v31  }
  0x33 PF: > { %549 = sbr.rel (!%p4902_p7) target bundleno = 63 (0x3f), region = 110  ;;  %s551_s8 = sand.u32 (%p4902_p7), 1, %s4755_s20  }
  0x34   : > { %s4048_s12 = sshll.u32 (%p4902_p7), %s4775_s25, 5  ;;  %s3923_s17 = sshll.u32 (%p4902_p7), %s551_s8, 7 }
  0x35   : > { %s4980_s7 = scalar_lea.vmem (%p4902_p7), %s6409_s2, %s4048_s12  ;;  %s553_s13 = scalar_lea.vmem (%p4902_p7), [#allocation7], %s3923_s17 }
  0x36   : > { %v573_v32 = vld [vmem:[%s4980_s7] sm:$0xff] (%p4902_p7)   ;;  %v577_v33 = vld [vmem:[%s4980_s7 + $0x8] sm:$0xff] (%p4902_p7)   ;;  %v581_v34 = vld [vmem:[%s4980_s7 + $0x10] sm:$0xff] (%p4902_p7)  }
  0x37   : > { %574 = vst [vmem:[%s553_s13] sm:$0xff] (%p4902_p7), %v573_v32   ;;  %578 = vst [vmem:[%s553_s13 + $0x8] sm:$0xff] (%p4902_p7), %v577_v33   ;;  %v585_v35 = vld [vmem:[%s4980_s7 + $0x18] sm:$0xff] (%p4902_p7)   ;;  %v589_v36 = vld [vmem:[%s4980_s7 + $0x40] sm:$0xff] (%p4902_p7)  }
  0x38   : > { %582 = vst [vmem:[%s553_s13 + $0x10] sm:$0xff] %v581_v34   ;;  %v593_v37 = vld [vmem:[%s4980_s7 + $0x48] sm:$0xff]   ;;  %586 = vst [vmem:[%s553_s13 + $0x18] sm:$0xff] %v585_v35   ;;  %v597_v38 = vld [vmem:[%s4980_s7 + $0x50] sm:$0xff]  }
  0x39   : > { %590 = vst [vmem:[%s553_s13 + $0x20] sm:$0xff] %v589_v36   ;;  %594 = vst [vmem:[%s553_s13 + $0x28] sm:$0xff] %v593_v37   ;;  %v601_v39 = vld [vmem:[%s4980_s7 + $0x58] sm:$0xff]   ;;  %v605_v40 = vld [vmem:[%s4980_s7 + $0x80] sm:$0xff]  }
  0x3a   : > { %598 = vst [vmem:[%s553_s13 + $0x30] sm:$0xff] %v597_v38   ;;  %602 = vst [vmem:[%s553_s13 + $0x38] sm:$0xff] %v601_v39   ;;  %v609_v41 = vld [vmem:[%s4980_s7 + $0x88] sm:$0xff]   ;;  %v613_v42 = vld [vmem:[%s4980_s7 + $0x90] sm:$0xff]  }
  0x3b   : > { %606 = vst [vmem:[%s553_s13 + $0x40] sm:$0xff] %v605_v40   ;;  %v617_v43 = vld [vmem:[%s4980_s7 + $0x98] sm:$0xff]   ;;  %610 = vst [vmem:[%s553_s13 + $0x48] sm:$0xff] %v609_v41   ;;  %v621_v44 = vld [vmem:[%s4980_s7 + $0xc0] sm:$0xff]  }
  0x3c   : > { %614 = vst [vmem:[%s553_s13 + $0x50] sm:$0xff] %v613_v42   ;;  %618 = vst [vmem:[%s553_s13 + $0x58] sm:$0xff] %v617_v43   ;;  %v625_v45 = vld [vmem:[%s4980_s7 + $0xc8] sm:$0xff]   ;;  %v629_v46 = vld [vmem:[%s4980_s7 + $0xd0] sm:$0xff]  }
  0x3d   : > { %622 = vst [vmem:[%s553_s13 + $0x60] sm:$0xff] %v621_v44   ;;  %626 = vst [vmem:[%s553_s13 + $0x68] sm:$0xff] %v625_v45   ;;  %v633_v47 = vld [vmem:[%s4980_s7 + $0xd8] sm:$0xff]  }
  0x3e   : > { %630 = vst [vmem:[%s553_s13 + $0x70] sm:$0xff] %v629_v46   ;;  %634 = vst [vmem:[%s553_s13 + $0x78] sm:$0xff] %v633_v47  }
  0x3f PF: > { %p3926_p1 = scmp.ge.s32.totalorder %s4783_s27, 1  ;;  %p723_p2 = scmp.lt.s32.totalorder %s4783_s27, 5 }
  0x41   : > { %p724_p3 = pnand %p3926_p1, %p723_p2 }
  0x42   : > { %s5001_s9 = sand.u32 (!%p724_p3), 1, %s4759_s21   ;;  %s737_s10 = sand.u32 (!%p724_p3), 1, %s4751_s19  }
  0x43   : > { %727 = sbr.rel (%p724_p3) target bundleno = 1361 (0x551), region = 151  ;;  %s3927_s8 = sshll.u32 (!%p724_p3), %s5001_s9, 7 }
  0x44   : > { %s3928_s12 = sshll.u32 (!%p724_p3), %s737_s10, 7  ;;  %s3930_s17 = sshll.u32 (!%p724_p3), %s5001_s9, 6 }
  0x45   : > { %s5006_s28 = scalar_lea.vmem (!%p724_p3), [#allocation5], %s3927_s8  ;;  %s5008_s29 = scalar_lea.vmem (!%p724_p3), [#allocation6], %s3928_s12 }
  0x46   : > { %s5010_s7 = scalar_lea.vmem (!%p724_p3), [#allocation7], %s3928_s12  ;;  %s5012_s13 = scalar_lea.vmem (!%p724_p3), [#allocation8], %s3930_s17 }
  0x47   : > { %p3931_p4 = scmp.ne.s32.totalorder (!%p724_p3), %s4767_s23, 0 }
  0x49   : > { %787 = sbr.rel (%p3931_p4) target bundleno = 127 (0x7f), region = 167 }
  0x4e   : > { %vm788_vm0 = vcmask 7168   ;;  %vm853_vm1 = vcmask 261120   ;;  %v4785_v48 = vmov -1e+30   ;;  %v4786_v49 = vmov 0.0  }
  0x4f   : > { %789 = vst.msk [vmem:[#allocation2] sm:$0xff] %vm788_vm0, %v4785_v48  ;;  %790 = vst.msk [vmem:[#allocation2 + $0x8] sm:$0xff] %vm788_vm0, %v4785_v48 }
  0x50   : > { %791 = vst.msk [vmem:[#allocation2 + $0x10] sm:$0xff] %vm788_vm0, %v4785_v48  ;;  %792 = vst.msk [vmem:[#allocation2 + $0x18] sm:$0xff] %vm788_vm0, %v4785_v48 }
  0x51   : > { %793 = vst.msk [vmem:[#allocation2 + $0x20] sm:$0xff] %vm788_vm0, %v4785_v48  ;;  %794 = vst.msk [vmem:[#allocation2 + $0x28] sm:$0xff] %vm788_vm0, %v4785_v48 }
  0x52   : > { %795 = vst.msk [vmem:[#allocation2 + $0x30] sm:$0xff] %vm788_vm0, %v4785_v48  ;;  %796 = vst.msk [vmem:[#allocation2 + $0x38] sm:$0xff] %vm788_vm0, %v4785_v48 }
  0x53   : > { %797 = vst.msk [vmem:[#allocation2 + $0x40] sm:$0xff] %vm788_vm0, %v4785_v48  ;;  %798 = vst.msk [vmem:[#allocation2 + $0x48] sm:$0xff] %vm788_vm0, %v4785_v48 }
  0x54   : > { %799 = vst.msk [vmem:[#allocation2 + $0x50] sm:$0xff] %vm788_vm0, %v4785_v48  ;;  %800 = vst.msk [vmem:[#allocation2 + $0x58] sm:$0xff] %vm788_vm0, %v4785_v48 }
  0x55   : > { %801 = vst.msk [vmem:[#allocation2 + $0x60] sm:$0xff] %vm788_vm0, %v4785_v48  ;;  %802 = vst.msk [vmem:[#allocation2 + $0x68] sm:$0xff] %vm788_vm0, %v4785_v48 }
  0x56   : > { %803 = vst.msk [vmem:[#allocation2 + $0x70] sm:$0xff] %vm788_vm0, %v4785_v48  ;;  %804 = vst.msk [vmem:[#allocation2 + $0x78] sm:$0xff] %vm788_vm0, %v4785_v48 }
  0x57   : > { %805 = vst.msk [vmem:[#allocation2 + $0x80] sm:$0xff] %vm788_vm0, %v4785_v48  ;;  %806 = vst.msk [vmem:[#allocation2 + $0x88] sm:$0xff] %vm788_vm0, %v4785_v48 }
  0x58   : > { %807 = vst.msk [vmem:[#allocation2 + $0x90] sm:$0xff] %vm788_vm0, %v4785_v48  ;;  %808 = vst.msk [vmem:[#allocation2 + $0x98] sm:$0xff] %vm788_vm0, %v4785_v48 }
  0x59   : > { %809 = vst.msk [vmem:[#allocation2 + $0xa0] sm:$0xff] %vm788_vm0, %v4785_v48  ;;  %810 = vst.msk [vmem:[#allocation2 + $0xa8] sm:$0xff] %vm788_vm0, %v4785_v48 }
  0x5a   : > { %811 = vst.msk [vmem:[#allocation2 + $0xb0] sm:$0xff] %vm788_vm0, %v4785_v48  ;;  %812 = vst.msk [vmem:[#allocation2 + $0xb8] sm:$0xff] %vm788_vm0, %v4785_v48 }
  0x5b   : > { %813 = vst.msk [vmem:[#allocation2 + $0xc0] sm:$0xff] %vm788_vm0, %v4785_v48  ;;  %814 = vst.msk [vmem:[#allocation2 + $0xc8] sm:$0xff] %vm788_vm0, %v4785_v48 }
  0x5c   : > { %815 = vst.msk [vmem:[#allocation2 + $0xd0] sm:$0xff] %vm788_vm0, %v4785_v48  ;;  %816 = vst.msk [vmem:[#allocation2 + $0xd8] sm:$0xff] %vm788_vm0, %v4785_v48 }
  0x5d   : > { %817 = vst.msk [vmem:[#allocation2 + $0xe0] sm:$0xff] %vm788_vm0, %v4785_v48  ;;  %818 = vst.msk [vmem:[#allocation2 + $0xe8] sm:$0xff] %vm788_vm0, %v4785_v48 }
  0x5e   : > { %819 = vst.msk [vmem:[#allocation2 + $0xf0] sm:$0xff] %vm788_vm0, %v4785_v48  ;;  %820 = vst.msk [vmem:[#allocation2 + $0xf8] sm:$0xff] %vm788_vm0, %v4785_v48 }
  0x5f   : > { %821 = vst.msk [vmem:[#allocation3] sm:$0xff] %vm788_vm0, %v4786_v49  ;;  %822 = vst.msk [vmem:[#allocation3 + $0x8] sm:$0xff] %vm788_vm0, %v4786_v49 }
  0x60   : > { %823 = vst.msk [vmem:[#allocation3 + $0x10] sm:$0xff] %vm788_vm0, %v4786_v49  ;;  %824 = vst.msk [vmem:[#allocation3 + $0x18] sm:$0xff] %vm788_vm0, %v4786_v49 }
  0x61   : > { %825 = vst.msk [vmem:[#allocation3 + $0x20] sm:$0xff] %vm788_vm0, %v4786_v49  ;;  %826 = vst.msk [vmem:[#allocation3 + $0x28] sm:$0xff] %vm788_vm0, %v4786_v49 }
  0x62   : > { %827 = vst.msk [vmem:[#allocation3 + $0x30] sm:$0xff] %vm788_vm0, %v4786_v49  ;;  %828 = vst.msk [vmem:[#allocation3 + $0x38] sm:$0xff] %vm788_vm0, %v4786_v49 }
  0x63   : > { %829 = vst.msk [vmem:[#allocation3 + $0x40] sm:$0xff] %vm788_vm0, %v4786_v49  ;;  %830 = vst.msk [vmem:[#allocation3 + $0x48] sm:$0xff] %vm788_vm0, %v4786_v49 }
  0x64   : > { %831 = vst.msk [vmem:[#allocation3 + $0x50] sm:$0xff] %vm788_vm0, %v4786_v49  ;;  %832 = vst.msk [vmem:[#allocation3 + $0x58] sm:$0xff] %vm788_vm0, %v4786_v49 }
  0x65   : > { %833 = vst.msk [vmem:[#allocation3 + $0x60] sm:$0xff] %vm788_vm0, %v4786_v49  ;;  %834 = vst.msk [vmem:[#allocation3 + $0x68] sm:$0xff] %vm788_vm0, %v4786_v49 }
  0x66   : > { %835 = vst.msk [vmem:[#allocation3 + $0x70] sm:$0xff] %vm788_vm0, %v4786_v49  ;;  %836 = vst.msk [vmem:[#allocation3 + $0x78] sm:$0xff] %vm788_vm0, %v4786_v49 }
  0x67   : > { %837 = vst.msk [vmem:[#allocation3 + $0x80] sm:$0xff] %vm788_vm0, %v4786_v49  ;;  %838 = vst.msk [vmem:[#allocation3 + $0x88] sm:$0xff] %vm788_vm0, %v4786_v49 }
  0x68   : > { %839 = vst.msk [vmem:[#allocation3 + $0x90] sm:$0xff] %vm788_vm0, %v4786_v49  ;;  %840 = vst.msk [vmem:[#allocation3 + $0x98] sm:$0xff] %vm788_vm0, %v4786_v49 }
  0x69   : > { %841 = vst.msk [vmem:[#allocation3 + $0xa0] sm:$0xff] %vm788_vm0, %v4786_v49  ;;  %842 = vst.msk [vmem:[#allocation3 + $0xa8] sm:$0xff] %vm788_vm0, %v4786_v49 }
  0x6a   : > { %843 = vst.msk [vmem:[#allocation3 + $0xb0] sm:$0xff] %vm788_vm0, %v4786_v49  ;;  %844 = vst.msk [vmem:[#allocation3 + $0xb8] sm:$0xff] %vm788_vm0, %v4786_v49 }
  0x6b   : > { %845 = vst.msk [vmem:[#allocation3 + $0xc0] sm:$0xff] %vm788_vm0, %v4786_v49  ;;  %846 = vst.msk [vmem:[#allocation3 + $0xc8] sm:$0xff] %vm788_vm0, %v4786_v49 }
  0x6c   : > { %847 = vst.msk [vmem:[#allocation3 + $0xd0] sm:$0xff] %vm788_vm0, %v4786_v49  ;;  %848 = vst.msk [vmem:[#allocation3 + $0xd8] sm:$0xff] %vm788_vm0, %v4786_v49 }
  0x6d   : > { %849 = vst.msk [vmem:[#allocation3 + $0xe0] sm:$0xff] %vm788_vm0, %v4786_v49  ;;  %850 = vst.msk [vmem:[#allocation3 + $0xe8] sm:$0xff] %vm788_vm0, %v4786_v49 }
  0x6e   : > { %851 = vst.msk [vmem:[#allocation3 + $0xf0] sm:$0xff] %vm788_vm0, %v4786_v49  ;;  %852 = vst.msk [vmem:[#allocation3 + $0xf8] sm:$0xff] %vm788_vm0, %v4786_v49 }
  0x6f   : > { %854 = vst.msk [vmem:[#allocation4] sm:$0xff] %vm853_vm1, %v4786_v49  ;;  %855 = vst.msk [vmem:[#allocation4 + $0x8] sm:$0xff] %vm853_vm1, %v4786_v49 }
  0x70   : > { %856 = vst.msk [vmem:[#allocation4 + $0x10] sm:$0xff] %vm853_vm1, %v4786_v49  ;;  %857 = vst.msk [vmem:[#allocation4 + $0x18] sm:$0xff] %vm853_vm1, %v4786_v49 }
  0x71   : > { %858 = vst.msk [vmem:[#allocation4 + $0x20] sm:$0xff] %vm853_vm1, %v4786_v49  ;;  %859 = vst.msk [vmem:[#allocation4 + $0x28] sm:$0xff] %vm853_vm1, %v4786_v49 }
  0x72   : > { %860 = vst.msk [vmem:[#allocation4 + $0x30] sm:$0xff] %vm853_vm1, %v4786_v49  ;;  %861 = vst.msk [vmem:[#allocation4 + $0x38] sm:$0xff] %vm853_vm1, %v4786_v49 }
  0x73   : > { %862 = vst.msk [vmem:[#allocation4 + $0x40] sm:$0xff] %vm853_vm1, %v4786_v49  ;;  %863 = vst.msk [vmem:[#allocation4 + $0x48] sm:$0xff] %vm853_vm1, %v4786_v49 }
  0x74   : > { %864 = vst.msk [vmem:[#allocation4 + $0x50] sm:$0xff] %vm853_vm1, %v4786_v49  ;;  %865 = vst.msk [vmem:[#allocation4 + $0x58] sm:$0xff] %vm853_vm1, %v4786_v49 }
  0x75   : > { %866 = vst.msk [vmem:[#allocation4 + $0x60] sm:$0xff] %vm853_vm1, %v4786_v49  ;;  %867 = vst.msk [vmem:[#allocation4 + $0x68] sm:$0xff] %vm853_vm1, %v4786_v49 }
  0x76   : > { %868 = vst.msk [vmem:[#allocation4 + $0x70] sm:$0xff] %vm853_vm1, %v4786_v49  ;;  %869 = vst.msk [vmem:[#allocation4 + $0x78] sm:$0xff] %vm853_vm1, %v4786_v49 }
  0x77   : > { %870 = vst.msk [vmem:[#allocation4 + $0x80] sm:$0xff] %vm853_vm1, %v4786_v49  ;;  %871 = vst.msk [vmem:[#allocation4 + $0x88] sm:$0xff] %vm853_vm1, %v4786_v49 }
  0x78   : > { %872 = vst.msk [vmem:[#allocation4 + $0x90] sm:$0xff] %vm853_vm1, %v4786_v49  ;;  %873 = vst.msk [vmem:[#allocation4 + $0x98] sm:$0xff] %vm853_vm1, %v4786_v49 }
  0x79   : > { %874 = vst.msk [vmem:[#allocation4 + $0xa0] sm:$0xff] %vm853_vm1, %v4786_v49  ;;  %875 = vst.msk [vmem:[#allocation4 + $0xa8] sm:$0xff] %vm853_vm1, %v4786_v49 }
  0x7a   : > { %876 = vst.msk [vmem:[#allocation4 + $0xb0] sm:$0xff] %vm853_vm1, %v4786_v49  ;;  %877 = vst.msk [vmem:[#allocation4 + $0xb8] sm:$0xff] %vm853_vm1, %v4786_v49 }
  0x7b   : > { %878 = vst.msk [vmem:[#allocation4 + $0xc0] sm:$0xff] %vm853_vm1, %v4786_v49  ;;  %879 = vst.msk [vmem:[#allocation4 + $0xc8] sm:$0xff] %vm853_vm1, %v4786_v49 }
  0x7c   : > { %880 = vst.msk [vmem:[#allocation4 + $0xd0] sm:$0xff] %vm853_vm1, %v4786_v49  ;;  %881 = vst.msk [vmem:[#allocation4 + $0xd8] sm:$0xff] %vm853_vm1, %v4786_v49 }
  0x7d   : > { %882 = vst.msk [vmem:[#allocation4 + $0xe0] sm:$0xff] %vm853_vm1, %v4786_v49  ;;  %883 = vst.msk [vmem:[#allocation4 + $0xe8] sm:$0xff] %vm853_vm1, %v4786_v49 }
  0x7e   : > { %884 = vst.msk [vmem:[#allocation4 + $0xf0] sm:$0xff] %vm853_vm1, %v4786_v49  ;;  %885 = vst.msk [vmem:[#allocation4 + $0xf8] sm:$0xff] %vm853_vm1, %v4786_v49 }
  0x7f PF: > { %p3932_p5 = scmp.gt.s32.totalorder %s4767_s23, %s4771_s24 }
  0x81   : > { %889 = sbr.rel (%p3932_p5) target bundleno = 921 (0x399), region = 171 }
  0x86   : > { %v4425_v50 = vld [vmem:[%s5008_s29 + $0x18] sm:$0xff]   ;;  %vm1026_vm2 = vcmask 261120   ;;  %v4427_v53 = vld [vmem:[%s5008_s29 + $0x10] sm:$0xff]   ;;  %v4429_v56 = vld [vmem:[%s5008_s29 + $0x8] sm:$0xff]   ;;  %v1504_v34 = vlaneseq  ;;  %s3981_s19 = sshll.u32 %s4771_s24, 6  ;;  %s3982_s10 = sshll.u32 %s4767_s23, 6 }
  0x87   : > { %v4426_v51 = vld [vmem:[%s5008_s29 + $0x38] sm:$0xff]   ;;  %4314 = vmatprep.subr.msk.bf16.mxu0 %vm1026_vm2, %v4425_v50  ;;  %v1049_v52 = vsel %vm1026_vm2, %v4425_v50, 0  ;;  %v4428_v55 = vld [vmem:[%s5008_s29 + $0x30] sm:$0xff]   ;;  %v4430_v57 = vld [vmem:[%s5008_s29 + $0x28] sm:$0xff]   ;;  %v1046_v58 = vsel %vm1026_vm2, %v4427_v53, 0  ;;  %v1043_v62 = vsel %vm1026_vm2, %v4429_v56, 0  ;;  %v5259_v38 = vstv %s3981_s19 }
  0x88   : > { %4318 = vmatprep.subr.msk.bf16.mxu1 %vm1026_vm2, %v4426_v51  ;;  %4139 = vmatpush3.bf16.xpose.msra.mxu0 %v1049_v52  ;;  %v1178_v54 = vsel %vm1026_vm2, %v4426_v51, 0  ;;  %v4433_v59 = vld [vmem:[%s5006_s28] sm:$0xff]   ;;  %v1175_v60 = vsel %vm1026_vm2, %v4428_v55, 0  ;;  %v1172_v0 = vsel %vm1026_vm2, %v4430_v57, 0  ;;  %v4437_v3 = vld [vmem:[%s5008_s29 + $0x58] sm:$0xff]   ;;  %v4439_v6 = vld [vmem:[%s5008_s29 + $0x50] sm:$0xff]   ;;  %v1525_v39 = vstv %s3982_s10 }
  0x89   : > { %4155 = vmatpush3.bf16.xpose.msra.mxu1 %v1178_v54  ;;  %4315 = vmatprep.subr.msk.bf16.mxu0 %vm1026_vm2, %v4427_v53  ;;  %v4434_v61 = vld [vmem:[%s5006_s28 + $0x20] sm:$0xff]   ;;  %v4438_v5 = vld [vmem:[%s5008_s29 + $0x78] sm:$0xff]   ;;  %v4440_v7 = vld [vmem:[%s5008_s29 + $0x70] sm:$0xff]   ;;  %v1307_v10 = vsel %vm1026_vm2, %v4437_v3, 0  ;;  %v1304_v12 = vsel %vm1026_vm2, %v4439_v6, 0  ;;  %v1505_v35 = vshrl.u32 %v1504_v34, 7 }
  0x8a   : > { %4319 = vmatprep.subr.msk.bf16.mxu1 %vm1026_vm2, %v4428_v55  ;;  %4146 = vmatprep.mubr.msk.bf16.mxu0 %vm1026_vm2, %v4433_v59  ;;  %v4431_v63 = vld [vmem:[%s5008_s29] sm:$0xff]   ;;  %v4435_v8 = vld [vmem:[%s5006_s28 + $0x8] sm:$0xff]   ;;  %v1436_v11 = vsel %vm1026_vm2, %v4438_v5, 0  ;;  %v4441_v13 = vld [vmem:[%s5006_s28 + $0x10] sm:$0xff]   ;;  %v1433_v14 = vsel %vm1026_vm2, %v4440_v7, 0  ;;  %v1524_v37 = vand.u32 127, %v1504_v34 }
  0x8b   : > { %4162 = vmatprep.mubr.msk.bf16.mxu1 %vm1026_vm2, %v4434_v61  ;;  %v4432_v1 = vld [vmem:[%s5008_s29 + $0x20] sm:$0xff]   ;;  %v1040_v2 = vsel %vm1026_vm2, %v4431_v63, 0  ;;  %v4436_v9 = vld [vmem:[%s5006_s28 + $0x28] sm:$0xff]   ;;  %v4443_v15 = vld [vmem:[%s5006_s28 + $0x30] sm:$0xff]   ;;  %v1507_v36 = vadd.s32 16, %v1505_v35  ;;  %v1508_v42 = vadd.s32 24, %v1505_v35  ;;  %v5267_v43 = vadd.s32 %v5259_v38, %v1505_v35 }
  0x8c   : > { %v1169_v4 = vsel %vm1026_vm2, %v4432_v1, 0  ;;  %v4442_v16 = vld [vmem:[%s5006_s28 + $0x18] sm:$0xff]   ;;  %v4445_v18 = vld [vmem:[%s5008_s29 + $0x48] sm:$0xff]   ;;  %v4449_v20 = vld [vmem:[%s5006_s28 + $0x40] sm:$0xff]   ;;  %v5264_v41 = vadd.s32 %v1525_v39, %v1524_v37  ;;  %vm1615_vm4 = vcmask 523264   ;;  %v1506_v46 = vadd.s32 8, %v1505_v35 }
  0x8d   : > { %v4444_v17 = vld [vmem:[%s5006_s28 + $0x38] sm:$0xff]   ;;  %v4446_v19 = vld [vmem:[%s5008_s29 + $0x68] sm:$0xff]   ;;  %v4451_v21 = vld [vmem:[%s5006_s28 + $0x60] sm:$0xff]   ;;  %v1301_v22 = vsel %vm1026_vm2, %v4445_v18, 0  ;;  %v5262_v40 = vadd.s32 %v5259_v38, %v1507_v36  ;;  %v5272_v44 = vadd.s32 %v5259_v38, %v1508_v42  ;;  %v1512_v52 = vadd.s32 56, %v1505_v35 }
  0x8e   : > { %v4447_v23 = vld [vmem:[%s5008_s29 + $0x40] sm:$0xff]   ;;  %v1430_v24 = vsel %vm1026_vm2, %v4446_v19, 0  ;;  %v4450_v28 = vld [vmem:[%s5006_s28 + $0x48] sm:$0xff]   ;;  %v4453_v30 = vld [vmem:[%s5006_s28 + $0x50] sm:$0xff]   ;;  %vm1527_vm5 = vcmp.ge.s32.totalorder %v5267_v43, %v5264_v41  ;;  %v1511_v55 = vadd.s32 48, %v1505_v35  ;;  %vm2288_vm12 = vcmask 7168  }
  0x8f   : > { %v4448_v25 = vld [vmem:[%s5008_s29 + $0x60] sm:$0xff]   ;;  %v1298_v26 = vsel %vm1026_vm2, %v4447_v23, 0  ;;  %v4452_v29 = vld [vmem:[%s5006_s28 + $0x68] sm:$0xff]   ;;  %v4455_v31 = vld [vmem:[%s5006_s28 + $0x70] sm:$0xff]   ;;  %vm1529_vm3 = vcmp.ge.s32.totalorder %v5262_v40, %v5264_v41  ;;  %vm1530_vm6 = vcmp.ge.s32.totalorder %v5272_v44, %v5264_v41 }
  0x90   : > { %4141 = vmatpush3.bf16.xpose.msra.mxu0 %v1046_v58  ;;  %v1427_v27 = vsel %vm1026_vm2, %v4448_v25, 0  ;;  %v4454_v32 = vld [vmem:[%s5006_s28 + $0x58] sm:$0xff]   ;;  %v5298_v58 = vadd.s32 %v5259_v38, %v1506_v46 }
  0x91   : > { %4157 = vmatpush3.bf16.xpose.msra.mxu1 %v1175_v60  ;;  %4316 = vmatprep.subr.msk.bf16.mxu0 %vm1026_vm2, %v4429_v56  ;;  %v4456_v33 = vld [vmem:[%s5006_s28 + $0x78] sm:$0xff]  }
  0x92   : > { %4320 = vmatprep.subr.msk.bf16.mxu1 %vm1026_vm2, %v4430_v57  ;;  %vm1528_vm7 = vcmp.ge.s32.totalorder %v5298_v58, %v5264_v41 }
  0x98   : > { %4143 = vmatpush3.bf16.xpose.msra.mxu0 %v1043_v62 }
  0x99   : > { %4159 = vmatpush3.bf16.xpose.msra.mxu1 %v1172_v0  ;;  %4317 = vmatprep.subr.msk.bf16.mxu0 %vm1026_vm2, %v4431_v63  ;;  %v5308_v63 = vadd.s32 %v5259_v38, %v1512_v52 }
  0x9a   : > { %4321 = vmatprep.subr.msk.bf16.mxu1 %vm1026_vm2, %v4432_v1 }
  0x9b   : > { %vm1534_vm8 = vcmp.ge.s32.totalorder %v5308_v63, %v5264_v41 }
  0xa0   : > { %4145 = vmatpush3.bf16.xpose.msra.mxu0 %v1040_v2 }
  0xa1   : > { %4161 = vmatpush3.bf16.xpose.msra.mxu1 %v1169_v4  ;;  %4322 = vmatprep.subr.msk.bf16.mxu0 %vm1026_vm2, %v4437_v3  ;;  %v5318_v3 = vadd.s32 %v5259_v38, %v1511_v55 }
  0xa2   : > { %4326 = vmatprep.subr.msk.bf16.mxu1 %vm1026_vm2, %v4438_v5 }
  0xa3   : > { %vm1533_vm9 = vcmp.ge.s32.totalorder %v5318_v3, %v5264_v41 }
  0xa7   : > { %4147 = vmatmul.mubr.msk.bf16.vlgmr.msra.gmra.mxu0 %vm1026_vm2, %v4435_v8 }
  0xa8   : > { %4163 = vmatmul.mubr.msk.bf16.vlgmr.msra.gmra.mxu1 %vm1026_vm2, %v4436_v9  ;;  %4171 = vmatpush3.bf16.xpose.msra.mxu0 %v1307_v10 }
  0xa9   : > { %4187 = vmatpush3.bf16.xpose.msra.mxu1 %v1436_v11  ;;  %4323 = vmatprep.subr.msk.bf16.mxu0 %vm1026_vm2, %v4439_v6 }
  0xaa   : > { %4327 = vmatprep.subr.msk.bf16.mxu1 %vm1026_vm2, %v4440_v7  ;;  %4150 = vmatprep.mubr.msk.bf16.mxu0 %vm1026_vm2, %v4441_v13 }
  0xab   : > { %4166 = vmatprep.mubr.msk.bf16.mxu1 %vm1026_vm2, %v4443_v15  ;;  %v1509_v15 = vadd.s32 32, %v1505_v35 }
  0xaf   : > { %4151 = vmatmul.mubr.msk.bf16.gmra.mxu0 %vm1026_vm2, %v4442_v16 }
  0xb0   : > { %4173 = vmatpush3.bf16.xpose.msra.mxu0 %v1304_v12  ;;  %4167 = vmatmul.mubr.msk.bf16.gmra.mxu1 %vm1026_vm2, %v4444_v17 }
  0xb1   : > { %4189 = vmatpush3.bf16.xpose.msra.mxu1 %v1433_v14  ;;  %4324 = vmatprep.subr.msk.bf16.mxu0 %vm1026_vm2, %v4445_v18  ;;  %v1510_v14 = vadd.s32 40, %v1505_v35 }
  0xb2   : > { %4328 = vmatprep.subr.msk.bf16.mxu1 %vm1026_vm2, %v4446_v19  ;;  %4178 = vmatprep.mubr.msk.bf16.mxu0 %vm1026_vm2, %v4449_v20 }
  0xb3   : > { %4194 = vmatprep.mubr.msk.bf16.mxu1 %vm1026_vm2, %v4451_v21  ;;  %v4787_v21 = vmov 0  }
  0xb4   : > { %4424 = vset.pattern.permute.xlu0 %v4787_v21  ;;  %4423 = vset.pattern.permute.xlu1 %v4787_v21 }
  0xb8   : > { %4175 = vmatpush3.bf16.xpose.msra.mxu0 %v1301_v22 }
  0xb9   : > { %4191 = vmatpush3.bf16.xpose.msra.mxu1 %v1430_v24  ;;  %4325 = vmatprep.subr.msk.bf16.mxu0 %vm1026_vm2, %v4447_v23  ;;  %v5362_v23 = vadd.s32 %v5259_v38, %v1510_v14  ;;  %v5365_v24 = vadd.s32 %v5259_v38, %v1509_v15 }
  0xba   : > { %4329 = vmatprep.subr.msk.bf16.mxu1 %vm1026_vm2, %v4448_v25 }
  0xbb   : > { %vm1532_vm10 = vcmp.ge.s32.totalorder %v5362_v23, %v5264_v41  ;;  %vm1531_vm11 = vcmp.ge.s32.totalorder %v5365_v24, %v5264_v41 }
  0xc0   : > { %4177 = vmatpush3.bf16.xpose.msra.mxu0 %v1298_v26 }
  0xc1   : > { %4193 = vmatpush3.bf16.xpose.msra.mxu1 %v1427_v27 }
  0xc7   : > { %4179 = vmatmul.mubr.msk.bf16.vlgmr.msra.gmra.mxu0 %vm1026_vm2, %v4450_v28 }
  0xc8   : > { %4195 = vmatmul.mubr.msk.bf16.vlgmr.msra.gmra.mxu1 %vm1026_vm2, %v4452_v29  ;;  %4182 = vmatprep.mubr.msk.bf16.mxu0 %vm1026_vm2, %v4453_v30 }
  0xc9   : > { %4198 = vmatprep.mubr.msk.bf16.mxu1 %vm1026_vm2, %v4455_v31 }
  0xcf   : > { %4183 = vmatmul.mubr.msk.bf16.gmra.mxu0 %vm1026_vm2, %v4454_v32 }
  0xd0   : > { %4199 = vmatmul.mubr.msk.bf16.gmra.mxu1 %vm1026_vm2, %v4456_v33 }
 0x167   : > { %v4148_v45 = vpop.f32.mrf.mxu0 }
 0x168   : > { %v5277_v47 = vsel %vm1529_vm3, %v4148_v45, -1e+30  ;;  %v4164_v48 = vpop.f32.mrf.mxu1 }
 0x169   : > { %6452 = vst [vmem:[#allocation11_spill] sm:$0xff] %v5277_v47  ;;  %v5284_v49 = vsel %vm1529_vm3, %v4164_v48, -1e+30  ;;  %v1085_v50 = vpop.f32.mrf.mxu0  ;;  %v1622_v51 = vsel %vm1615_vm4, %v5277_v47, -inf  ;;  %v5802_v47 = vld [vmem:[#allocation2 + $0xe8] sm:$0xff] }
 0x16a   : > { %6453 = vst [vmem:[#allocation12_spill] sm:$0xff] %v5284_v49  ;;  %v1214_v53 = vpop.f32.mrf.mxu1  ;;  %v1646_v54 = vsel %vm1615_vm4, %v5284_v49, -inf  ;;  %1623 = vmax.xlane.f32.xlu1 %v1622_v51  ;;  %v5295_v56 = vsel %vm1527_vm5, %v1085_v50, -1e+30 }
 0x16b   : > { %6454 = vst [vmem:[#allocation13_spill] sm:$0xff] %v5295_v56  ;;  %1647 = vmax.xlane.f32.xlu0 %v1646_v54  ;;  %v4149_v57 = vpop.f32.mrf.mxu0  ;;  %v1616_v2 = vsel %vm1615_vm4, %v5295_v56, -inf  ;;  %v5323_v4 = vsel %vm1527_vm5, %v1214_v53, -1e+30 }
 0x16c   : > { %v5303_v59 = vsel %vm1530_vm6, %v4149_v57, -1e+30  ;;  %v4165_v60 = vpop.f32.mrf.mxu1  ;;  %6457 = vst [vmem:[#allocation16_spill] sm:$0xff] %v5323_v4  ;;  %v1640_v10 = vsel %vm1615_vm4, %v5323_v4, -inf }
 0x16d   : > { %6455 = vst [vmem:[#allocation14_spill] sm:$0xff] %v5303_v59  ;;  %v1088_v61 = vpop.f32.mrf.mxu0  ;;  %v1625_v62 = vsel %vm1615_vm4, %v5303_v59, -inf  ;;  %v5313_v0 = vsel %vm1530_vm6, %v4165_v60, -1e+30  ;;  %v5754_v59 = vld [vmem:[#allocation2 + $0xf8] sm:$0xff] }
 0x16e   : > { %6456 = vst [vmem:[#allocation15_spill] sm:$0xff] %v5313_v0  ;;  %v1217_v1 = vpop.f32.mrf.mxu1  ;;  %1626 = vmax.xlane.f32.xlu1 %v1625_v62  ;;  %v1649_v7 = vsel %vm1615_vm4, %v5313_v0, -inf  ;;  %v5343_v12 = vsel %vm1528_vm7, %v1088_v61, -1e+30  ;;  %6485 = vst [vmem:[#allocation44_spill] sm:$0xff] %v5754_v59  ;;  %v5779_v0 = vld [vmem:[#allocation2 + $0xa8] sm:$0xff] }
 0x16f   : > { %1617 = vmax.xlane.f32.xlu0 %v1616_v2  ;;  %v4152_v5 = vpop.f32.mrf.mxu0  ;;  %v5334_v9 = vsel %vm1528_vm7, %v1217_v1, -1e+30  ;;  %6459 = vst [vmem:[#allocation18_spill] sm:$0xff] %v5343_v12  ;;  %v1619_v20 = vsel %vm1615_vm4, %v5343_v12, -inf }
 0x170   : > { %v4168_v6 = vpop.f32.mrf.mxu1  ;;  %6458 = vst [vmem:[#allocation17_spill] sm:$0xff] %v5334_v9  ;;  %v5353_v17 = vsel %vm1533_vm9, %v4152_v5, -1e+30  ;;  %v1643_v18 = vsel %vm1615_vm4, %v5334_v9, -inf  ;;  %v5759_v9 = vld [vmem:[#allocation2 + $0xa0] sm:$0xff] }
 0x171   : > { %v1101_v8 = vpop.f32.mrf.mxu0  ;;  %6461 = vst [vmem:[#allocation20_spill] sm:$0xff] %v5353_v17  ;;  %v1634_v25 = vsel %vm1615_vm4, %v5353_v17, -inf  ;;  %v5377_v27 = vsel %vm1533_vm9, %v4168_v6, -1e+30 }
 0x172   : > { %1650 = vmax.xlane.f32.xlu1 %v1649_v7  ;;  %v1230_v11 = vpop.f32.mrf.mxu1  ;;  %6463 = vst [vmem:[#allocation22_spill] sm:$0xff] %v5377_v27  ;;  %v1658_v30 = vsel %vm1615_vm4, %v5377_v27, -inf  ;;  %v5395_v32 = vsel %vm1531_vm11, %v1101_v8, -1e+30 }
 0x173   : > { %1641 = vmax.xlane.f32.xlu0 %v1640_v10  ;;  %v4153_v13 = vpop.f32.mrf.mxu0  ;;  %6465 = vst [vmem:[#allocation24_spill] sm:$0xff] %v5395_v32  ;;  %v1628_v36 = vsel %vm1615_vm4, %v5395_v32, -inf  ;;  %v5409_v37 = vsel %vm1531_vm11, %v1230_v11, -1e+30 }
 0x174   : > { %v5348_v16 = vsel %vm1534_vm8, %v4153_v13, -1e+30  ;;  %v4169_v19 = vpop.f32.mrf.mxu1  ;;  %6467 = vst [vmem:[#allocation26_spill] sm:$0xff] %v5409_v37  ;;  %v1652_v39 = vsel %vm1615_vm4, %v5409_v37, -inf }
 0x175   : > { %6460 = vst [vmem:[#allocation19_spill] sm:$0xff] %v5348_v16  ;;  %v1637_v22 = vsel %vm1615_vm4, %v5348_v16, -inf  ;;  %v5372_v26 = vsel %vm1534_vm8, %v4169_v19, -1e+30  ;;  %v1104_v28 = vpop.f32.mrf.mxu0  ;;  %v5725_v16 = vld [vmem:[#allocation2 + $0xb0] sm:$0xff] }
 0x176   : > { %1644 = vmax.xlane.f32.xlu1 %v1643_v18  ;;  %6462 = vst [vmem:[#allocation21_spill] sm:$0xff] %v5372_v26  ;;  %v1661_v29 = vsel %vm1615_vm4, %v5372_v26, -inf  ;;  %v5390_v31 = vsel %vm1532_vm10, %v1104_v28, -1e+30  ;;  %v1233_v33 = vpop.f32.mrf.mxu1  ;;  %v5736_v26 = vld [vmem:[#allocation2 + $0xb8] sm:$0xff] }
 0x177   : > { %1620 = vmax.xlane.f32.xlu0 %v1619_v20  ;;  %6464 = vst [vmem:[#allocation23_spill] sm:$0xff] %v5390_v31  ;;  %v1631_v34 = vsel %vm1615_vm4, %v5390_v31, -inf  ;;  %v5402_v35 = vsel %vm1532_vm10, %v1233_v33, -1e+30  ;;  %v5720_v31 = vld [vmem:[#allocation2 + $0xc8] sm:$0xff] }
 0x178   : > { %6466 = vst [vmem:[#allocation25_spill] sm:$0xff] %v5402_v35  ;;  %v1655_v38 = vsel %vm1615_vm4, %v5402_v35, -inf  ;;  %v5741_v35 = vld [vmem:[#allocation2 + $0xf0] sm:$0xff] }
 0x179   : > { %6484 = vst [vmem:[#allocation43_spill] sm:$0xff] %v5741_v35 }
 0x17a   : > { %1638 = vmax.xlane.f32.xlu1 %v1637_v22 }
 0x17b   : > { %1635 = vmax.xlane.f32.xlu0 %v1634_v25 }
 0x17e   : > { %1662 = vmax.xlane.f32.xlu1 %v1661_v29 }
 0x17f   : > { %1659 = vmax.xlane.f32.xlu0 %v1658_v30 }
 0x182   : > { %1632 = vmax.xlane.f32.xlu1 %v1631_v34 }
 0x183   : > { %1629 = vmax.xlane.f32.xlu0 %v1628_v36 }
 0x186   : > { %1656 = vmax.xlane.f32.xlu1 %v1655_v38 }
 0x187   : > { %1653 = vmax.xlane.f32.xlu0 %v1652_v39  ;;  %v4180_v42 = vpop.f32.mrf.mxu0 }
 0x188   : > { %v5418_v45 = vsel %vm1529_vm3, %v4180_v42, -1e+30  ;;  %v4196_v46 = vpop.f32.mrf.mxu1 }
 0x189   : > { %6468 = vst [vmem:[#allocation27_spill] sm:$0xff] %v5418_v45  ;;  %v1343_v48 = vpop.f32.mrf.mxu0  ;;  %v5423_v50 = vsel %vm1529_vm3, %v4196_v46, -1e+30  ;;  %v1670_v51 = vsel %vm1615_vm4, %v5418_v45, -inf }
 0x18a   : > { %6469 = vst [vmem:[#allocation28_spill] sm:$0xff] %v5423_v50  ;;  %v1472_v52 = vpop.f32.mrf.mxu1  ;;  %v1694_v57 = vsel %vm1615_vm4, %v5423_v50, -inf  ;;  %v5444_v62 = vsel %vm1527_vm5, %v1343_v48, -1e+30  ;;  %v5527_v48 = vld [vmem:[#allocation2 + $0x10] sm:$0xff]  ;;  %v5709_v50 = vld [vmem:[#allocation2 + $0xc0] sm:$0xff] }
 0x18b   : > { %1671 = vmax.xlane.f32.xlu0 %v1670_v51  ;;  %v4181_v53 = vpop.f32.mrf.mxu0  ;;  %6472 = vst [vmem:[#allocation31_spill] sm:$0xff] %v5444_v62  ;;  %v1664_v6 = vsel %vm1615_vm4, %v5444_v62, -inf  ;;  %v5458_v7 = vsel %vm1527_vm5, %v1472_v52, -1e+30  ;;  %v5529_v51 = vld [vmem:[#allocation2 + $0x50] sm:$0xff] }
 0x18c   : > { %v5430_v54 = vsel %vm1530_vm6, %v4181_v53, -1e+30  ;;  %v4197_v55 = vpop.f32.mrf.mxu1  ;;  %6474 = vst [vmem:[#allocation33_spill] sm:$0xff] %v5458_v7  ;;  %v1688_v43 = vsel %vm1615_vm4, %v5458_v7, -inf }
 0x18d   : > { %6470 = vst [vmem:[#allocation29_spill] sm:$0xff] %v5430_v54  ;;  %v1346_v60 = vpop.f32.mrf.mxu0  ;;  %v5437_v40 = vsel %vm1530_vm6, %v4197_v55, -1e+30  ;;  %v1673_v61 = vsel %vm1615_vm4, %v5430_v54, -inf  ;;  %v5537_v55 = vld [vmem:[#allocation2 + $0x18] sm:$0xff]  ;;  %v5704_v54 = vld [vmem:[#allocation2 + $0x88] sm:$0xff] }
 0x18e   : > { %6471 = vst [vmem:[#allocation30_spill] sm:$0xff] %v5437_v40  ;;  %1674 = vmax.xlane.f32.xlu1 %v1673_v61  ;;  %v1697_v1 = vsel %vm1615_vm4, %v5437_v40, -inf  ;;  %v1475_v5 = vpop.f32.mrf.mxu1  ;;  %v5451_v44 = vsel %vm1528_vm7, %v1346_v60, -1e+30  ;;  %v5544_v60 = vld [vmem:[#allocation2] sm:$0xff] }
 0x18f   : > { %1695 = vmax.xlane.f32.xlu0 %v1694_v57  ;;  %v4184_v2 = vpop.f32.mrf.mxu0  ;;  %6473 = vst [vmem:[#allocation32_spill] sm:$0xff] %v5451_v44  ;;  %v1667_v13 = vsel %vm1615_vm4, %v5451_v44, -inf  ;;  %v5470_v14 = vsel %vm1528_vm7, %v1475_v5, -1e+30  ;;  %v4461_v57 = vld [vmem:[%s5010_s7 + $0x28] sm:$0xff]  }
 0x190   : > { %v4200_v10 = vpop.f32.mrf.mxu1  ;;  %v5463_v11 = vsel %vm1533_vm9, %v4184_v2, -1e+30  ;;  %6476 = vst [vmem:[#allocation35_spill] sm:$0xff] %v5470_v14  ;;  %v1691_v21 = vsel %vm1615_vm4, %v5470_v14, -inf }
 0x191   : > { %v1359_v8 = vpop.f32.mrf.mxu0  ;;  %6475 = vst [vmem:[#allocation34_spill] sm:$0xff] %v5463_v11  ;;  %v1682_v20 = vsel %vm1615_vm4, %v5463_v11, -inf  ;;  %v5484_v58 = vsel %vm1533_vm9, %v4200_v10, -1e+30  ;;  %v5561_v10 = vld [vmem:[#allocation2 + $0x40] sm:$0xff]  ;;  %v5675_v11 = vld [vmem:[#allocation2 + $0x98] sm:$0xff] }
 0x192   : > { %1698 = vmax.xlane.f32.xlu1 %v1697_v1  ;;  %v1488_v18 = vpop.f32.mrf.mxu1  ;;  %6478 = vst [vmem:[#allocation37_spill] sm:$0xff] %v5484_v58  ;;  %v1706_v29 = vsel %vm1615_vm4, %v5484_v58, -inf  ;;  %v5500_v3 = vsel %vm1531_vm11, %v1359_v8, -1e+30  ;;  %v5556_v8 = vld [vmem:[#allocation2 + $0x58] sm:$0xff] }
 0x193   : > { %1665 = vmax.xlane.f32.xlu0 %v1664_v6  ;;  %v4185_v15 = vpop.f32.mrf.mxu0  ;;  %6480 = vst [vmem:[#allocation39_spill] sm:$0xff] %v5500_v3  ;;  %v1676_v34 = vsel %vm1615_vm4, %v5500_v3, -inf  ;;  %v5514_v36 = vsel %vm1531_vm11, %v1488_v18, -1e+30 }
 0x194   : > { %v5477_v19 = vsel %vm1534_vm8, %v4185_v15, -1e+30  ;;  %v4201_v22 = vpop.f32.mrf.mxu1  ;;  %6482 = vst [vmem:[#allocation41_spill] sm:$0xff] %v5514_v36  ;;  %v1700_v46 = vsel %vm1615_vm4, %v5514_v36, -inf }
 0x195   : > { %6477 = vst [vmem:[#allocation36_spill] sm:$0xff] %v5477_v19  ;;  %v1685_v25 = vsel %vm1615_vm4, %v5477_v19, -inf  ;;  %v5493_v28 = vsel %vm1534_vm8, %v4201_v22, -1e+30  ;;  %v1362_v30 = vpop.f32.mrf.mxu0  ;;  %v5578_v22 = vld [vmem:[#allocation2 + $0x8] sm:$0xff] }
 0x196   : > { %1668 = vmax.xlane.f32.xlu1 %v1667_v13  ;;  %6479 = vst [vmem:[#allocation38_spill] sm:$0xff] %v5493_v28  ;;  %v1709_v33 = vsel %vm1615_vm4, %v5493_v28, -inf  ;;  %v5507_v63 = vsel %vm1532_vm10, %v1362_v30, -1e+30  ;;  %v1491_v38 = vpop.f32.mrf.mxu1  ;;  %v5646_v28 = vld [vmem:[#allocation2 + $0x68] sm:$0xff] }
 0x197   : > { %1689 = vmax.xlane.f32.xlu0 %v1688_v43  ;;  %6481 = vst [vmem:[#allocation40_spill] sm:$0xff] %v5507_v63  ;;  %v1679_v39 = vsel %vm1615_vm4, %v5507_v63, -inf  ;;  %v5521_v42 = vsel %vm1532_vm10, %v1491_v38, -1e+30  ;;  %v5592_v38 = vld [vmem:[#allocation2 + $0x38] sm:$0xff]  ;;  %v5677_v63 = vld [vmem:[#allocation2 + $0xd0] sm:$0xff] }
 0x198   : > { %6483 = vst [vmem:[#allocation42_spill] sm:$0xff] %v5521_v42  ;;  %v1703_v24 = vsel %vm1615_vm4, %v5521_v42, -inf }
 0x19a   : > { %1692 = vmax.xlane.f32.xlu1 %v1691_v21  ;;  %v5650_v21 = vld [vmem:[#allocation2 + $0x60] sm:$0xff] }
 0x19b   : > { %1683 = vmax.xlane.f32.xlu0 %v1682_v20  ;;  %v5572_v20 = vld [vmem:[#allocation2 + $0x48] sm:$0xff] }
 0x19e   : > { %1686 = vmax.xlane.f32.xlu1 %v1685_v25  ;;  %v5626_v25 = vld [vmem:[#allocation2 + $0x28] sm:$0xff] }
 0x19f   : > { %1707 = vmax.xlane.f32.xlu0 %v1706_v29 }
 0x1a2   : > { %1710 = vmax.xlane.f32.xlu1 %v1709_v33 }
 0x1a3   : > { %1677 = vmax.xlane.f32.xlu0 %v1676_v34 }
 0x1a6   : > { %1680 = vmax.xlane.f32.xlu1 %v1679_v39  ;;  %v5596_v39 = vld [vmem:[#allocation2 + $0x30] sm:$0xff] }
 0x1a7   : > { %1701 = vmax.xlane.f32.xlu0 %v1700_v46 }
 0x1aa   : > { %1704 = vmax.xlane.f32.xlu1 %v1703_v24  ;;  %v4457_v24 = vld [vmem:[%s5010_s7 + $0x38] sm:$0xff]  }
 0x1ab   : > { %4218 = vmatprep.subr.bf16.mxu1 %v4457_v24 }
 0x1ac   : > { %4219 = vmatpush3.bf16.msra.mxu1 %v4457_v24  ;;  %v5631_v24 = vld [vmem:[#allocation2 + $0x20] sm:$0xff] }
 0x1f3   : > { %v1624_v52 = vpop.xlane.xlu1 %1623 }
 0x1f4   : > { %v1648_v53 = vpop.xlane.xlu0 %1647  ;;  %v5532_v41 = vmax.f32 %v5527_v48, %v1624_v52 }
 0x1f5   : > { %v5535_v23 = vmax.f32 %v5529_v51, %v1648_v53 }
 0x1f6   : > { %3031 = vst.msk [vmem:[#allocation2 + $0x10] sm:$0xff] %vm2288_vm12, %v5532_v41  ;;  %1852 = vperm.xlu1 %4423, %v5532_v41  }
 0x1f7   : > { %3039 = vst.msk [vmem:[#allocation2 + $0x50] sm:$0xff] %vm2288_vm12, %v5535_v23  ;;  %v1627_v1 = vpop.xlane.xlu1 %1626 }
 0x1f8   : > { %v1618_v2 = vpop.xlane.xlu0 %1617  ;;  %v5551_v5 = vmax.f32 %v5537_v55, %v1627_v1 }
 0x1f9   : > { %v5554_v6 = vmax.f32 %v5544_v60, %v1618_v2  ;;  %v5609_v2 = vld [vmem:[#allocation2 + $0x78] sm:$0xff] }
 0x1fa   : > { %3032 = vst.msk [vmem:[#allocation2 + $0x18] sm:$0xff] %vm2288_vm12, %v5551_v5  ;;  %1892 = vperm.xlu1 %4423, %v5535_v23  }
 0x1fb   : > { %3029 = vst.msk [vmem:[#allocation2] sm:$0xff] %vm2288_vm12, %v5554_v6  ;;  %1842 = vperm.xlu0 %4424, %v5554_v6   ;;  %v1651_v13 = vpop.xlane.xlu1 %1650 }
 0x1fc   : > { %v1642_v43 = vpop.xlane.xlu0 %1641  ;;  %v5567_v15 = vmax.f32 %v5556_v8, %v1651_v13  ;;  %v5613_v13 = vld [vmem:[#allocation2 + $0x70] sm:$0xff] }
 0x1fd   : > { %v5570_v18 = vmax.f32 %v5561_v10, %v1642_v43 }
 0x1fe   : > { %3040 = vst.msk [vmem:[#allocation2 + $0x58] sm:$0xff] %vm2288_vm12, %v5567_v15 }
 0x1ff   : > { %3037 = vst.msk [vmem:[#allocation2 + $0x40] sm:$0xff] %vm2288_vm12, %v5570_v18  ;;  %1897 = vperm.xlu0 %4424, %v5567_v15   ;;  %1882 = vperm.xlu1 %4423, %v5570_v18   ;;  %v1645_v29 = vpop.xlane.xlu1 %1644 }
 0x200   : > { %v5587_v30 = vmax.f32 %v5572_v20, %v1645_v29  ;;  %v1621_v33 = vpop.xlane.xlu0 %1620  ;;  %v4458_v29 = vld [vmem:[%s5010_s7 + $0x18] sm:$0xff]  }
 0x201   : > { %v5590_v34 = vmax.f32 %v5578_v22, %v1621_v33  ;;  %v4459_v33 = vld [vmem:[%s5010_s7 + $0x30] sm:$0xff]   ;;  %4202 = vmatprep.subr.bf16.mxu0 %v4458_v29 }
 0x202   : > { %3038 = vst.msk [vmem:[#allocation2 + $0x48] sm:$0xff] %vm2288_vm12, %v5587_v30  ;;  %4220 = vmatprep.subr.bf16.mxu1 %v4459_v33  ;;  %4203 = vmatpush3.bf16.msra.mxu0 %v4458_v29 }
 0x203   : > { %3030 = vst.msk [vmem:[#allocation2 + $0x8] sm:$0xff] %vm2288_vm12, %v5590_v34  ;;  %1887 = vperm.xlu0 %4424, %v5587_v30   ;;  %1857 = vperm.xlu1 %4423, %v5551_v5   ;;  %v1639_v46 = vpop.xlane.xlu1 %1638  ;;  %v1745_v56 = vsub.f32 %v5578_v22, %v5590_v34 }
 0x204   : > { %v1636_v52 = vpop.xlane.xlu0 %1635  ;;  %v5604_v53 = vmax.f32 %v5592_v38, %v1639_v46  ;;  %4221 = vmatpush3.bf16.msra.mxu1 %v4459_v33 }
 0x205   : > { %v5607_v1 = vmax.f32 %v5596_v39, %v1636_v52  ;;  %4222 = vmatprep.subr.bf16.mxu1 %v4461_v57 }
 0x206   : > { %3036 = vst.msk [vmem:[#allocation2 + $0x38] sm:$0xff] %vm2288_vm12, %v5604_v53 }
 0x207   : > { %3035 = vst.msk [vmem:[#allocation2 + $0x30] sm:$0xff] %vm2288_vm12, %v5607_v1  ;;  %1847 = vperm.xlu1 %4423, %v5590_v34   ;;  %v1663_v43 = vpop.xlane.xlu1 %1662 }
 0x208   : > { %v1660_v46 = vpop.xlane.xlu0 %1659  ;;  %v5621_v52 = vmax.f32 %v5609_v2, %v1663_v43  ;;  %4223 = vmatpush3.bf16.msra.mxu1 %v4461_v57  ;;  %v4464_v57 = vld [vmem:[%s5010_s7] sm:$0xff]  }
 0x209   : > { %v5624_v61 = vmax.f32 %v5613_v13, %v1660_v46  ;;  %v4460_v46 = vld [vmem:[%s5010_s7 + $0x10] sm:$0xff]  }
 0x20a   : > { %3044 = vst.msk [vmem:[#allocation2 + $0x78] sm:$0xff] %vm2288_vm12, %v5621_v52  ;;  %1917 = vperm.xlu0 %4424, %v5621_v52   ;;  %4204 = vmatprep.subr.bf16.mxu0 %v4460_v46 }
 0x20b   : > { %3043 = vst.msk [vmem:[#allocation2 + $0x70] sm:$0xff] %vm2288_vm12, %v5624_v61  ;;  %1872 = vperm.xlu1 %4423, %v5607_v1   ;;  %v1633_v43 = vpop.xlane.xlu1 %1632  ;;  %4205 = vmatpush3.bf16.msra.mxu0 %v4460_v46  ;;  %v5666_v46 = vld [vmem:[#allocation2 + $0x90] sm:$0xff] }
 0x20c   : > { %v1630_v58 = vpop.xlane.xlu0 %1629  ;;  %v5641_v36 = vmax.f32 %v5626_v25, %v1633_v43  ;;  %v4463_v43 = vld [vmem:[%s5010_s7 + $0x20] sm:$0xff]  }
 0x20d   : > { %v5644_v29 = vmax.f32 %v5631_v24, %v1630_v58  ;;  %v4462_v58 = vld [vmem:[%s5010_s7 + $0x8] sm:$0xff]   ;;  %4224 = vmatprep.subr.bf16.mxu1 %v4463_v43 }
 0x20e   : > { %3034 = vst.msk [vmem:[#allocation2 + $0x28] sm:$0xff] %vm2288_vm12, %v5641_v36  ;;  %4206 = vmatprep.subr.bf16.mxu0 %v4462_v58  ;;  %4225 = vmatpush3.bf16.msra.mxu1 %v4463_v43  ;;  %v1749_v34 = vsub.f32 %v5626_v25, %v5641_v36 }
 0x20f   : > { %3033 = vst.msk [vmem:[#allocation2 + $0x20] sm:$0xff] %vm2288_vm12, %v5644_v29  ;;  %1912 = vperm.xlu1 %4423, %v5624_v61   ;;  %v1657_v33 = vpop.xlane.xlu1 %1656  ;;  %4207 = vmatpush3.bf16.msra.mxu0 %v4462_v58 }
 0x210   : > { %v1654_v3 = vpop.xlane.xlu0 %1653  ;;  %v5658_v42 = vmax.f32 %v5646_v28, %v1657_v33  ;;  %4208 = vmatprep.subr.bf16.mxu0 %v4464_v57  ;;  %v1786_v25 = vmul.f32 1.442695, %v1749_v34 }
 0x211   : > { %v5661_v19 = vmax.f32 %v5650_v21, %v1654_v3 }
 0x212   : > { %3042 = vst.msk [vmem:[#allocation2 + $0x68] sm:$0xff] %vm2288_vm12, %v5658_v42  ;;  %1907 = vperm.xlu0 %4424, %v5658_v42  }
 0x213   : > { %3041 = vst.msk [vmem:[#allocation2 + $0x60] sm:$0xff] %vm2288_vm12, %v5661_v19  ;;  %1862 = vperm.xlu1 %4423, %v5644_v29   ;;  %4209 = vmatpush3.bf16.msra.mxu0 %v4464_v57  ;;  %v5693_v57 = vld [vmem:[#allocation2 + $0x80] sm:$0xff] }
 0x214   : > { %v1672_v33 = vpop.xlane.xlu0 %1671 }
 0x215   : > { %v5673_v3 = vmax.f32 %v5666_v46, %v1672_v33  ;;  %v5688_v33 = vld [vmem:[#allocation2 + $0xd8] sm:$0xff] }
 0x217   : > { %3047 = vst.msk [vmem:[#allocation2 + $0x90] sm:$0xff] %vm2288_vm12, %v5673_v3  ;;  %1902 = vperm.xlu1 %4423, %v5661_v19   ;;  %v1675_v58 = vpop.xlane.xlu1 %1674 }
 0x218   : > { %v1696_v7 = vpop.xlane.xlu0 %1695  ;;  %v5683_v43 = vmax.f32 %v5675_v11, %v1675_v58 }
 0x219   : > { %v5686_v40 = vmax.f32 %v5677_v63, %v1696_v7 }
 0x21a   : > { %3048 = vst.msk [vmem:[#allocation2 + $0x98] sm:$0xff] %vm2288_vm12, %v5683_v43  ;;  %1937 = vperm.xlu0 %4424, %v5683_v43  }
 0x21b   : > { %3055 = vst.msk [vmem:[#allocation2 + $0xd0] sm:$0xff] %vm2288_vm12, %v5686_v40  ;;  %1877 = vperm.xlu1 %4423, %v5604_v53   ;;  %v1699_v62 = vpop.xlane.xlu1 %1698 }
 0x21c   : > { %v1666_v58 = vpop.xlane.xlu0 %1665  ;;  %v5699_v14 = vmax.f32 %v5688_v33, %v1699_v62 }
 0x21d   : > { %v5702_v7 = vmax.f32 %v5693_v57, %v1666_v58 }
 0x21e   : > { %3056 = vst.msk [vmem:[#allocation2 + $0xd8] sm:$0xff] %vm2288_vm12, %v5699_v14  ;;  %1977 = vperm.xlu0 %4424, %v5699_v14  }
 0x21f   : > { %3045 = vst.msk [vmem:[#allocation2 + $0x80] sm:$0xff] %vm2288_vm12, %v5702_v7  ;;  %1867 = vperm.xlu1 %4423, %v5641_v36   ;;  %v1669_v44 = vpop.xlane.xlu1 %1668 }
 0x220   : > { %v1690_v62 = vpop.xlane.xlu0 %1689  ;;  %v5715_v45 = vmax.f32 %v5704_v54, %v1669_v44 }
 0x221   : > { %v5718_v58 = vmax.f32 %v5709_v50, %v1690_v62 }
 0x222   : > { %3046 = vst.msk [vmem:[#allocation2 + $0x88] sm:$0xff] %vm2288_vm12, %v5715_v45  ;;  %1927 = vperm.xlu0 %4424, %v5715_v45  }
 0x223   : > { %3053 = vst.msk [vmem:[#allocation2 + $0xc0] sm:$0xff] %vm2288_vm12, %v5718_v58  ;;  %1932 = vperm.xlu1 %4423, %v5673_v3   ;;  %v1693_v32 = vpop.xlane.xlu1 %1692 }
 0x224   : > { %v5731_v44 = vmax.f32 %v5720_v31, %v1693_v32  ;;  %v1684_v62 = vpop.xlane.xlu0 %1683 }
 0x225   : > { %v5734_v37 = vmax.f32 %v5725_v16, %v1684_v62  ;;  %v1744_v62 = vsub.f32 %v5544_v60, %v5554_v6 }
 0x226   : > { %3054 = vst.msk [vmem:[#allocation2 + $0xc8] sm:$0xff] %vm2288_vm12, %v5731_v44  ;;  %1967 = vperm.xlu0 %4424, %v5731_v44  }
 0x227   : > { %3051 = vst.msk [vmem:[#allocation2 + $0xb0] sm:$0xff] %vm2288_vm12, %v5734_v37  ;;  %1972 = vperm.xlu1 %4423, %v5686_v40   ;;  %v1687_v32 = vpop.xlane.xlu1 %1686  ;;  %v1776_v6 = vmul.f32 1.442695, %v1744_v62 }
 0x228   : > { %v1708_v27 = vpop.xlane.xlu0 %1707  ;;  %v5749_v17 = vmax.f32 %v5736_v26, %v1687_v32  ;;  %v1747_v32 = vsub.f32 %v5537_v55, %v5551_v5  ;;  %v5786_v55 = vld [vmem:[#allocation2 + $0xe0] sm:$0xff] }
 0x229   : > { %v5752_v12 = vmax.f32 %v5741_v35, %v1708_v27  ;;  %v5767_v27 = vld [vmem:[%s5010_s7 + $0x58] sm:$0xff]   ;;  %4473 = vpow2.f32 %v1776_v6 }
 0x22a   : > { %3052 = vst.msk [vmem:[#allocation2 + $0xb8] sm:$0xff] %vm2288_vm12, %v5749_v17  ;;  %1957 = vperm.xlu0 %4424, %v5749_v17   ;;  %6486 = vst [vmem:[#allocation45_spill] sm:$0xff] %v5767_v27  ;;  %4234 = vmatprep.subr.bf16.mxu0 %v5767_v27  ;;  %v1782_v22 = vmul.f32 1.442695, %v1747_v32  ;;  %v6487_v32 = vsub.f32 %v5527_v48, %v5532_v41  ;;  %v1750_v48 = vsub.f32 %v5596_v39, %v5607_v1 }
 0x22b   : > { %3059 = vst.msk [vmem:[#allocation2 + $0xf0] sm:$0xff] %vm2288_vm12, %v5752_v12  ;;  %1922 = vperm.xlu1 %4423, %v5702_v7   ;;  %v1711_v60 = vpop.xlane.xlu1 %1710  ;;  %v1757_v39 = vsub.f32 %v5646_v28, %v5658_v42  ;;  %v6490_v28 = vsub.f32 %v5529_v51, %v5535_v23 }
 0x22c   : > { %v1678_v49 = vpop.xlane.xlu0 %1677  ;;  %v5772_v4 = vmax.f32 %v5754_v59, %v1711_v60  ;;  %v1778_v59 = vmul.f32 1.442695, %v1745_v56  ;;  %4475 = vpow2.f32 %v1782_v22  ;;  %v1751_v56 = vsub.f32 %v5592_v38, %v5604_v53 }
 0x22d   : > { %v5777_v35 = vmax.f32 %v5759_v9, %v1678_v49  ;;  %v5792_v49 = vld [vmem:[%s5010_s7 + $0x78] sm:$0xff]   ;;  %v1753_v38 = vsub.f32 %v5572_v20, %v5587_v30  ;;  %v6488_v20 = vsub.f32 %v5556_v8, %v5567_v15  ;;  %v6489_v22 = vsub.f32 %v5561_v10, %v5570_v18 }
 0x22e   : > { %3060 = vst.msk [vmem:[#allocation2 + $0xf8] sm:$0xff] %vm2288_vm12, %v5772_v4  ;;  %4250 = vmatprep.subr.bf16.mxu1 %v5792_v49  ;;  %4477 = vpow2.f32 %v1778_v59  ;;  %v1790_v53 = vmul.f32 1.442695, %v1751_v56  ;;  %v1759_v8 = vsub.f32 %v5609_v2, %v5621_v52  ;;  %v1802_v15 = vmul.f32 1.442695, %v1757_v39 }
 0x22f   : > { %3049 = vst.msk [vmem:[#allocation2 + $0xa0] sm:$0xff] %vm2288_vm12, %v5777_v35  ;;  %1962 = vperm.xlu1 %4423, %v5718_v58   ;;  %v1681_v5 = vpop.xlane.xlu1 %1680  ;;  %4479 = vpow2.f32 %v1786_v25  ;;  %v1794_v41 = vmul.f32 1.442695, %v1753_v38  ;;  %v1798_v30 = vmul.f32 1.442695, %v6488_v20  ;;  %v1756_v10 = vsub.f32 %v5650_v21, %v5661_v19 }
 0x230   : > { %v1702_v60 = vpop.xlane.xlu0 %1701  ;;  %v5797_v62 = vmax.f32 %v5779_v0, %v1681_v5  ;;  %v1780_v5 = vmul.f32 1.442695, %v6487_v32  ;;  %v1792_v34 = vmul.f32 1.442695, %v6489_v22  ;;  %v1796_v42 = vmul.f32 1.442695, %v6490_v28 }
 0x231   : > { %v5800_v27 = vmax.f32 %v5786_v55, %v1702_v60  ;;  %v1748_v60 = vsub.f32 %v5631_v24, %v5644_v29  ;;  %v1788_v29 = vmul.f32 1.442695, %v1750_v48  ;;  %v1806_v25 = vmul.f32 1.442695, %v1759_v8 }
 0x232   : > { %3050 = vst.msk [vmem:[#allocation2 + $0xa8] sm:$0xff] %vm2288_vm12, %v5797_v62  ;;  %1947 = vperm.xlu0 %4424, %v5797_v62   ;;  %4481 = vpow2.f32 %v1780_v5  ;;  %v1763_v2 = vsub.f32 %v5675_v11, %v5683_v43  ;;  %v1800_v51 = vmul.f32 1.442695, %v1756_v10  ;;  %v1771_v21 = vsub.f32 %v5688_v33, %v5699_v14 }
 0x233   : > { %3057 = vst.msk [vmem:[#allocation2 + $0xe0] sm:$0xff] %vm2288_vm12, %v5800_v27  ;;  %1952 = vperm.xlu1 %4423, %v5734_v37   ;;  %v1705_v36 = vpop.xlane.xlu1 %1704  ;;  %v1784_v59 = vmul.f32 1.442695, %v1748_v60  ;;  %4483 = vpow2.f32 %v1790_v53  ;;  %v6491_v11 = vsub.f32 %v5613_v13, %v5624_v61  ;;  %v1762_v5 = vsub.f32 %v5666_v46, %v5673_v3 }
 0x234   : > { %v5814_v6 = vmax.f32 %v5802_v47, %v1705_v36  ;;  %v1814_v19 = vmul.f32 1.442695, %v1763_v2  ;;  %v1830_v38 = vmul.f32 1.442695, %v1771_v21  ;;  %v1761_v14 = vsub.f32 %v5704_v54, %v5715_v45 }
 0x235   : > { %4485 = vpow2.f32 %v1784_v59  ;;  %v1804_v43 = vmul.f32 1.442695, %v6491_v11  ;;  %v1812_v61 = vmul.f32 1.442695, %v1762_v5  ;;  %v1770_v13 = vsub.f32 %v5677_v63, %v5686_v40 }
 0x236   : > { %3058 = vst.msk [vmem:[#allocation2 + $0xe8] sm:$0xff] %vm2288_vm12, %v5814_v6  ;;  %1987 = vperm.xlu0 %4424, %v5814_v6   ;;  %v5831_v24 = vpop.eup %4473  ;;  %4487 = vpow2.f32 %v1794_v41  ;;  %v1810_v46 = vmul.f32 1.442695, %v1761_v14  ;;  %v1769_v3 = vsub.f32 %v5720_v31, %v5731_v44  ;;  %v1760_v54 = vsub.f32 %v5693_v57, %v5702_v7 }
 0x237   : > { %1942 = vperm.xlu1 %4423, %v5777_v35   ;;  %4489 = vpow2.f32 %v1788_v29  ;;  %v1828_v45 = vmul.f32 1.442695, %v1770_v13  ;;  %v1767_v63 = vsub.f32 %v5736_v26, %v5749_v17  ;;  %v1768_v44 = vsub.f32 %v5709_v50, %v5718_v58 }
 0x238   : > { %4491 = vpow2.f32 %v1798_v30  ;;  %v1826_v40 = vmul.f32 1.442695, %v1769_v3  ;;  %v1808_v31 = vmul.f32 1.442695, %v1760_v54  ;;  %v1765_v7 = vsub.f32 %v5779_v0, %v5797_v62  ;;  %v6495_v3 = vld [vmem:[#allocation12_spill] sm:$0xff]  ;;  %v6496_v54 = vld [vmem:[#allocation13_spill] sm:$0xff] }
 0x239   : > { %v5840_v1 = vpop.eup %4475  ;;  %4493 = vpow2.f32 %v1792_v34  ;;  %v1822_v57 = vmul.f32 1.442695, %v1767_v63  ;;  %v1824_v17 = vmul.f32 1.442695, %v1768_v44  ;;  %v1766_v26 = vsub.f32 %v5725_v16, %v5734_v37 }
 0x23a   : > { %1997 = vperm.xlu0 %4424, %v5772_v4   ;;  %4495 = vpow2.f32 %v1802_v15  ;;  %v1818_v50 = vmul.f32 1.442695, %v1765_v7  ;;  %v1773_v58 = vsub.f32 %v5802_v47, %v5814_v6  ;;  %v1764_v62 = vsub.f32 %v5759_v9, %v5777_v35  ;;  %v6497_v7 = vld [vmem:[#allocation17_spill] sm:$0xff] }
 0x23b   : > { %1982 = vperm.xlu1 %4423, %v5800_v27   ;;  %v5845_v36 = vpop.eup %4477  ;;  %4497 = vpow2.f32 %v1796_v42  ;;  %v1820_v0 = vmul.f32 1.442695, %v1766_v26  ;;  %v1772_v47 = vsub.f32 %v5786_v55, %v5800_v27  ;;  %v6498_v26 = vld [vmem:[#allocation14_spill] sm:$0xff] }
 0x23c   : > { %v5851_v56 = vpop.eup %4479  ;;  %4499 = vpow2.f32 %v1806_v25  ;;  %v1834_v16 = vmul.f32 1.442695, %v1773_v58  ;;  %v1816_v34 = vmul.f32 1.442695, %v1764_v62 }
 0x23d   : > { %4501 = vpow2.f32 %v1800_v51  ;;  %v1832_v35 = vmul.f32 1.442695, %v1772_v47  ;;  %v6499_v47 = vld [vmem:[#allocation18_spill] sm:$0xff] }
 0x23e   : > { %2355 = vperm.xlu0 %4424, %v5831_v24   ;;  %4503 = vpow2.f32 %v1814_v19  ;;  %v6492_v19 = vld [vmem:[#allocation11_spill] sm:$0xff] }
 0x23f   : > { %1992 = vperm.xlu1 %4423, %v5752_v12   ;;  %v5858_v18 = vpop.eup %4481  ;;  %4505 = vpow2.f32 %v1804_v43 }
 0x240   : > { %v5864_v52 = vpop.eup %4483  ;;  %4507 = vpow2.f32 %v1830_v38  ;;  %v6493_v38 = vld [vmem:[#allocation15_spill] sm:$0xff] }
 0x241   : > { %4509 = vpow2.f32 %v1812_v61  ;;  %v6494_v61 = vld [vmem:[#allocation16_spill] sm:$0xff] }
 0x242   : > { %2370 = vperm.xlu0 %4424, %v5840_v1   ;;  %v5866_v23 = vpop.eup %4485  ;;  %4511 = vpow2.f32 %v1810_v46 }
 0x243   : > { %2360 = vperm.xlu1 %4423, %v5845_v36   ;;  %v5872_v32 = vpop.eup %4487  ;;  %4513 = vpow2.f32 %v1828_v45 }
 0x244   : > { %v5879_v60 = vpop.eup %4489  ;;  %4515 = vpow2.f32 %v1826_v40 }
 0x245   : > { %v5885_v33 = vpop.eup %4491  ;;  %4517 = vpow2.f32 %v1808_v31 }
 0x246   : > { %2380 = vperm.xlu0 %4424, %v5851_v56   ;;  %v5889_v53 = vpop.eup %4493  ;;  %4519 = vpow2.f32 %v1822_v57 }
 0x247   : > { %2365 = vperm.xlu1 %4423, %v5858_v18   ;;  %v5895_v48 = vpop.eup %4495  ;;  %4521 = vpow2.f32 %v1824_v17 }
 0x248   : > { %v5899_v59 = vpop.eup %4497  ;;  %4523 = vpow2.f32 %v1818_v50 }
 0x249   : > { %v5905_v41 = vpop.eup %4499  ;;  %4525 = vpow2.f32 %v1820_v0 }
 0x24a   : > { %2390 = vperm.xlu0 %4424, %v5864_v52   ;;  %v5909_v29 = vpop.eup %4501  ;;  %4527 = vpow2.f32 %v1834_v16 }
 0x24b   : > { %2375 = vperm.xlu1 %4423, %v5866_v23   ;;  %v5915_v20 = vpop.eup %4503  ;;  %4529 = vpow2.f32 %v1816_v34 }
 0x24c   : > { %v5919_v30 = vpop.eup %4505  ;;  %4531 = vpow2.f32 %v1832_v35 }
 0x24d   : > { %v5925_v39 = vpop.eup %4507 }
 0x24e   : > { %2400 = vperm.xlu0 %4424, %v5872_v32   ;;  %v5929_v22 = vpop.eup %4509 }
 0x24f   : > { %2385 = vperm.xlu1 %4423, %v5879_v60   ;;  %v5933_v37 = vpop.eup %4511 }
 0x250   : > { %v5937_v6 = vpop.eup %4513 }
 0x251   : > { %v5941_v9 = vpop.eup %4515 }
 0x252   : > { %2410 = vperm.xlu0 %4424, %v5885_v33   ;;  %v5943_v8 = vpop.eup %4517 }
 0x253   : > { %2395 = vperm.xlu1 %4423, %v5889_v53   ;;  %v5947_v15 = vpop.eup %4519 }
 0x254   : > { %v5949_v27 = vpop.eup %4521 }
 0x255   : > { %v5953_v55 = vpop.eup %4523 }
 0x256   : > { %2420 = vperm.xlu0 %4424, %v5895_v48   ;;  %v5955_v42 = vpop.eup %4525 }
 0x257   : > { %2405 = vperm.xlu1 %4423, %v5899_v59   ;;  %v5959_v10 = vpop.eup %4527 }
 0x258   : > { %v5961_v2 = vpop.eup %4529 }
 0x259   : > { %v5966_v11 = vpop.eup %4531 }
 0x25a   : > { %2430 = vperm.xlu0 %4424, %v5905_v41  }
 0x25b   : > { %2415 = vperm.xlu1 %4423, %v5909_v29  }
 0x25e   : > { %2450 = vperm.xlu0 %4424, %v5915_v20  }
 0x25f   : > { %2425 = vperm.xlu1 %4423, %v5919_v30  }
 0x262   : > { %2490 = vperm.xlu0 %4424, %v5925_v39  }
 0x263   : > { %2445 = vperm.xlu1 %4423, %v5929_v22  }
 0x266   : > { %2440 = vperm.xlu0 %4424, %v5933_v37  }
 0x267   : > { %2485 = vperm.xlu1 %4423, %v5937_v6  }
 0x26a   : > { %2480 = vperm.xlu0 %4424, %v5941_v9  }
 0x26b   : > { %2435 = vperm.xlu1 %4423, %v5943_v8  }
 0x26e   : > { %2470 = vperm.xlu0 %4424, %v5947_v15  }
 0x26f   : > { %2475 = vperm.xlu1 %4423, %v5949_v27  }
 0x271   : > { %v1853_v28 = vpop.permute.xlu1 %1852 }
 0x272   : > { %2460 = vperm.xlu0 %4424, %v5953_v55   ;;  %v2002_v21 = vsub.f32 %v6492_v19, %v1853_v28 }
 0x273   : > { %2465 = vperm.xlu1 %4423, %v5955_v42  }
 0x274   : > { %v2036_v46 = vmul.f32 1.442695, %v2002_v21  ;;  %v6500_v21 = vld [vmem:[#allocation20_spill] sm:$0xff] }
 0x275   : > { %v1893_v25 = vpop.permute.xlu1 %1892 }
 0x276   : > { %v1843_v51 = vpop.permute.xlu0 %1842  ;;  %2500 = vperm.xlu0 %4424, %v5959_v10   ;;  %v2010_v45 = vsub.f32 %v6495_v3, %v1893_v25  ;;  %4533 = vpow2.f32 %v2036_v46  ;;  %v6502_v46 = vld [vmem:[#allocation25_spill] sm:$0xff] }
 0x277   : > { %2455 = vperm.xlu1 %4423, %v5961_v2   ;;  %v2000_v40 = vsub.f32 %v6496_v54, %v1843_v51 }
 0x278   : > { %v2052_v58 = vmul.f32 1.442695, %v2010_v45 }
 0x279   : > { %v2032_v0 = vmul.f32 1.442695, %v2000_v40 }
 0x27a   : > { %v1898_v43 = vpop.permute.xlu0 %1897  ;;  %v1883_v5 = vpop.permute.xlu1 %1882 }
 0x27b   : > { %v2011_v14 = vsub.f32 %v6493_v38, %v1898_v43  ;;  %v2008_v13 = vsub.f32 %v6494_v61, %v1883_v5  ;;  %2495 = vperm.xlu1 %4423, %v5966_v11   ;;  %v6501_v38 = vld [vmem:[#allocation22_spill] sm:$0xff] }
 0x27d   : > { %v2054_v63 = vmul.f32 1.442695, %v2011_v14  ;;  %v2048_v31 = vmul.f32 1.442695, %v2008_v13 }
 0x27e   : > { %v1888_v44 = vpop.permute.xlu0 %1887  ;;  %v1858_v57 = vpop.permute.xlu1 %1857 }
 0x27f   : > { %v2009_v17 = vsub.f32 %v6497_v7, %v1888_v44  ;;  %v2003_v50 = vsub.f32 %v6498_v26, %v1858_v57  ;;  %4535 = vpow2.f32 %v2054_v63  ;;  %v6503_v63 = vld [vmem:[#allocation21_spill] sm:$0xff] }
 0x280   : > { %4537 = vpow2.f32 %v2048_v31 }
 0x281   : > { %v2050_v62 = vmul.f32 1.442695, %v2009_v17  ;;  %v2038_v16 = vmul.f32 1.442695, %v2003_v50 }
 0x282   : > { %v1848_v34 = vpop.permute.xlu1 %1847 }
 0x283   : > { %4539 = vpow2.f32 %v2050_v62  ;;  %v2001_v35 = vsub.f32 %v6499_v47, %v1848_v34  ;;  %v4534_v5 = vpop.eup %4533  ;;  %v4469_v62 = vld [vmem:[%s5010_s7 + $0x70] sm:$0xff]   ;;  %v6504_v34 = vld [vmem:[#allocation26_spill] sm:$0xff] }
 0x284   : > { %4541 = vpow2.f32 %v2052_v58 }
 0x285   : > { %4543 = vpow2.f32 %v2032_v0  ;;  %v2034_v28 = vmul.f32 1.442695, %v2001_v35  ;;  %v1918_v51 = vpop.permute.xlu0 %1917 }
 0x286   : > { %4545 = vpow2.f32 %v2038_v16  ;;  %v1873_v25 = vpop.permute.xlu1 %1872  ;;  %v2015_v31 = vsub.f32 %v6503_v63, %v1918_v51  ;;  %v4471_v63 = vld [vmem:[%s5010_s7 + $0x68] sm:$0xff]  }
 0x287   : > { %4547 = vpow2.f32 %v2034_v28  ;;  %v2006_v43 = vsub.f32 %v6500_v21, %v1873_v25  ;;  %v6505_v25 = vld [vmem:[#allocation24_spill] sm:$0xff] }
 0x288   : > { %v2062_v28 = vmul.f32 1.442695, %v2015_v31 }
 0x289   : > { %v2044_v44 = vmul.f32 1.442695, %v2006_v43 }
 0x28a   : > { %v1913_v19 = vpop.permute.xlu1 %1912 }
 0x28b   : > { %v2014_v14 = vsub.f32 %v6501_v38, %v1913_v19  ;;  %4549 = vpow2.f32 %v2044_v44  ;;  %v2166_v19 = vsel %vm1615_vm4, %v4534_v5, 0.0 }
 0x28c   : > { %v5978_v13 = vpop.eup %4535 }
 0x28d   : > { %v1908_v61 = vpop.permute.xlu0 %1907  ;;  %v4538_v54 = vpop.eup %4537  ;;  %v2060_v7 = vmul.f32 1.442695, %v2014_v14 }
 0x28e   : > { %v2013_v3 = vsub.f32 %v6502_v46, %v1908_v61  ;;  %v1863_v45 = vpop.permute.xlu1 %1862  ;;  %v4466_v46 = vld [vmem:[%s5010_s7 + $0x50] sm:$0xff]  }
 0x28f   : > { %v2004_v51 = vsub.f32 %v6505_v25, %v1863_v45  ;;  %4551 = vpow2.f32 %v2060_v7 }
 0x290   : > { %v5981_v40 = vpop.eup %4539  ;;  %v2058_v58 = vmul.f32 1.442695, %v2013_v3  ;;  %v6506_v3 = vld [vmem:[#allocation19_spill] sm:$0xff] }
 0x291   : > { %v4542_v57 = vpop.eup %4541  ;;  %v2549_v17 = vpack.c.bf16 %v5981_v40, %v4538_v54  ;;  %v2040_v31 = vmul.f32 1.442695, %v2004_v51 }
 0x292   : > { %v4544_v26 = vpop.eup %4543  ;;  %v2550_v50 = vpack.c.bf16 %v5978_v13, %v4542_v57  ;;  %v1903_v0 = vpop.permute.xlu1 %1902  ;;  %4553 = vpow2.f32 %v2058_v58  ;;  %v6508_v58 = vld [vmem:[#allocation23_spill] sm:$0xff] }
 0x293   : > { %v5987_v16 = vpop.eup %4545  ;;  %v2012_v47 = vsub.f32 %v6504_v34, %v1903_v0  ;;  %4226 = vmatprep.mubr.msk.bf16.mxu1 %vm1615_vm4, %v2549_v17  ;;  %v4472_v34 = vld [vmem:[%s5010_s7 + $0x60] sm:$0xff]   ;;  %v2160_v51 = vsel %vm1615_vm4, %v4544_v26, 0.0 }
 0x294   : > { %v4548_v35 = vpop.eup %4547  ;;  %4227 = vmatmul.mubr.msk.bf16.vlgmr.msra.gmra.mxu1 %vm1615_vm4, %v2550_v50  ;;  %v2546_v14 = vpack.c.bf16 %v5987_v16, %v4534_v5  ;;  %v6507_v5 = vld [vmem:[#allocation45_spill] sm:$0xff]  ;;  %v4468_v50 = vld [vmem:[%s5010_s7 + $0x48] sm:$0xff]  }
 0x295   : > { %v2056_v21 = vmul.f32 1.442695, %v2012_v47  ;;  %v5994_v43 = vpop.permute.xlu0 %1937  ;;  %2167 = vadd.xlane.f32.xlu0 %v2166_v19  ;;  %v2545_v38 = vpack.c.bf16 %v4548_v35, %v4544_v26  ;;  %4251 = vmatpush3.bf16.msra.mxu1 %v5792_v49  ;;  %v2190_v49 = vsel %vm1615_vm4, %v4542_v57, 0.0  ;;  %v2184_v47 = vsel %vm1615_vm4, %v4538_v54, 0.0  ;;  %v4470_v19 = vld [vmem:[%s5010_s7 + $0x40] sm:$0xff]  }
 0x296   : > { %v1878_v61 = vpop.permute.xlu1 %1877  ;;  %4252 = vmatprep.subr.bf16.mxu1 %v4469_v62  ;;  %v2169_v26 = vsel %vm1615_vm4, %v5987_v16, 0.0 }
 0x297   : > { %4555 = vpow2.f32 %v2056_v21  ;;  %v2007_v45 = vsub.f32 %v6506_v3, %v1878_v61  ;;  %4210 = vmatprep.mubr.msk.bf16.mxu0 %vm1615_vm4, %v2545_v38  ;;  %v2163_v38 = vsel %vm1615_vm4, %v4548_v35, 0.0 }
 0x298   : > { %4557 = vpow2.f32 %v2062_v28  ;;  %4211 = vmatmul.mubr.msk.bf16.vlgmr.msra.gmra.mxu0 %vm1615_vm4, %v2546_v14  ;;  %v6015_v14 = vpop.eup %4549 }
 0x299   : > { %v6004_v44 = vpop.permute.xlu0 %1977  ;;  %2191 = vadd.xlane.f32.xlu0 %v2190_v49  ;;  %4235 = vmatpush3.bf16.msra.mxu0 %v6507_v5  ;;  %v2046_v7 = vmul.f32 1.442695, %v2007_v45  ;;  %4559 = vpow2.f32 %v2040_v31  ;;  %v6511_v49 = vld [vmem:[#allocation28_spill] sm:$0xff] }
 0x29a   : > { %v1868_v17 = vpop.permute.xlu1 %1867  ;;  %4236 = vmatprep.subr.bf16.mxu0 %v4466_v46  ;;  %4253 = vmatpush3.bf16.msra.mxu1 %v4469_v62  ;;  %v6509_v62 = vld [vmem:[#allocation27_spill] sm:$0xff] }
 0x29b   : > { %v2005_v0 = vsub.f32 %v6508_v58, %v1868_v17  ;;  %4254 = vmatprep.subr.bf16.mxu1 %v4471_v63  ;;  %4561 = vpow2.f32 %v2046_v7  ;;  %v6512_v7 = vld [vmem:[#allocation29_spill] sm:$0xff] }
 0x29c   : > { %v4552_v61 = vpop.eup %4551  ;;  %v2019_v17 = vsub.f32 %v6512_v7, %v5994_v43 }
 0x29d   : > { %v2042_v28 = vmul.f32 1.442695, %v2005_v0  ;;  %v1928_v57 = vpop.permute.xlu0 %1927  ;;  %2185 = vadd.xlane.f32.xlu0 %v2184_v47  ;;  %4237 = vmatpush3.bf16.msra.mxu0 %v4466_v46  ;;  %v6510_v46 = vld [vmem:[#allocation32_spill] sm:$0xff]  ;;  %v6513_v47 = vld [vmem:[#allocation35_spill] sm:$0xff] }
 0x29e   : > { %v1933_v25 = vpop.permute.xlu1 %1932  ;;  %4238 = vmatprep.subr.bf16.mxu0 %v4468_v50  ;;  %4255 = vmatpush3.bf16.msra.mxu1 %v4471_v63  ;;  %v2017_v3 = vsub.f32 %v6510_v46, %v1928_v57 }
 0x29f   : > { %4563 = vpow2.f32 %v2042_v28  ;;  %v2018_v21 = vsub.f32 %v6509_v62, %v1933_v25  ;;  %2161 = vadd.xlane.f32.xlu1 %v2160_v51  ;;  %4256 = vmatprep.subr.bf16.mxu1 %v4472_v34  ;;  %v6020_v63 = vpop.eup %4553  ;;  %v2193_v25 = vsel %vm1615_vm4, %v5978_v13, 0.0  ;;  %v6514_v62 = vld [vmem:[#allocation31_spill] sm:$0xff] }
 0x2a1   : > { %v2068_v54 = vmul.f32 1.442695, %v2018_v21  ;;  %2164 = vadd.xlane.f32.xlu0 %v2163_v38  ;;  %4239 = vmatpush3.bf16.msra.mxu0 %v4468_v50  ;;  %v1968_v31 = vpop.permute.xlu0 %1967  ;;  %v2178_v50 = vsel %vm1615_vm4, %v6015_v14, 0.0  ;;  %v2070_v21 = vmul.f32 1.442695, %v2019_v17  ;;  %v6515_v38 = vld [vmem:[#allocation30_spill] sm:$0xff] }
 0x2a2   : > { %v1973_v45 = vpop.permute.xlu1 %1972  ;;  %4240 = vmatprep.subr.bf16.mxu0 %v4470_v19  ;;  %4257 = vmatpush3.bf16.msra.mxu1 %v4472_v34  ;;  %v2066_v34 = vmul.f32 1.442695, %v2017_v3  ;;  %v2025_v28 = vsub.f32 %v6513_v47, %v1968_v31  ;;  %v2187_v31 = vsel %vm1615_vm4, %v5981_v40, 0.0 }
 0x2a3   : > { %v2026_v5 = vsub.f32 %v6511_v49, %v1973_v45  ;;  %2170 = vadd.xlane.f32.xlu1 %v2169_v26  ;;  %4565 = vpow2.f32 %v2068_v54  ;;  %v2027_v54 = vsub.f32 %v6515_v38, %v6004_v44 }
 0x2a4   : > { %v4556_v35 = vpop.eup %4555  ;;  %v2082_v13 = vmul.f32 1.442695, %v2025_v28 }
 0x2a5   : > { %v4558_v58 = vpop.eup %4557  ;;  %v2084_v0 = vmul.f32 1.442695, %v2026_v5  ;;  %2179 = vadd.xlane.f32.xlu0 %v2178_v50  ;;  %v2551_v16 = vpack.c.bf16 %v6020_v63, %v4556_v35  ;;  %4241 = vmatpush3.bf16.msra.mxu0 %v4470_v19  ;;  %v2202_v19 = vsel %vm1615_vm4, %v4552_v61, 0.0  ;;  %v1958_v3 = vpop.permute.xlu0 %1957  ;;  %v6516_v5 = vld [vmem:[#allocation33_spill] sm:$0xff]  ;;  %v2086_v17 = vmul.f32 1.442695, %v2027_v54 }
 0x2a6   : > { %v1923_v57 = vpop.permute.xlu1 %1922  ;;  %v2552_v51 = vpack.c.bf16 %v4558_v58, %v4552_v61  ;;  %v4560_v46 = vpop.eup %4559 }
 0x2a7   : > { %v2016_v43 = vsub.f32 %v6514_v62, %v1923_v57  ;;  %2194 = vadd.xlane.f32.xlu1 %v2193_v25  ;;  %4230 = vmatprep.mubr.msk.bf16.mxu1 %vm1615_vm4, %v2551_v16  ;;  %4567 = vpow2.f32 %v2084_v0  ;;  %v2172_v61 = vsel %vm1615_vm4, %v4560_v46, 0.0  ;;  %v6518_v25 = vld [vmem:[#allocation34_spill] sm:$0xff]  ;;  %v6519_v62 = vld [vmem:[#allocation36_spill] sm:$0xff] }
 0x2a8   : > { %4231 = vmatmul.mubr.msk.bf16.gmra.mxu1 %vm1615_vm4, %v2552_v51  ;;  %4569 = vpow2.f32 %v2066_v34  ;;  %v4562_v49 = vpop.eup %4561  ;;  %v6517_v34 = vld [vmem:[#allocation40_spill] sm:$0xff] }
 0x2a9   : > { %v2064_v45 = vmul.f32 1.442695, %v2016_v43  ;;  %2203 = vadd.xlane.f32.xlu0 %v2202_v19  ;;  %v2181_v40 = vsel %vm1615_vm4, %v4562_v49, 0.0  ;;  %v2548_v57 = vpack.c.bf16 %v4562_v49, %v6015_v14  ;;  %v2023_v43 = vsub.f32 %v6519_v62, %v1958_v3 }
 0x2aa   : > { %v1963_v26 = vpop.permute.xlu1 %1962 }
 0x2ab   : > { %4571 = vpow2.f32 %v2064_v45  ;;  %v2024_v7 = vsub.f32 %v6516_v5, %v1963_v26  ;;  %2188 = vadd.xlane.f32.xlu1 %v2187_v31  ;;  %v6520_v45 = vld [vmem:[#allocation42_spill] sm:$0xff]  ;;  %v2205_v26 = vsel %vm1615_vm4, %v4558_v58, 0.0  ;;  %v6521_v31 = vld [vmem:[#allocation39_spill] sm:$0xff]  ;;  %v2078_v5 = vmul.f32 1.442695, %v2023_v43  ;;  %v6523_v58 = vld [vmem:[#allocation41_spill] sm:$0xff] }
 0x2ac   : > { %v4564_v44 = vpop.eup %4563  ;;  %4573 = vpow2.f32 %v2070_v21  ;;  %v2196_v21 = vsel %vm1615_vm4, %v4556_v35, 0.0 }
 0x2ad   : > { %v2080_v50 = vmul.f32 1.442695, %v2024_v7  ;;  %v1948_v0 = vpop.permute.xlu0 %1947  ;;  %2173 = vadd.xlane.f32.xlu0 %v2172_v61  ;;  %v2547_v16 = vpack.c.bf16 %v4564_v44, %v4560_v46  ;;  %4575 = vpow2.f32 %v2082_v13 }
 0x2ae   : > { %v2021_v47 = vsub.f32 %v6517_v34, %v1948_v0  ;;  %v1953_v28 = vpop.permute.xlu1 %1952  ;;  %v2175_v34 = vsel %vm1615_vm4, %v4564_v44, 0.0  ;;  %v2199_v44 = vsel %vm1615_vm4, %v6020_v63, 0.0 }
 0x2af   : > { %4577 = vpow2.f32 %v2080_v50  ;;  %v2022_v51 = vsub.f32 %v6518_v25, %v1953_v28  ;;  %2182 = vadd.xlane.f32.xlu1 %v2181_v40  ;;  %4214 = vmatprep.mubr.msk.bf16.mxu0 %vm1615_vm4, %v2547_v16  ;;  %v6522_v50 = vld [vmem:[#allocation38_spill] sm:$0xff] }
 0x2b0   : > { %4579 = vpow2.f32 %v2086_v17  ;;  %4215 = vmatmul.mubr.msk.bf16.gmra.mxu0 %vm1615_vm4, %v2548_v57  ;;  %v4566_v38 = vpop.eup %4565  ;;  %v2074_v46 = vmul.f32 1.442695, %v2021_v47 }
 0x2b1   : > { %v2076_v54 = vmul.f32 1.442695, %v2022_v51  ;;  %v1988_v19 = vpop.permute.xlu0 %1987  ;;  %2197 = vadd.xlane.f32.xlu0 %v2196_v21  ;;  %v2214_v3 = vsel %vm1615_vm4, %v4566_v38, 0.0 }
 0x2b2   : > { %v2029_v14 = vsub.f32 %v6520_v45, %v1988_v19  ;;  %v1943_v13 = vpop.permute.xlu1 %1942 }
 0x2b3   : > { %v2020_v49 = vsub.f32 %v6521_v31, %v1943_v13  ;;  %2206 = vadd.xlane.f32.xlu1 %v2205_v26  ;;  %4581 = vpow2.f32 %v2076_v54 }
 0x2b4   : > { %v4568_v7 = vpop.eup %4567  ;;  %4583 = vpow2.f32 %v2074_v46  ;;  %v2090_v61 = vmul.f32 1.442695, %v2029_v14  ;;  %v6524_v46 = vld [vmem:[#allocation37_spill] sm:$0xff] }
 0x2b5   : > { %v2072_v17 = vmul.f32 1.442695, %v2020_v49  ;;  %v1998_v35 = vpop.permute.xlu0 %1997  ;;  %2215 = vadd.xlane.f32.xlu0 %v2214_v3  ;;  %v4570_v47 = vpop.eup %4569  ;;  %v2238_v57 = vsel %vm1615_vm4, %v4568_v7, 0.0 }
 0x2b6   : > { %v2031_v0 = vsub.f32 %v6522_v50, %v1998_v35  ;;  %v1983_v16 = vpop.permute.xlu1 %1982 }
 0x2b7   : > { %4585 = vpow2.f32 %v2072_v17  ;;  %v2028_v28 = vsub.f32 %v6523_v58, %v1983_v16  ;;  %2176 = vadd.xlane.f32.xlu1 %v2175_v34  ;;  %v2211_v34 = vsel %vm1615_vm4, %v4570_v47, 0.0 }
 0x2b8   : > { %v4572_v40 = vpop.eup %4571  ;;  %4587 = vpow2.f32 %v2078_v5  ;;  %v2094_v21 = vmul.f32 1.442695, %v2031_v0 }
 0x2b9   : > { %v4574_v25 = vpop.eup %4573  ;;  %v2088_v51 = vmul.f32 1.442695, %v2028_v28  ;;  %2239 = vadd.xlane.f32.xlu0 %v2238_v57  ;;  %v2553_v62 = vpack.c.bf16 %v4570_v47, %v4572_v40  ;;  %4589 = vpow2.f32 %v2090_v61  ;;  %v2208_v13 = vsel %vm1615_vm4, %v4572_v40, 0.0  ;;  %v6069_v16 = vpop.permute.xlu0 %2355 }
 0x2ba   : > { %v2554_v43 = vpack.c.bf16 %v4574_v25, %v4566_v38  ;;  %v1993_v54 = vpop.permute.xlu1 %1992  ;;  %v4576_v19 = vpop.eup %4575  ;;  %v2217_v63 = vsel %vm1615_vm4, %v4574_v25, 0.0 }
 0x2bb   : > { %4591 = vpow2.f32 %v2088_v51  ;;  %v2030_v45 = vsub.f32 %v6524_v46, %v1993_v54  ;;  %2200 = vadd.xlane.f32.xlu1 %v2199_v44  ;;  %4242 = vmatprep.mubr.msk.bf16.mxu0 %vm1615_vm4, %v2553_v62  ;;  %v2235_v25 = vsel %vm1615_vm4, %v4576_v19, 0.0 }
 0x2bc   : > { %v4578_v14 = vpop.eup %4577  ;;  %4243 = vmatmul.mubr.msk.bf16.vlgmr.msra.gmra.mxu0 %vm1615_vm4, %v2554_v43  ;;  %4593 = vpow2.f32 %v2094_v21 }
 0x2bd   : > { %v4580_v26 = vpop.eup %4579  ;;  %v2092_v38 = vmul.f32 1.442695, %v2030_v45  ;;  %2209 = vadd.xlane.f32.xlu0 %v2208_v13  ;;  %v2557_v31 = vpack.c.bf16 %v4576_v19, %v4578_v14  ;;  %v2232_v5 = vsel %vm1615_vm4, %v4578_v14, 0.0  ;;  %v6076_v43 = vpop.permute.xlu0 %2370 }
 0x2be   : > { %v2558_v49 = vpack.c.bf16 %v4580_v26, %v4568_v7  ;;  %v2241_v17 = vsel %vm1615_vm4, %v4580_v26, 0.0  ;;  %v6081_v44 = vpop.permute.xlu1 %2360 }
 0x2bf   : > { %4595 = vpow2.f32 %v2092_v38  ;;  %2218 = vadd.xlane.f32.xlu1 %v2217_v63  ;;  %4258 = vmatprep.mubr.msk.bf16.mxu1 %vm1615_vm4, %v2557_v31  ;;  %v6525_v31 = vld [vmem:[#allocation43_spill] sm:$0xff] }
 0x2c0   : > { %4259 = vmatmul.mubr.msk.bf16.vlgmr.msra.gmra.mxu1 %vm1615_vm4, %v2558_v49  ;;  %v4582_v3 = vpop.eup %4581  ;;  %v6526_v49 = vsub.f32 %v6525_v31, %v5752_v12 }
 0x2c1   : > { %2233 = vadd.xlane.f32.xlu0 %v2232_v5  ;;  %v4584_v35 = vpop.eup %4583  ;;  %v2226_v7 = vsel %vm1615_vm4, %v4582_v3, 0.0  ;;  %v6084_v46 = vpop.permute.xlu0 %2380  ;;  %v6527_v5 = vld [vmem:[#allocation44_spill] sm:$0xff] }
 0x2c2   : > { %v6088_v13 = vpop.permute.xlu1 %2365  ;;  %v2223_v26 = vsel %vm1615_vm4, %v4584_v35, 0.0  ;;  %v1836_v63 = vmul.f32 1.442695, %v6526_v49 }
 0x2c3   : > { %2242 = vadd.xlane.f32.xlu1 %v2241_v17 }
 0x2c4   : > { %v4586_v61 = vpop.eup %4585  ;;  %4597 = vpow2.f32 %v1836_v63 }
 0x2c5   : > { %v4588_v50 = vpop.eup %4587  ;;  %2227 = vadd.xlane.f32.xlu0 %v2226_v7  ;;  %v2555_v0 = vpack.c.bf16 %v4584_v35, %v4586_v61  ;;  %v2220_v19 = vsel %vm1615_vm4, %v4586_v61, 0.0  ;;  %v6091_v38 = vpop.permute.xlu0 %2390 }
 0x2c6   : > { %v2556_v58 = vpack.c.bf16 %v4588_v50, %v4582_v3  ;;  %v4590_v28 = vpop.eup %4589  ;;  %v2229_v54 = vsel %vm1615_vm4, %v4588_v50, 0.0  ;;  %v6528_v3 = vsub.f32 %v6527_v5, %v5772_v4  ;;  %v6100_v7 = vpop.permute.xlu1 %2375  ;;  %v2098_v5 = vld [vmem:[#allocation3 + $0x10] sm:$0xff] }
 0x2c7   : > { %2212 = vadd.xlane.f32.xlu1 %v2211_v34  ;;  %4246 = vmatprep.mubr.msk.bf16.mxu0 %vm1615_vm4, %v2555_v0  ;;  %v2247_v61 = vsel %vm1615_vm4, %v4590_v28, 0.0 }
 0x2c8   : > { %v4592_v40 = vpop.eup %4591  ;;  %4247 = vmatmul.mubr.msk.bf16.gmra.mxu0 %vm1615_vm4, %v2556_v58  ;;  %v1838_v17 = vmul.f32 1.442695, %v6528_v3  ;;  %v2130_v3 = vmul.f32 %v5858_v18, %v2098_v5  ;;  %v2097_v5 = vld [vmem:[#allocation3 + $0x8] sm:$0xff] }
 0x2c9   : > { %v2559_v57 = vpack.c.bf16 %v4590_v28, %v4592_v40  ;;  %v4594_v51 = vpop.eup %4593  ;;  %v2244_v14 = vsel %vm1615_vm4, %v4592_v40, 0.0  ;;  %v6102_v50 = vpop.permute.xlu0 %2400 }
 0x2ca   : > { %v2253_v45 = vsel %vm1615_vm4, %v4594_v51, 0.0  ;;  %4599 = vpow2.f32 %v1838_v17  ;;  %v6104_v35 = vpop.permute.xlu1 %2385 }
 0x2cb   : > { %2236 = vadd.xlane.f32.xlu1 %v2235_v25  ;;  %4262 = vmatprep.mubr.msk.bf16.mxu1 %vm1615_vm4, %v2559_v57 }
 0x2cc   : > { %v4596_v62 = vpop.eup %4595 }
 0x2cd   : > { %v2250_v47 = vsel %vm1615_vm4, %v4596_v62, 0.0  ;;  %v2560_v21 = vpack.c.bf16 %v4594_v51, %v4596_v62  ;;  %v6106_v0 = vpop.permute.xlu0 %2410 }
 0x2ce   : > { %2251 = vadd.xlane.f32.xlu0 %v2250_v47  ;;  %v6108_v34 = vpop.permute.xlu1 %2395 }
 0x2cf   : > { %2230 = vadd.xlane.f32.xlu1 %v2229_v54  ;;  %4263 = vmatmul.mubr.msk.bf16.gmra.mxu1 %vm1615_vm4, %v2560_v21 }
 0x2d1   : > { %v6110_v12 = vpop.eup %4597  ;;  %v6112_v58 = vpop.permute.xlu0 %2420 }
 0x2d2   : > { %2221 = vadd.xlane.f32.xlu0 %v2220_v19  ;;  %v6118_v28 = vpop.permute.xlu1 %2405 }
 0x2d3   : > { %2254 = vadd.xlane.f32.xlu1 %v2253_v45 }
 0x2d5   : > { %v6120_v40 = vpop.permute.xlu0 %2430 }
 0x2d6   : > { %2245 = vadd.xlane.f32.xlu0 %v2244_v14  ;;  %v6122_v57 = vpop.permute.xlu1 %2415 }
 0x2d7   : > { %2224 = vadd.xlane.f32.xlu1 %v2223_v26  ;;  %v6114_v4 = vpop.eup %4599 }
 0x2d9   : > { %v6124_v25 = vpop.permute.xlu0 %2450 }
 0x2da   : > { %6529 = vst [vmem:[#allocation11_spill] sm:$0xff] %v6124_v25  ;;  %v6126_v51 = vpop.permute.xlu1 %2425 }
 0x2db   : > { %2248 = vadd.xlane.f32.xlu1 %v2247_v61 }
 0x2dd   : > { %v6128_v62 = vpop.permute.xlu0 %2490 }
 0x2de   : > { %6530 = vst [vmem:[#allocation15_spill] sm:$0xff] %v6128_v62  ;;  %v6130_v47 = vpop.permute.xlu1 %2445  ;;  %v2106_v62 = vld [vmem:[#allocation3 + $0x50] sm:$0xff] }
 0x2e1   : > { %v6132_v21 = vpop.permute.xlu0 %2440 }
 0x2e2   : > { %6531 = vst [vmem:[#allocation16_spill] sm:$0xff] %v6132_v21  ;;  %v6134_v54 = vpop.permute.xlu1 %2485 }
 0x2e3   : > { %6532 = vst [vmem:[#allocation12_spill] sm:$0xff] %v6134_v54 }
 0x2e5   : > { %v6136_v19 = vpop.permute.xlu0 %2480 }
 0x2e6   : > { %6533 = vst [vmem:[#allocation13_spill] sm:$0xff] %v6136_v19  ;;  %v6138_v45 = vpop.permute.xlu1 %2435 }
 0x2e9   : > { %v6140_v14 = vpop.permute.xlu0 %2470 }
 0x2ea   : > { %6534 = vst [vmem:[#allocation17_spill] sm:$0xff] %v6140_v14  ;;  %v6142_v26 = vpop.permute.xlu1 %2475  ;;  %v2138_v14 = vmul.f32 %v5899_v59, %v2106_v62  ;;  %v2129_v62 = vmul.f32 %v5845_v36, %v2097_v5  ;;  %v2105_v5 = vld [vmem:[#allocation3 + $0x48] sm:$0xff] }
 0x2eb   : > { %6535 = vst [vmem:[#allocation14_spill] sm:$0xff] %v6142_v26  ;;  %v2104_v26 = vld [vmem:[#allocation3 + $0x40] sm:$0xff] }
 0x2ec   : > { %2505 = vperm.xlu1 %4423, %v6110_v12   ;;  %2510 = vperm.xlu0 %4424, %v6114_v4  }
 0x2ed   : > { %v6144_v31 = vpop.permute.xlu0 %2460 }
 0x2ee   : > { %6536 = vst [vmem:[#allocation18_spill] sm:$0xff] %v6144_v31  ;;  %v6146_v49 = vpop.permute.xlu1 %2465 }
 0x2ef   : > { %6537 = vst [vmem:[#allocation20_spill] sm:$0xff] %v6146_v49  ;;  %v2096_v49 = vld [vmem:[#allocation3] sm:$0xff] }
 0x2f0   : > { %v2128_v25 = vmul.f32 %v5831_v24, %v2096_v49 }
 0x2f1   : > { %v6148_v63 = vpop.permute.xlu0 %2500 }
 0x2f2   : > { %6538 = vst [vmem:[#allocation22_spill] sm:$0xff] %v6148_v63  ;;  %v6151_v17 = vpop.permute.xlu1 %2455  ;;  %v2136_v63 = vmul.f32 %v5889_v53, %v2104_v26  ;;  %v2107_v26 = vld [vmem:[#allocation3 + $0x58] sm:$0xff] }
 0x2f3   : > { %6539 = vst [vmem:[#allocation25_spill] sm:$0xff] %v6151_v17  ;;  %v2139_v36 = vmul.f32 %v5885_v33, %v2107_v26 }
 0x2f6   : > { %v6155_v31 = vpop.permute.xlu1 %2495 }
 0x31e   : > { %v2168_v61 = vpop.xlane.xlu0 %2167 }
 0x31f   : > { %v2258_v19 = vadd.f32 %v2168_v61, %v2130_v3  ;;  %v2099_v61 = vld [vmem:[#allocation3 + $0x18] sm:$0xff] }
 0x321   : > { %2291 = vst.msk [vmem:[#allocation3 + $0x10] sm:$0xff] %vm2288_vm12, %v2258_v19  ;;  %v2102_v19 = vld [vmem:[#allocation3 + $0x30] sm:$0xff] }
 0x322   : > { %v2192_v21 = vpop.xlane.xlu0 %2191  ;;  %v2134_v24 = vmul.f32 %v5879_v60, %v2102_v19  ;;  %v2137_v60 = vmul.f32 %v5872_v32, %v2105_v5  ;;  %v2103_v19 = vld [vmem:[#allocation3 + $0x38] sm:$0xff]  ;;  %v2101_v5 = vld [vmem:[#allocation3 + $0x28] sm:$0xff] }
 0x323   : > { %v2266_v54 = vadd.f32 %v2192_v21, %v2138_v14 }
 0x325   : > { %2299 = vst.msk [vmem:[#allocation3 + $0x50] sm:$0xff] %vm2288_vm12, %v2266_v54  ;;  %v2131_v54 = vmul.f32 %v5840_v1, %v2099_v61 }
 0x326   : > { %v2186_v18 = vpop.xlane.xlu0 %2185 }
 0x327   : > { %v2264_v17 = vadd.f32 %v2186_v18, %v2136_v63  ;;  %v2110_v18 = vld [vmem:[#allocation3 + $0x70] sm:$0xff] }
 0x328   : > { %v2162_v3 = vpop.xlane.xlu1 %2161  ;;  %v2142_v1 = vmul.f32 %v5919_v30, %v2110_v18  ;;  %v2135_v30 = vmul.f32 %v5864_v52, %v2103_v19 }
 0x329   : > { %2297 = vst.msk [vmem:[#allocation3 + $0x40] sm:$0xff] %vm2288_vm12, %v2264_v17  ;;  %v2256_v59 = vadd.f32 %v2162_v3, %v2128_v25 }
 0x32a   : > { %v2165_v21 = vpop.xlane.xlu0 %2164 }
 0x32b   : > { %2289 = vst.msk [vmem:[#allocation3] sm:$0xff] %vm2288_vm12, %v2256_v59  ;;  %v2257_v14 = vadd.f32 %v2165_v21, %v2129_v62  ;;  %v2100_v59 = vld [vmem:[#allocation3 + $0x20] sm:$0xff] }
 0x32c   : > { %v2171_v53 = vpop.xlane.xlu1 %2170  ;;  %v2132_v33 = vmul.f32 %v5866_v23, %v2100_v59 }
 0x32d   : > { %2290 = vst.msk [vmem:[#allocation3 + $0x8] sm:$0xff] %vm2288_vm12, %v2257_v14  ;;  %v2259_v63 = vadd.f32 %v2171_v53, %v2131_v54  ;;  %v2108_v53 = vld [vmem:[#allocation3 + $0x60] sm:$0xff] }
 0x32e   : > { %v2180_v49 = vpop.xlane.xlu0 %2179  ;;  %v2140_v32 = vmul.f32 %v5909_v29, %v2108_v53  ;;  %v2133_v29 = vmul.f32 %v5851_v56, %v2101_v5  ;;  %v2115_v53 = vld [vmem:[#allocation3 + $0x98] sm:$0xff]  ;;  %v2113_v5 = vld [vmem:[#allocation3 + $0x88] sm:$0xff] }
 0x32f   : > { %2292 = vst.msk [vmem:[#allocation3 + $0x18] sm:$0xff] %vm2288_vm12, %v2259_v63  ;;  %v2262_v25 = vadd.f32 %v2180_v49, %v2134_v24  ;;  %v2111_v24 = vld [vmem:[#allocation3 + $0x78] sm:$0xff] }
 0x330   : > { %v2195_v17 = vpop.xlane.xlu1 %2194  ;;  %v2143_v23 = vmul.f32 %v5905_v41, %v2111_v24 }
 0x331   : > { %2295 = vst.msk [vmem:[#allocation3 + $0x30] sm:$0xff] %vm2288_vm12, %v2262_v25  ;;  %v2267_v3 = vadd.f32 %v2195_v17, %v2139_v36  ;;  %v2114_v25 = vld [vmem:[#allocation3 + $0x90] sm:$0xff] }
 0x332   : > { %v2204_v61 = vpop.xlane.xlu0 %2203  ;;  %v2146_v52 = vmul.f32 %v5929_v22, %v2114_v25 }
 0x333   : > { %2300 = vst.msk [vmem:[#allocation3 + $0x58] sm:$0xff] %vm2288_vm12, %v2267_v3  ;;  %v2270_v62 = vadd.f32 %v2204_v61, %v2142_v1  ;;  %v2122_v61 = vld [vmem:[#allocation3 + $0xd0] sm:$0xff] }
 0x334   : > { %v2189_v21 = vpop.xlane.xlu1 %2188  ;;  %v2154_v41 = vmul.f32 %v5937_v6, %v2122_v61  ;;  %v2147_v6 = vmul.f32 %v5915_v20, %v2115_v53  ;;  %v2331_v61 = vld [vmem:[#allocation4 + $0x50] sm:$0xff]  ;;  %v2119_v53 = vld [vmem:[#allocation3 + $0xb8] sm:$0xff] }
 0x335   : > { %2303 = vst.msk [vmem:[#allocation3 + $0x70] sm:$0xff] %vm2288_vm12, %v2270_v62  ;;  %v2265_v14 = vadd.f32 %v2189_v21, %v2137_v60  ;;  %v2109_v60 = vld [vmem:[#allocation3 + $0x68] sm:$0xff] }
 0x336   : > { %v2174_v54 = vpop.xlane.xlu0 %2173  ;;  %v2141_v22 = vmul.f32 %v5895_v48, %v2109_v60  ;;  %v2523_v60 = vmul.f32 %v6118_v28, %v2331_v61 }
 0x337   : > { %2298 = vst.msk [vmem:[#allocation3 + $0x48] sm:$0xff] %vm2288_vm12, %v2265_v14  ;;  %v2260_v26 = vadd.f32 %v2174_v54, %v2132_v33  ;;  %v2112_v14 = vld [vmem:[#allocation3 + $0x80] sm:$0xff] }
 0x338   : > { %v2183_v63 = vpop.xlane.xlu1 %2182  ;;  %v2144_v56 = vmul.f32 %v5943_v8, %v2112_v14 }
 0x339   : > { %2293 = vst.msk [vmem:[#allocation3 + $0x20] sm:$0xff] %vm2288_vm12, %v2260_v26  ;;  %v2263_v49 = vadd.f32 %v2183_v63, %v2135_v30  ;;  %v2120_v63 = vld [vmem:[#allocation3 + $0xc0] sm:$0xff] }
 0x33a   : > { %v2198_v18 = vpop.xlane.xlu0 %2197  ;;  %v2152_v48 = vmul.f32 %v5949_v27, %v2120_v63  ;;  %v2145_v27 = vmul.f32 %v5933_v37, %v2113_v5 }
 0x33b   : > { %2296 = vst.msk [vmem:[#allocation3 + $0x38] sm:$0xff] %vm2288_vm12, %v2263_v49  ;;  %v2268_v36 = vadd.f32 %v2198_v18, %v2140_v32  ;;  %v2123_v32 = vld [vmem:[#allocation3 + $0xd8] sm:$0xff] }
 0x33c   : > { %v2207_v17 = vpop.xlane.xlu1 %2206  ;;  %v2155_v8 = vmul.f32 %v5925_v39, %v2123_v32  ;;  %v2329_v39 = vld [vmem:[#allocation4 + $0x40] sm:$0xff] }
 0x33d   : > { %2301 = vst.msk [vmem:[#allocation3 + $0x60] sm:$0xff] %vm2288_vm12, %v2268_v36  ;;  %v2271_v3 = vadd.f32 %v2207_v17, %v2143_v23  ;;  %v2118_v36 = vld [vmem:[#allocation3 + $0xb0] sm:$0xff]  ;;  %v2521_v37 = vmul.f32 %v6108_v34, %v2329_v39  ;;  %v2324_v34 = vld [vmem:[#allocation4 + $0x18] sm:$0xff]  ;;  %v2117_v39 = vld [vmem:[#allocation3 + $0xa8] sm:$0xff] }
 0x33e   : > { %v2216_v1 = vpop.xlane.xlu0 %2215  ;;  %v2150_v20 = vmul.f32 %v5955_v42, %v2118_v36  ;;  %v2126_v42 = vld [vmem:[#allocation3 + $0xf0] sm:$0xff] }
 0x33f   : > { %2304 = vst.msk [vmem:[#allocation3 + $0x78] sm:$0xff] %vm2288_vm12, %v2271_v3  ;;  %v2274_v59 = vadd.f32 %v2216_v1, %v2146_v52  ;;  %v2158_v63 = vmul.f32 %v6110_v12, %v2126_v42 }
 0x340   : > { %v2177_v62 = vpop.xlane.xlu1 %2176 }
 0x341   : > { %2307 = vst.msk [vmem:[#allocation3 + $0x90] sm:$0xff] %vm2288_vm12, %v2274_v59  ;;  %v2261_v21 = vadd.f32 %v2177_v62, %v2133_v29  ;;  %v2121_v29 = vld [vmem:[#allocation3 + $0xc8] sm:$0xff] }
 0x342   : > { %v2240_v19 = vpop.xlane.xlu0 %2239 }
 0x343   : > { %2294 = vst.msk [vmem:[#allocation3 + $0x28] sm:$0xff] %vm2288_vm12, %v2261_v21  ;;  %v2282_v33 = vadd.f32 %v2240_v19, %v2154_v41  ;;  %v2153_v21 = vmul.f32 %v5941_v9, %v2121_v29  ;;  %v2323_v41 = vld [vmem:[#allocation4 + $0x10] sm:$0xff]  ;;  %v2332_v19 = vld [vmem:[#allocation4 + $0x58] sm:$0xff] }
 0x344   : > { %v2201_v54 = vpop.xlane.xlu1 %2200  ;;  %v2515_v28 = vmul.f32 %v6088_v13, %v2323_v41 }
 0x345   : > { %2315 = vst.msk [vmem:[#allocation3 + $0xd0] sm:$0xff] %vm2288_vm12, %v2282_v33  ;;  %v2269_v26 = vadd.f32 %v2201_v54, %v2141_v22 }
 0x346   : > { %v2210_v30 = vpop.xlane.xlu0 %2209 }
 0x347   : > { %2302 = vst.msk [vmem:[#allocation3 + $0x68] sm:$0xff] %vm2288_vm12, %v2269_v26  ;;  %v2272_v24 = vadd.f32 %v2210_v30, %v2144_v56  ;;  %v2321_v26 = vld [vmem:[#allocation4] sm:$0xff]  ;;  %v2330_v56 = vld [vmem:[#allocation4 + $0x48] sm:$0xff] }
 0x348   : > { %v2219_v49 = vpop.xlane.xlu1 %2218  ;;  %v2513_v36 = vmul.f32 %v6069_v16, %v2321_v26  ;;  %v2522_v12 = vmul.f32 %v6102_v50, %v2330_v56 }
 0x349   : > { %2305 = vst.msk [vmem:[#allocation3 + $0x80] sm:$0xff] %vm2288_vm12, %v2272_v24  ;;  %v2275_v18 = vadd.f32 %v2219_v49, %v2147_v6  ;;  %v2524_v24 = vmul.f32 %v6106_v0, %v2332_v19  ;;  %v2116_v49 = vld [vmem:[#allocation3 + $0xa0] sm:$0xff] }
 0x34a   : > { %v2234_v25 = vpop.xlane.xlu0 %2233 }
 0x34b   : > { %2308 = vst.msk [vmem:[#allocation3 + $0x98] sm:$0xff] %vm2288_vm12, %v2275_v18  ;;  %v2280_v23 = vadd.f32 %v2234_v25, %v2152_v48  ;;  %v2151_v25 = vmul.f32 %v5947_v15, %v2119_v53  ;;  %v2516_v15 = vmul.f32 %v6076_v43, %v2324_v34  ;;  %v2333_v53 = vld [vmem:[#allocation4 + $0x60] sm:$0xff] }
 0x34c   : > { %v2243_v17 = vpop.xlane.xlu1 %2242 }
 0x34d   : > { %2313 = vst.msk [vmem:[#allocation3 + $0xc0] sm:$0xff] %vm2288_vm12, %v2280_v23  ;;  %v2283_v3 = vadd.f32 %v2243_v17, %v2155_v8  ;;  %v2127_v8 = vld [vmem:[#allocation3 + $0xf8] sm:$0xff]  ;;  %v2322_v17 = vld [vmem:[#allocation4 + $0x8] sm:$0xff] }
 0x34e   : > { %v2228_v52 = vpop.xlane.xlu0 %2227  ;;  %v2159_v29 = vmul.f32 %v6114_v4, %v2127_v8  ;;  %v2149_v4 = vmul.f32 %v5953_v55, %v2117_v39 }
 0x34f   : > { %2316 = vst.msk [vmem:[#allocation3 + $0xd8] sm:$0xff] %vm2288_vm12, %v2283_v3  ;;  %v2278_v1 = vadd.f32 %v2228_v52, %v2150_v20  ;;  %v2148_v52 = vmul.f32 %v5961_v2, %v2116_v49 }
 0x350   : > { %v2213_v59 = vpop.xlane.xlu1 %2212 }
 0x351   : > { %2311 = vst.msk [vmem:[#allocation3 + $0xb0] sm:$0xff] %vm2288_vm12, %v2278_v1  ;;  %v2273_v62 = vadd.f32 %v2213_v59, %v2145_v27  ;;  %v2124_v27 = vld [vmem:[#allocation3 + $0xe0] sm:$0xff] }
 0x352   : > { %v2156_v42 = vmul.f32 %v5966_v11, %v2124_v27 }
 0x353   : > { %2306 = vst.msk [vmem:[#allocation3 + $0x88] sm:$0xff] %vm2288_vm12, %v2273_v62  ;;  %v2514_v62 = vmul.f32 %v6081_v44, %v2322_v17 }
 0x354   : > { %v4228_v14 = vpop.f32.mrf.mxu1  ;;  %v2237_v33 = vpop.xlane.xlu1 %2236 }
 0x355   : > { %v2975_v22 = vadd.f32 %v4228_v14, %v2523_v60  ;;  %v2281_v54 = vadd.f32 %v2237_v33, %v2153_v21  ;;  %v2125_v33 = vld [vmem:[#allocation3 + $0xe8] sm:$0xff] }
 0x356   : > { %v2732_v30 = vpop.f32.mrf.mxu1  ;;  %v2157_v11 = vmul.f32 %v5959_v10, %v2125_v33  ;;  %v2327_v10 = vld [vmem:[#allocation4 + $0x30] sm:$0xff] }
 0x357   : > { %3007 = vst.msk [vmem:[#allocation4 + $0x50] sm:$0xff] %vm1026_vm2, %v2975_v22  ;;  %v2973_v9 = vadd.f32 %v2732_v30, %v2521_v37  ;;  %v2252_v6 = vpop.xlane.xlu0 %2251  ;;  %v2335_v22 = vld [vmem:[#allocation4 + $0x70] sm:$0xff]  ;;  %v2336_v30 = vld [vmem:[#allocation4 + $0x78] sm:$0xff] }
 0x358   : > { %2314 = vst.msk [vmem:[#allocation3 + $0xc8] sm:$0xff] %vm2288_vm12, %v2281_v54  ;;  %v2286_v32 = vadd.f32 %v2252_v6, %v2158_v63  ;;  %v4212_v18 = vpop.f32.mrf.mxu0  ;;  %v4229_v48 = vpop.f32.mrf.mxu1  ;;  %v2527_v56 = vmul.f32 %v6126_v51, %v2335_v22  ;;  %v2525_v63 = vmul.f32 %v6122_v57, %v2333_v53  ;;  %v2528_v6 = vmul.f32 %v6120_v40, %v2336_v30  ;;  %v6544_v22 = vld [vmem:[#allocation15_spill] sm:$0xff]  ;;  %v6545_v30 = vld [vmem:[#allocation13_spill] sm:$0xff] }
 0x359   : > { %3005 = vst.msk [vmem:[#allocation4 + $0x40] sm:$0xff] %vm1026_vm2, %v2973_v9  ;;  %v2967_v13 = vadd.f32 %v4212_v18, %v2515_v28  ;;  %v2976_v0 = vadd.f32 %v4229_v48, %v2524_v24  ;;  %v2231_v23 = vpop.xlane.xlu1 %2230  ;;  %v2334_v24 = vld [vmem:[#allocation4 + $0x68] sm:$0xff]  ;;  %v2325_v18 = vld [vmem:[#allocation4 + $0x20] sm:$0xff] }
 0x35a   : > { %2319 = vst.msk [vmem:[#allocation3 + $0xf0] sm:$0xff] %vm2288_vm12, %v2286_v32  ;;  %v2279_v5 = vadd.f32 %v2231_v23, %v2151_v25  ;;  %v2631_v3 = vpop.f32.mrf.mxu0  ;;  %v2735_v20 = vpop.f32.mrf.mxu1  ;;  %v2526_v32 = vmul.f32 %v6112_v58, %v2334_v24  ;;  %v2519_v25 = vmul.f32 %v6104_v35, %v2327_v10  ;;  %v2517_v40 = vmul.f32 %v6100_v7, %v2325_v18  ;;  %v2344_v10 = vld [vmem:[#allocation4 + $0xb8] sm:$0xff] }
 0x35b   : > { %2999 = vst.msk [vmem:[#allocation4 + $0x10] sm:$0xff] %vm1026_vm2, %v2967_v13  ;;  %3008 = vst.msk [vmem:[#allocation4 + $0x58] sm:$0xff] %vm1026_vm2, %v2976_v0  ;;  %v2965_v16 = vadd.f32 %v2631_v3, %v2513_v36  ;;  %v2974_v50 = vadd.f32 %v2735_v20, %v2522_v12  ;;  %v2222_v1 = vpop.xlane.xlu0 %2221  ;;  %v2328_v36 = vld [vmem:[#allocation4 + $0x38] sm:$0xff]  ;;  %v2326_v0 = vld [vmem:[#allocation4 + $0x28] sm:$0xff] }
 0x35c   : > { %2312 = vst.msk [vmem:[#allocation3 + $0xb8] sm:$0xff] %vm2288_vm12, %v2279_v5  ;;  %v2276_v61 = vadd.f32 %v2222_v1, %v2148_v52  ;;  %v4213_v59 = vpop.f32.mrf.mxu0  ;;  %v2520_v58 = vmul.f32 %v6091_v38, %v2328_v36  ;;  %v2518_v35 = vmul.f32 %v6084_v46, %v2326_v0  ;;  %v2339_v20 = vld [vmem:[#allocation4 + $0x90] sm:$0xff]  ;;  %v2337_v52 = vld [vmem:[#allocation4 + $0x80] sm:$0xff]  ;;  %v2340_v38 = vld [vmem:[#allocation4 + $0x98] sm:$0xff] }
 0x35d   : > { %2997 = vst.msk [vmem:[#allocation4] sm:$0xff] %vm1026_vm2, %v2965_v16  ;;  %3006 = vst.msk [vmem:[#allocation4 + $0x48] sm:$0xff] %vm1026_vm2, %v2974_v50  ;;  %v2968_v2 = vadd.f32 %v4213_v59, %v2516_v15  ;;  %v2255_v43 = vpop.xlane.xlu1 %2254  ;;  %v2531_v15 = vmul.f32 %v6130_v47, %v2339_v20  ;;  %v2347_v16 = vld [vmem:[#allocation4 + $0xd0] sm:$0xff]  ;;  %v2529_v1 = vmul.f32 %v6138_v45, %v2337_v52  ;;  %v2338_v46 = vld [vmem:[#allocation4 + $0x88] sm:$0xff] }
 0x35e   : > { %2309 = vst.msk [vmem:[#allocation3 + $0xa0] sm:$0xff] %vm2288_vm12, %v2276_v61  ;;  %v2287_v60 = vadd.f32 %v2255_v43, %v2159_v29  ;;  %v2634_v21 = vpop.f32.mrf.mxu0  ;;  %v2345_v61 = vld [vmem:[#allocation4 + $0xc0] sm:$0xff]  ;;  %v6542_v47 = vld [vmem:[#allocation16_spill] sm:$0xff] }
 0x35f   : > { %3000 = vst.msk [vmem:[#allocation4 + $0x18] sm:$0xff] %vm1026_vm2, %v2968_v2  ;;  %v2966_v41 = vadd.f32 %v2634_v21, %v2514_v62  ;;  %v2246_v19 = vpop.xlane.xlu0 %2245  ;;  %v6540_v29 = vld [vmem:[#allocation11_spill] sm:$0xff]  ;;  %v6541_v2 = vld [vmem:[#allocation12_spill] sm:$0xff] }
 0x360   : > { %2320 = vst.msk [vmem:[#allocation3 + $0xf8] sm:$0xff] %vm2288_vm12, %v2287_v60  ;;  %v2284_v44 = vadd.f32 %v2246_v19, %v2156_v42  ;;  %v2532_v62 = vmul.f32 %v6540_v29, %v2340_v38  ;;  %v2539_v43 = vmul.f32 %v6541_v2, %v2347_v16  ;;  %v2348_v60 = vld [vmem:[#allocation4 + $0xd8] sm:$0xff]  ;;  %v2350_v16 = vld [vmem:[#allocation4 + $0xe8] sm:$0xff] }
 0x361   : > { %2998 = vst.msk [vmem:[#allocation4 + $0x8] sm:$0xff] %vm1026_vm2, %v2966_v41  ;;  %v2225_v14 = vpop.xlane.xlu1 %2224  ;;  %v2530_v41 = vmul.f32 %v6542_v47, %v2338_v46  ;;  %v6543_v19 = vld [vmem:[#allocation14_spill] sm:$0xff] }
 0x362   : > { %2317 = vst.msk [vmem:[#allocation3 + $0xe0] sm:$0xff] %vm2288_vm12, %v2284_v44  ;;  %v2277_v37 = vadd.f32 %v2225_v14, %v2149_v4  ;;  %v2537_v44 = vmul.f32 %v6543_v19, %v2345_v61  ;;  %v2346_v14 = vld [vmem:[#allocation4 + $0xc8] sm:$0xff]  ;;  %v6550_v61 = vld [vmem:[#allocation22_spill] sm:$0xff] }
 0x364   : > { %2310 = vst.msk [vmem:[#allocation3 + $0xa8] sm:$0xff] %vm2288_vm12, %v2277_v37 }
 0x365   : > { %v2249_v54 = vpop.xlane.xlu1 %2248 }
 0x366   : > { %v2285_v26 = vadd.f32 %v2249_v54, %v2157_v11  ;;  %v2540_v11 = vmul.f32 %v6544_v22, %v2348_v60 }
 0x368   : > { %2318 = vst.msk [vmem:[#allocation3 + $0xe8] sm:$0xff] %vm2288_vm12, %v2285_v26  ;;  %v4232_v55 = vpop.f32.mrf.mxu1  ;;  %v2343_v26 = vld [vmem:[#allocation4 + $0xb0] sm:$0xff] }
 0x369   : > { %v2979_v28 = vadd.f32 %v4232_v55, %v2527_v56  ;;  %v2538_v55 = vmul.f32 %v6545_v30, %v2346_v14 }
 0x36a   : > { %v2748_v9 = vpop.f32.mrf.mxu1 }
 0x36b   : > { %3011 = vst.msk [vmem:[#allocation4 + $0x70] sm:$0xff] %vm1026_vm2, %v2979_v28  ;;  %v2977_v49 = vadd.f32 %v2748_v9, %v2525_v63  ;;  %v2341_v28 = vld [vmem:[#allocation4 + $0xa0] sm:$0xff]  ;;  %v6546_v9 = vld [vmem:[#allocation20_spill] sm:$0xff] }
 0x36c   : > { %v4233_v34 = vpop.f32.mrf.mxu1 }
 0x36d   : > { %3009 = vst.msk [vmem:[#allocation4 + $0x60] sm:$0xff] %vm1026_vm2, %v2977_v49  ;;  %v2980_v51 = vadd.f32 %v4233_v34, %v2528_v6  ;;  %v2535_v6 = vmul.f32 %v6546_v9, %v2343_v26 }
 0x36e   : > { %v2751_v48 = vpop.f32.mrf.mxu1 }
 0x36f   : > { %3012 = vst.msk [vmem:[#allocation4 + $0x78] sm:$0xff] %vm1026_vm2, %v2980_v51  ;;  %v2978_v57 = vadd.f32 %v2751_v48, %v2526_v32  ;;  %v6547_v32 = vld [vmem:[#allocation25_spill] sm:$0xff]  ;;  %v2342_v48 = vld [vmem:[#allocation4 + $0xa8] sm:$0xff] }
 0x370   : > { %v4216_v12 = vpop.f32.mrf.mxu0  ;;  %v2533_v51 = vmul.f32 %v6547_v32, %v2341_v28 }
 0x371   : > { %3010 = vst.msk [vmem:[#allocation4 + $0x68] sm:$0xff] %vm1026_vm2, %v2978_v57  ;;  %v2971_v13 = vadd.f32 %v4216_v12, %v2519_v25  ;;  %v6548_v57 = vld [vmem:[#allocation17_spill] sm:$0xff] }
 0x372   : > { %v2647_v23 = vpop.f32.mrf.mxu0  ;;  %v2536_v36 = vmul.f32 %v6548_v57, %v2344_v10  ;;  %v2351_v12 = vld [vmem:[#allocation4 + $0xf0] sm:$0xff] }
 0x373   : > { %3003 = vst.msk [vmem:[#allocation4 + $0x30] sm:$0xff] %vm1026_vm2, %v2971_v13  ;;  %v2969_v8 = vadd.f32 %v2647_v23, %v2517_v40  ;;  %v2506_v40 = vpop.permute.xlu1 %2505  ;;  %v6549_v23 = vld [vmem:[#allocation18_spill] sm:$0xff] }
 0x374   : > { %v4217_v17 = vpop.f32.mrf.mxu0 }
 0x375   : > { %3001 = vst.msk [vmem:[#allocation4 + $0x20] sm:$0xff] %vm1026_vm2, %v2969_v8  ;;  %v2972_v5 = vadd.f32 %v4217_v17, %v2520_v58  ;;  %v2534_v58 = vmul.f32 %v6549_v23, %v2342_v48  ;;  %v2349_v8 = vld [vmem:[#allocation4 + $0xe0] sm:$0xff] }
 0x376   : > { %v2650_v3 = vpop.f32.mrf.mxu0 }
 0x377   : > { %3004 = vst.msk [vmem:[#allocation4 + $0x38] sm:$0xff] %vm1026_vm2, %v2972_v5  ;;  %v2970_v7 = vadd.f32 %v2650_v3, %v2518_v35  ;;  %v2543_v35 = vmul.f32 %v2506_v40, %v2351_v12  ;;  %v2352_v3 = vld [vmem:[#allocation4 + $0xf8] sm:$0xff] }
 0x379   : > { %3002 = vst.msk [vmem:[#allocation4 + $0x28] sm:$0xff] %vm1026_vm2, %v2970_v7  ;;  %v2511_v7 = vpop.permute.xlu0 %2510 }
 0x37c   : > { %v4244_v50 = vpop.f32.mrf.mxu0 }
 0x37d   : > { %v2983_v27 = vadd.f32 %v4244_v50, %v2531_v15  ;;  %v2541_v15 = vmul.f32 %v6155_v31, %v2349_v8 }
 0x37e   : > { %v2833_v59 = vpop.f32.mrf.mxu0 }
 0x37f   : > { %3015 = vst.msk [vmem:[#allocation4 + $0x90] sm:$0xff] %vm1026_vm2, %v2983_v27  ;;  %v2981_v39 = vadd.f32 %v2833_v59, %v2529_v1  ;;  %v2544_v1 = vmul.f32 %v2511_v7, %v2352_v3  ;;  %v2542_v59 = vmul.f32 %v6550_v61, %v2350_v16 }
 0x380   : > { %v4245_v21 = vpop.f32.mrf.mxu0  ;;  %v4260_v42 = vpop.f32.mrf.mxu1 }
 0x381   : > { %3013 = vst.msk [vmem:[#allocation4 + $0x80] sm:$0xff] %vm1026_vm2, %v2981_v39  ;;  %v2984_v45 = vadd.f32 %v4245_v21, %v2532_v62  ;;  %v2991_v4 = vadd.f32 %v4260_v42, %v2539_v43 }
 0x382   : > { %v2836_v33 = vpop.f32.mrf.mxu0  ;;  %v2934_v37 = vpop.f32.mrf.mxu1 }
 0x383   : > { %3016 = vst.msk [vmem:[#allocation4 + $0x98] sm:$0xff] %vm1026_vm2, %v2984_v45  ;;  %3023 = vst.msk [vmem:[#allocation4 + $0xd0] sm:$0xff] %vm1026_vm2, %v2991_v4  ;;  %v2982_v54 = vadd.f32 %v2836_v33, %v2530_v41  ;;  %v2989_v53 = vadd.f32 %v2934_v37, %v2537_v44 }
 0x384   : > { %v4261_v56 = vpop.f32.mrf.mxu1 }
 0x385   : > { %3014 = vst.msk [vmem:[#allocation4 + $0x88] sm:$0xff] %vm1026_vm2, %v2982_v54  ;;  %3021 = vst.msk [vmem:[#allocation4 + $0xc0] sm:$0xff] %vm1026_vm2, %v2989_v53  ;;  %v2992_v63 = vadd.f32 %v4261_v56, %v2540_v11 }
 0x386   : > { %v2937_v24 = vpop.f32.mrf.mxu1 }
 0x387   : > { %3024 = vst.msk [vmem:[#allocation4 + $0xd8] sm:$0xff] %vm1026_vm2, %v2992_v63  ;;  %v2990_v49 = vadd.f32 %v2937_v24, %v2538_v55 }
 0x388   : > { %v4248_v34 = vpop.f32.mrf.mxu0 }
 0x389   : > { %3022 = vst.msk [vmem:[#allocation4 + $0xc8] sm:$0xff] %vm1026_vm2, %v2990_v49  ;;  %v2987_v18 = vadd.f32 %v4248_v34, %v2535_v6 }
 0x38a   : > { %v2849_v25 = vpop.f32.mrf.mxu0 }
 0x38b   : > { %3019 = vst.msk [vmem:[#allocation4 + $0xb0] sm:$0xff] %vm1026_vm2, %v2987_v18  ;;  %v2985_v13 = vadd.f32 %v2849_v25, %v2533_v51 }
 0x38c   : > { %v4249_v0 = vpop.f32.mrf.mxu0 }
 0x38d   : > { %3017 = vst.msk [vmem:[#allocation4 + $0xa0] sm:$0xff] %vm1026_vm2, %v2985_v13  ;;  %v2988_v17 = vadd.f32 %v4249_v0, %v2536_v36 }
 0x38e   : > { %v2852_v5 = vpop.f32.mrf.mxu0 }
 0x38f   : > { %3020 = vst.msk [vmem:[#allocation4 + $0xb8] sm:$0xff] %vm1026_vm2, %v2988_v17  ;;  %v2986_v20 = vadd.f32 %v2852_v5, %v2534_v58  ;;  %v4264_v52 = vpop.f32.mrf.mxu1 }
 0x390   : > { %v2995_v38 = vadd.f32 %v4264_v52, %v2543_v35 }
 0x391   : > { %3018 = vst.msk [vmem:[#allocation4 + $0xa8] sm:$0xff] %vm1026_vm2, %v2986_v20  ;;  %v2950_v50 = vpop.f32.mrf.mxu1 }
 0x392   : > { %3027 = vst.msk [vmem:[#allocation4 + $0xf0] sm:$0xff] %vm1026_vm2, %v2995_v38  ;;  %v2993_v27 = vadd.f32 %v2950_v50, %v2541_v15 }
 0x393   : > { %v4265_v46 = vpop.f32.mrf.mxu1 }
 0x394   : > { %3025 = vst.msk [vmem:[#allocation4 + $0xe0] sm:$0xff] %vm1026_vm2, %v2993_v27  ;;  %v2996_v29 = vadd.f32 %v4265_v46, %v2544_v1 }
 0x395   : > { %v2953_v62 = vpop.f32.mrf.mxu1 }
 0x396   : > { %3028 = vst.msk [vmem:[#allocation4 + $0xf8] sm:$0xff] %vm1026_vm2, %v2996_v29  ;;  %v2994_v2 = vadd.f32 %v2953_v62, %v2542_v59 }
 0x398   : > { %3026 = vst.msk [vmem:[#allocation4 + $0xe8] sm:$0xff] %vm1026_vm2, %v2994_v2 }
 0x399 PF: > { %p4015_p6 = scmp.ne.s32.totalorder %s4767_s23, %s4771_s24 }
 0x39b   : > { %3064 = sbr.rel (%p4015_p6) target bundleno = 1336 (0x538), region = 175 }
 0x3a0   : > { %v3075_v31 = vld [vmem:[#allocation3 + $0x50] sm:$0xff]  ;;  %v3073_v43 = vld [vmem:[#allocation3 + $0x40] sm:$0xff]  ;;  %v3076_v39 = vld [vmem:[#allocation3 + $0x58] sm:$0xff]  ;;  %v4788_v60 = vmov 0   ;;  %vm3270_vm13 = vcmask 261120  }
 0x3a1   : > { %4602 = vset.pattern.permute.xlu1 %v4788_v60  ;;  %4601 = vset.pattern.permute.xlu0 %v4788_v60  ;;  %4611 = vrcp.f32 %v3075_v31  ;;  %v3074_v21 = vld [vmem:[#allocation3 + $0x48] sm:$0xff]  ;;  %v3065_v47 = vld [vmem:[#allocation3] sm:$0xff]  ;;  %v3068_v41 = vld [vmem:[#allocation3 + $0x18] sm:$0xff] }
 0x3a2   : > { %4613 = vrcp.f32 %v3073_v43  ;;  %v3066_v42 = vld [vmem:[#allocation3 + $0x8] sm:$0xff]  ;;  %v3067_v19 = vld [vmem:[#allocation3 + $0x10] sm:$0xff]  ;;  %v3077_v45 = vld [vmem:[#allocation3 + $0x60] sm:$0xff] }
 0x3a3   : > { %4615 = vrcp.f32 %v3076_v39  ;;  %v3078_v44 = vld [vmem:[#allocation3 + $0x68] sm:$0xff]  ;;  %v4603_v4 = vld [vmem:[%s6410_s3 + $0x18] sm:$0xff]   ;;  %v4604_v22 = vld [vmem:[%s6410_s3 + $0x10] sm:$0xff]  }
 0x3a4   : > { %4617 = vrcp.f32 %v3074_v21  ;;  %4266 = vmatprep.subr.bf16.mxu0 %v4603_v4  ;;  %v3080_v37 = vld [vmem:[#allocation3 + $0x78] sm:$0xff]  ;;  %v3079_v53 = vld [vmem:[#allocation3 + $0x70] sm:$0xff]  ;;  %v4605_v26 = vld [vmem:[%s6410_s3 + $0x8] sm:$0xff]  }
 0x3a5   : > { %4619 = vrcp.f32 %v3066_v42  ;;  %4267 = vmatpush3.bf16.msra.mxu0 %v4603_v4  ;;  %v3070_v30 = vld [vmem:[#allocation3 + $0x28] sm:$0xff]  ;;  %4278 = vmatprep.subr.bf16.mxu1 %v4605_v26  ;;  %v3069_v63 = vld [vmem:[#allocation3 + $0x20] sm:$0xff]  ;;  %v3072_v9 = vld [vmem:[#allocation3 + $0x38] sm:$0xff] }
 0x3a6   : > { %4621 = vrcp.f32 %v3065_v47  ;;  %4268 = vmatprep.subr.bf16.mxu0 %v4604_v22  ;;  %4279 = vmatpush3.bf16.msra.mxu1 %v4605_v26  ;;  %v4606_v28 = vld [vmem:[%s6410_s3] sm:$0xff]   ;;  %v3071_v49 = vld [vmem:[#allocation3 + $0x30] sm:$0xff]  ;;  %v3082_v34 = vld [vmem:[#allocation3 + $0x88] sm:$0xff] }
 0x3a7   : > { %4623 = vrcp.f32 %v3068_v41  ;;  %4280 = vmatprep.subr.bf16.mxu1 %v4606_v28  ;;  %v3081_v51 = vld [vmem:[#allocation3 + $0x80] sm:$0xff]  ;;  %v3084_v48 = vld [vmem:[#allocation3 + $0x98] sm:$0xff]  ;;  %v3083_v57 = vld [vmem:[#allocation3 + $0x90] sm:$0xff] }
 0x3a8   : > { %4625 = vrcp.f32 %v3067_v19  ;;  %v3090_v12 = vld [vmem:[#allocation3 + $0xc8] sm:$0xff]  ;;  %v3089_v13 = vld [vmem:[#allocation3 + $0xc0] sm:$0xff]  ;;  %v3092_v23 = vld [vmem:[#allocation3 + $0xd8] sm:$0xff] }
 0x3a9   : > { %4627 = vrcp.f32 %v3078_v44  ;;  %4269 = vmatpush3.bf16.msra.mxu0 %v4604_v22  ;;  %v3091_v8 = vld [vmem:[#allocation3 + $0xd0] sm:$0xff]  ;;  %v6297_v17 = vld [vmem:[%s6410_s3 + $0x28] sm:$0xff]   ;;  %v3085_v7 = vld [vmem:[#allocation3 + $0xa0] sm:$0xff] }
 0x3aa   : > { %4629 = vrcp.f32 %v3077_v45  ;;  %4281 = vmatpush3.bf16.msra.mxu1 %v4606_v28  ;;  %v3086_v5 = vld [vmem:[#allocation3 + $0xa8] sm:$0xff]  ;;  %4290 = vmatprep.subr.bf16.mxu0 %v6297_v17  ;;  %v3088_v52 = vld [vmem:[#allocation3 + $0xb8] sm:$0xff]  ;;  %v3087_v38 = vld [vmem:[#allocation3 + $0xb0] sm:$0xff] }
 0x3ab   : > { %4631 = vrcp.f32 %v3080_v37  ;;  %v6303_v16 = vld [vmem:[%s6410_s3 + $0x38] sm:$0xff]   ;;  %v3094_v1 = vld [vmem:[#allocation3 + $0xe8] sm:$0xff]  ;;  %v3093_v46 = vld [vmem:[#allocation3 + $0xe0] sm:$0xff] }
 0x3ac   : > { %4633 = vrcp.f32 %v3079_v53  ;;  %4302 = vmatprep.subr.bf16.mxu1 %v6303_v16  ;;  %v3096_v59 = vld [vmem:[#allocation3 + $0xf8] sm:$0xff]  ;;  %v3095_v62 = vld [vmem:[#allocation3 + $0xf0] sm:$0xff]  ;;  %v3194_v4 = vld [vmem:[#allocation4 + $0x40] sm:$0xff] }
 0x3ad   : > { %4635 = vrcp.f32 %v3070_v30  ;;  %v3196_v44 = vld [vmem:[#allocation4 + $0x50] sm:$0xff]  ;;  %v3197_v45 = vld [vmem:[#allocation4 + $0x58] sm:$0xff]  ;;  %v3130_v26 = vld [vmem:[#allocation4 + $0x8] sm:$0xff] }
 0x3ae   : > { %v4612_v14 = vpop.eup %4611  ;;  %4637 = vrcp.f32 %v3069_v63  ;;  %v3129_v30 = vld [vmem:[#allocation4] sm:$0xff] }
 0x3af   : > { %v4614_v33 = vpop.eup %4613  ;;  %3214 = vperm.xlu1 %4602, %v4612_v14   ;;  %4639 = vrcp.f32 %v3072_v9  ;;  %v3195_v14 = vld [vmem:[#allocation4 + $0x48] sm:$0xff]  ;;  %v4608_v9 = vld [vmem:[%s6410_s3 + $0x20] sm:$0xff]  }
 0x3b0   : > { %v4616_v11 = vpop.eup %4615  ;;  %3204 = vperm.xlu0 %4601, %v4614_v33   ;;  %4641 = vrcp.f32 %v3071_v49  ;;  %v3132_v49 = vld [vmem:[#allocation4 + $0x18] sm:$0xff] }
 0x3b1   : > { %v4618_v54 = vpop.eup %4617  ;;  %4643 = vrcp.f32 %v3082_v34 }
 0x3b2   : > { %v4620_v56 = vpop.eup %4619  ;;  %4645 = vrcp.f32 %v3081_v51 }
 0x3b3   : > { %3219 = vperm.xlu1 %4602, %v4616_v11   ;;  %v4622_v55 = vpop.eup %4621  ;;  %4647 = vrcp.f32 %v3084_v48 }
 0x3b4   : > { %3209 = vperm.xlu0 %4601, %v4618_v54   ;;  %v4624_v24 = vpop.eup %4623  ;;  %4649 = vrcp.f32 %v3083_v57  ;;  %v3198_v57 = vld [vmem:[#allocation4 + $0x60] sm:$0xff] }
 0x3b5   : > { %v4626_v6 = vpop.eup %4625  ;;  %4651 = vrcp.f32 %v3090_v12 }
 0x3b6   : > { %v4628_v10 = vpop.eup %4627  ;;  %4653 = vrcp.f32 %v3089_v13 }
 0x3b7   : > { %3144 = vperm.xlu1 %4602, %v4620_v56   ;;  %v4630_v32 = vpop.eup %4629  ;;  %4655 = vrcp.f32 %v3092_v23 }
 0x3b8   : > { %3139 = vperm.xlu0 %4601, %v4622_v55   ;;  %v4632_v18 = vpop.eup %4631  ;;  %4657 = vrcp.f32 %v3091_v8  ;;  %v3200_v8 = vld [vmem:[#allocation4 + $0x70] sm:$0xff] }
 0x3b9   : > { %v4634_v25 = vpop.eup %4633  ;;  %4659 = vrcp.f32 %v3086_v5 }
 0x3ba   : > { %v4636_v36 = vpop.eup %4635  ;;  %4661 = vrcp.f32 %v3085_v7 }
 0x3bb   : > { %3154 = vperm.xlu1 %4602, %v4624_v24   ;;  %v4638_v40 = vpop.eup %4637  ;;  %4663 = vrcp.f32 %v3088_v52  ;;  %v3133_v52 = vld [vmem:[#allocation4 + $0x20] sm:$0xff] }
 0x3bc   : > { %3149 = vperm.xlu0 %4601, %v4626_v6   ;;  %v4640_v0 = vpop.eup %4639  ;;  %4665 = vrcp.f32 %v3087_v38 }
 0x3bd   : > { %v4642_v58 = vpop.eup %4641  ;;  %4667 = vrcp.f32 %v3094_v1 }
 0x3be   : > { %v4644_v35 = vpop.eup %4643  ;;  %4669 = vrcp.f32 %v3093_v46  ;;  %v3136_v46 = vld [vmem:[#allocation4 + $0x38] sm:$0xff] }
 0x3bf   : > { %3229 = vperm.xlu1 %4602, %v4628_v10   ;;  %v4646_v3 = vpop.eup %4645  ;;  %4671 = vrcp.f32 %v3096_v59  ;;  %v3131_v10 = vld [vmem:[#allocation4 + $0x10] sm:$0xff] }
 0x3c0   : > { %3224 = vperm.xlu0 %4601, %v4630_v32   ;;  %v4648_v20 = vpop.eup %4647  ;;  %4673 = vrcp.f32 %v3095_v62 }
 0x3c1   : > { %v4650_v15 = vpop.eup %4649 }
 0x3c2   : > { %v4652_v50 = vpop.eup %4651 }
 0x3c3   : > { %3239 = vperm.xlu1 %4602, %v4632_v18   ;;  %v4654_v27 = vpop.eup %4653 }
 0x3c4   : > { %3234 = vperm.xlu0 %4601, %v4634_v25   ;;  %v4656_v61 = vpop.eup %4655  ;;  %v3199_v25 = vld [vmem:[#allocation4 + $0x68] sm:$0xff] }
 0x3c5   : > { %v4658_v29 = vpop.eup %4657 }
 0x3c6   : > { %v4660_v2 = vpop.eup %4659 }
 0x3c7   : > { %3164 = vperm.xlu1 %4602, %v4636_v36   ;;  %v4662_v31 = vpop.eup %4661 }
 0x3c8   : > { %3159 = vperm.xlu0 %4601, %v4638_v40   ;;  %v4664_v43 = vpop.eup %4663  ;;  %v4610_v40 = vld [vmem:[%s6410_s3 + $0x30] sm:$0xff]  }
 0x3c9   : > { %v4666_v39 = vpop.eup %4665 }
 0x3ca   : > { %v4668_v60 = vpop.eup %4667 }
 0x3cb   : > { %3174 = vperm.xlu1 %4602, %v4640_v0   ;;  %v4670_v21 = vpop.eup %4669 }
 0x3cc   : > { %3169 = vperm.xlu0 %4601, %v4642_v58   ;;  %v4672_v42 = vpop.eup %4671  ;;  %v3201_v58 = vld [vmem:[#allocation4 + $0x78] sm:$0xff] }
 0x3cd   : > { %v4674_v47 = vpop.eup %4673 }
 0x3cf   : > { %3453 = vperm.xlu1 %4602, %v4644_v35  }
 0x3d0   : > { %3448 = vperm.xlu0 %4601, %v4646_v3  }
 0x3d3   : > { %3463 = vperm.xlu1 %4602, %v4648_v20   ;;  %v3134_v20 = vld [vmem:[#allocation4 + $0x28] sm:$0xff] }
 0x3d4   : > { %3458 = vperm.xlu0 %4601, %v4650_v15  }
 0x3d7   : > { %3615 = vperm.xlu1 %4602, %v4652_v50  }
 0x3d8   : > { %3610 = vperm.xlu0 %4601, %v4654_v27  }
 0x3db   : > { %3625 = vperm.xlu1 %4602, %v4656_v61  }
 0x3dc   : > { %3620 = vperm.xlu0 %4601, %v4658_v29  }
 0x3df   : > { %3473 = vperm.xlu1 %4602, %v4660_v2  }
 0x3e0   : > { %3468 = vperm.xlu0 %4601, %v4662_v31   ;;  %v3439_v31 = vld [vmem:[#allocation4 + $0x88] sm:$0xff] }
 0x3e3   : > { %3483 = vperm.xlu1 %4602, %v4664_v43   ;;  %v3438_v43 = vld [vmem:[#allocation4 + $0x80] sm:$0xff] }
 0x3e4   : > { %3478 = vperm.xlu0 %4601, %v4666_v39  }
 0x3e7   : > { %3635 = vperm.xlu1 %4602, %v4668_v60  }
 0x3e8   : > { %3630 = vperm.xlu0 %4601, %v4670_v21  }
 0x3eb   : > { %3645 = vperm.xlu1 %4602, %v4672_v42  }
 0x3ec   : > { %3640 = vperm.xlu0 %4601, %v4674_v47  }
 0x42a   : > { %v3215_v41 = vpop.permute.xlu1 %3214 }
 0x42b   : > { %v3205_v19 = vpop.permute.xlu0 %3204  ;;  %v3244_v37 = vmul.f32 %v3215_v41, %v3196_v44  ;;  %v3441_v41 = vld [vmem:[#allocation4 + $0x98] sm:$0xff] }
 0x42c   : > { %v3242_v54 = vmul.f32 %v3205_v19, %v3194_v4  ;;  %v3440_v19 = vld [vmem:[#allocation4 + $0x90] sm:$0xff] }
 0x42e   : > { %v3220_v33 = vpop.permute.xlu1 %3219 }
 0x42f   : > { %v3245_v22 = vmul.f32 %v3220_v33, %v3197_v45  ;;  %v3210_v11 = vpop.permute.xlu0 %3209 }
 0x430   : > { %v3243_v53 = vmul.f32 %v3210_v11, %v3195_v14 }
 0x431   : > { %v3251_v56 = vpack.c.bf16 %v3245_v22, %v3244_v37  ;;  %v3601_v37 = vld [vmem:[#allocation4 + $0xc8] sm:$0xff]  ;;  %v3600_v22 = vld [vmem:[#allocation4 + $0xc0] sm:$0xff] }
 0x432   : > { %v3145_v55 = vpop.permute.xlu1 %3144  ;;  %v3250_v63 = vpack.c.bf16 %v3243_v53, %v3242_v54 }
 0x433   : > { %v3178_v28 = vmul.f32 %v3145_v55, %v3130_v26  ;;  %v3140_v24 = vpop.permute.xlu0 %3139  ;;  %v3602_v55 = vld [vmem:[#allocation4 + $0xd0] sm:$0xff] }
 0x434   : > { %v3177_v6 = vmul.f32 %v3140_v24, %v3129_v30  ;;  %4270 = vmatprep.mubr.msk.bf16.mxu0 %vm3270_vm13, %v3250_v63  ;;  %v3603_v30 = vld [vmem:[#allocation4 + $0xd8] sm:$0xff] }
 0x435   : > { %4271 = vmatmul.mubr.msk.bf16.vlgmr.msra.gmra.mxu0 %vm3270_vm13, %v3251_v56 }
 0x436   : > { %v3155_v34 = vpop.permute.xlu1 %3154  ;;  %v3185_v32 = vpack.c.bf16 %v3178_v28, %v3177_v6  ;;  %4291 = vmatpush3.bf16.msra.mxu0 %v6297_v17 }
 0x437   : > { %v3180_v51 = vmul.f32 %v3155_v34, %v3132_v49  ;;  %v3150_v18 = vpop.permute.xlu0 %3149  ;;  %4292 = vmatprep.subr.bf16.mxu0 %v4608_v9  ;;  %v3443_v49 = vld [vmem:[#allocation4 + $0xa8] sm:$0xff] }
 0x438   : > { %v3179_v48 = vmul.f32 %v3150_v18, %v3131_v10  ;;  %4282 = vmatprep.mubr.msk.bf16.mxu1 %vm3270_vm13, %v3185_v32  ;;  %v3442_v10 = vld [vmem:[#allocation4 + $0xa0] sm:$0xff] }
 0x43a   : > { %v3186_v36 = vpack.c.bf16 %v3180_v51, %v3179_v48  ;;  %v3230_v12 = vpop.permute.xlu1 %3229  ;;  %4293 = vmatpush3.bf16.msra.mxu0 %v4608_v9 }
 0x43b   : > { %v3247_v13 = vmul.f32 %v3230_v12, %v3199_v25  ;;  %v3225_v0 = vpop.permute.xlu0 %3224  ;;  %v3445_v25 = vld [vmem:[#allocation4 + $0xb8] sm:$0xff] }
 0x43c   : > { %v3246_v23 = vmul.f32 %v3225_v0, %v3198_v57  ;;  %4283 = vmatmul.mubr.msk.bf16.vlgmr.msra.gmra.mxu1 %vm3270_vm13, %v3186_v36  ;;  %v3444_v57 = vld [vmem:[#allocation4 + $0xb0] sm:$0xff] }
 0x43d   : > { %4303 = vmatpush3.bf16.msra.mxu1 %v6303_v16  ;;  %v3135_v16 = vld [vmem:[#allocation4 + $0x30] sm:$0xff] }
 0x43e   : > { %v3252_v17 = vpack.c.bf16 %v3247_v13, %v3246_v23  ;;  %v3240_v35 = vpop.permute.xlu1 %3239  ;;  %4304 = vmatprep.subr.bf16.mxu1 %v4610_v40  ;;  %v3605_v23 = vld [vmem:[#allocation4 + $0xe8] sm:$0xff] }
 0x43f   : > { %v3249_v5 = vmul.f32 %v3240_v35, %v3201_v58  ;;  %v3235_v3 = vpop.permute.xlu0 %3234  ;;  %v3604_v58 = vld [vmem:[#allocation4 + $0xe0] sm:$0xff] }
 0x440   : > { %v3248_v7 = vmul.f32 %v3235_v3, %v3200_v8  ;;  %4274 = vmatprep.mubr.msk.bf16.mxu0 %vm3270_vm13, %v3252_v17 }
 0x441   : > { %4305 = vmatpush3.bf16.msra.mxu1 %v4610_v40 }
 0x442   : > { %v3253_v15 = vpack.c.bf16 %v3249_v5, %v3248_v7  ;;  %v3165_v38 = vpop.permute.xlu1 %3164  ;;  %v3607_v7 = vld [vmem:[#allocation4 + $0xf8] sm:$0xff] }
 0x443   : > { %v3182_v50 = vmul.f32 %v3165_v38, %v3134_v20  ;;  %v3160_v1 = vpop.permute.xlu0 %3159  ;;  %v3606_v20 = vld [vmem:[#allocation4 + $0xf0] sm:$0xff] }
 0x444   : > { %v3181_v27 = vmul.f32 %v3160_v1, %v3133_v52  ;;  %4275 = vmatmul.mubr.msk.bf16.gmra.mxu0 %vm3270_vm13, %v3253_v15 }
 0x446   : > { %v3187_v61 = vpack.c.bf16 %v3182_v50, %v3181_v27  ;;  %v3175_v59 = vpop.permute.xlu1 %3174 }
 0x447   : > { %v3184_v29 = vmul.f32 %v3175_v59, %v3136_v46  ;;  %v3170_v62 = vpop.permute.xlu0 %3169 }
 0x448   : > { %v3183_v2 = vmul.f32 %v3170_v62, %v3135_v16  ;;  %4286 = vmatprep.mubr.msk.bf16.mxu1 %vm3270_vm13, %v3187_v61 }
 0x44a   : > { %v3188_v39 = vpack.c.bf16 %v3184_v29, %v3183_v2  ;;  %v3454_v60 = vpop.permute.xlu1 %3453 }
 0x44b   : > { %v3487_v21 = vmul.f32 %v3454_v60, %v3439_v31  ;;  %v3449_v42 = vpop.permute.xlu0 %3448 }
 0x44c   : > { %v3486_v47 = vmul.f32 %v3449_v42, %v3438_v43  ;;  %4287 = vmatmul.mubr.msk.bf16.gmra.mxu1 %vm3270_vm13, %v3188_v39 }
 0x44e   : > { %v3494_v44 = vpack.c.bf16 %v3487_v21, %v3486_v47  ;;  %v3464_v45 = vpop.permute.xlu1 %3463 }
 0x44f   : > { %v3489_v4 = vmul.f32 %v3464_v45, %v3441_v41  ;;  %v3459_v14 = vpop.permute.xlu0 %3458 }
 0x450   : > { %v3488_v33 = vmul.f32 %v3459_v14, %v3440_v19  ;;  %4294 = vmatprep.mubr.msk.bf16.mxu0 %vm3270_vm13, %v3494_v44 }
 0x452   : > { %v3495_v11 = vpack.c.bf16 %v3489_v4, %v3488_v33  ;;  %v3616_v54 = vpop.permute.xlu1 %3615 }
 0x453   : > { %v3649_v53 = vmul.f32 %v3616_v54, %v3601_v37  ;;  %v3611_v26 = vpop.permute.xlu0 %3610 }
 0x454   : > { %v3648_v56 = vmul.f32 %v3611_v26, %v3600_v22  ;;  %4295 = vmatmul.mubr.msk.bf16.vlgmr.msra.gmra.mxu0 %vm3270_vm13, %v3495_v11  ;;  %v4040_v11 = vld [vmem:[%s6411_s4] ss:$0 sm:$0xff] }
 0x456   : > { %v3656_v63 = vpack.c.bf16 %v3649_v53, %v3648_v56  ;;  %v3626_v28 = vpop.permute.xlu1 %3625 }
 0x457   : > { %v3651_v24 = vmul.f32 %v3626_v28, %v3603_v30  ;;  %v3621_v9 = vpop.permute.xlu0 %3620 }
 0x458   : > { %v3650_v6 = vmul.f32 %v3621_v9, %v3602_v55  ;;  %4306 = vmatprep.mubr.msk.bf16.mxu1 %vm3270_vm13, %v3656_v63 }
 0x45a   : > { %v3657_v34 = vpack.c.bf16 %v3651_v24, %v3650_v6  ;;  %v3474_v32 = vpop.permute.xlu1 %3473 }
 0x45b   : > { %v3491_v51 = vmul.f32 %v3474_v32, %v3443_v49  ;;  %v3469_v18 = vpop.permute.xlu0 %3468 }
 0x45c   : > { %v3490_v48 = vmul.f32 %v3469_v18, %v3442_v10  ;;  %4307 = vmatmul.mubr.msk.bf16.vlgmr.msra.gmra.mxu1 %vm3270_vm13, %v3657_v34 }
 0x45e   : > { %v3496_v36 = vpack.c.bf16 %v3491_v51, %v3490_v48  ;;  %v3484_v12 = vpop.permute.xlu1 %3483 }
 0x45f   : > { %v3493_v40 = vmul.f32 %v3484_v12, %v3445_v25  ;;  %v3479_v13 = vpop.permute.xlu0 %3478 }
 0x460   : > { %v3492_v0 = vmul.f32 %v3479_v13, %v3444_v57  ;;  %4298 = vmatprep.mubr.msk.bf16.mxu0 %vm3270_vm13, %v3496_v36 }
 0x462   : > { %v3497_v8 = vpack.c.bf16 %v3493_v40, %v3492_v0  ;;  %v3636_v17 = vpop.permute.xlu1 %3635 }
 0x463   : > { %v3653_v35 = vmul.f32 %v3636_v17, %v3605_v23  ;;  %v3631_v5 = vpop.permute.xlu0 %3630 }
 0x464   : > { %v3652_v3 = vmul.f32 %v3631_v5, %v3604_v58  ;;  %4299 = vmatmul.mubr.msk.bf16.gmra.mxu0 %vm3270_vm13, %v3497_v8 }
 0x466   : > { %v3658_v52 = vpack.c.bf16 %v3653_v35, %v3652_v3  ;;  %v3646_v15 = vpop.permute.xlu1 %3645 }
 0x467   : > { %v3655_v38 = vmul.f32 %v3646_v15, %v3607_v7  ;;  %v3641_v50 = vpop.permute.xlu0 %3640 }
 0x468   : > { %v3654_v1 = vmul.f32 %v3641_v50, %v3606_v20  ;;  %4310 = vmatprep.mubr.msk.bf16.mxu1 %vm3270_vm13, %v3658_v52 }
 0x46a   : > { %v3659_v27 = vpack.c.bf16 %v3655_v38, %v3654_v1 }
 0x46c   : > { %4311 = vmatmul.mubr.msk.bf16.gmra.mxu1 %vm3270_vm13, %v3659_v27 }
 0x4f5   : > { %v4272_v46 = vpop.f32.mrf.mxu0 }
 0x4f7   : > { %v3317_v16 = vpop.f32.mrf.mxu0 }
 0x4f9   : > { %v4273_v61 = vpop.f32.mrf.mxu0 }
 0x4fb   : > { %v3320_v29 = vpop.f32.mrf.mxu0 }
 0x4fc   : > { %v4284_v59 = vpop.f32.mrf.mxu1 }
 0x4fd   : > { %v3415_v45 = vadd.f32 %v4284_v59, %v4272_v46 }
 0x4fe   : > { %v3406_v62 = vpop.f32.mrf.mxu1 }
 0x4ff   : > { %v3407_v33 = vadd.f32 %v3406_v62, %v3317_v16 }
 0x500   : > { %v4285_v31 = vpop.f32.mrf.mxu1 }
 0x501   : > { %v3418_v54 = vadd.f32 %v4285_v31, %v4273_v61 }
 0x502   : > { %v3409_v39 = vpop.f32.mrf.mxu1 }
 0x503   : > { %v3410_v55 = vadd.f32 %v3409_v39, %v3320_v29 }
 0x504   : > { %v4276_v2 = vpop.f32.mrf.mxu0 }
 0x506   : > { %v3333_v43 = vpop.f32.mrf.mxu0 }
 0x508   : > { %v4277_v60 = vpop.f32.mrf.mxu0 }
 0x50a   : > { %v3336_v42 = vpop.f32.mrf.mxu0 }
 0x50c   : > { %v4288_v21 = vpop.f32.mrf.mxu1 }
 0x50d   : > { %v3431_v57 = vadd.f32 %v4288_v21, %v4276_v2 }
 0x50e   : > { %v3422_v47 = vpop.f32.mrf.mxu1 }
 0x50f   : > { %v3423_v12 = vadd.f32 %v3422_v47, %v3333_v43 }
 0x510   : > { %v4289_v19 = vpop.f32.mrf.mxu1 }
 0x511   : > { %v3434_v0 = vadd.f32 %v4289_v19, %v4277_v60 }
 0x512   : > { %v3425_v4 = vpop.f32.mrf.mxu1 }
 0x513   : > { %v3426_v35 = vadd.f32 %v3425_v4, %v3336_v42 }
 0x514   : > { %v4296_v41 = vpop.f32.mrf.mxu0 }
 0x515   : > { %v3593_v37 = vadd.f32 %v4296_v41, %v3415_v45 }
 0x516   : > { %v3560_v44 = vpop.f32.mrf.mxu0 }
 0x517   : > { %v3591_v53 = vadd.f32 %v3560_v44, %v3407_v33 }
 0x518   : > { %v4297_v14 = vpop.f32.mrf.mxu0 }
 0x519   : > { %v3594_v63 = vadd.f32 %v4297_v14, %v3418_v54 }
 0x51a   : > { %v3563_v56 = vpop.f32.mrf.mxu0 }
 0x51b   : > { %v3592_v6 = vadd.f32 %v3563_v56, %v3410_v55 }
 0x51c   : > { %v4308_v22 = vpop.f32.mrf.mxu1 }
 0x51d   : > { %v3755_v26 = vadd.f32 %v4308_v22, %v3593_v37 }
 0x51e   : > { %v3722_v30 = vpop.f32.mrf.mxu1 }
 0x51f   : > { %v3770_v28 = vadd.f32 %v4040_v11, %v3755_v26  ;;  %v3753_v24 = vadd.f32 %v3722_v30, %v3591_v53 }
 0x520   : > { %v4309_v9 = vpop.f32.mrf.mxu1 }
 0x521   : > { %3778 = vst [vmem:[%s5012_s13 + $0x10] sm:$0xff] %v3770_v28  ;;  %v3768_v49 = vadd.f32 %v4040_v11, %v3753_v24  ;;  %v3756_v10 = vadd.f32 %v4309_v9, %v3594_v63 }
 0x522   : > { %v3725_v34 = vpop.f32.mrf.mxu1 }
 0x523   : > { %3776 = vst [vmem:[%s5012_s13] sm:$0xff] %v3768_v49  ;;  %v3771_v32 = vadd.f32 %v4040_v11, %v3756_v10  ;;  %v3754_v51 = vadd.f32 %v3725_v34, %v3592_v6 }
 0x524   : > { %v4300_v18 = vpop.f32.mrf.mxu0 }
 0x525   : > { %3779 = vst [vmem:[%s5012_s13 + $0x18] sm:$0xff] %v3771_v32  ;;  %v3769_v48 = vadd.f32 %v4040_v11, %v3754_v51  ;;  %v3597_v40 = vadd.f32 %v4300_v18, %v3431_v57 }
 0x526   : > { %v3576_v25 = vpop.f32.mrf.mxu0 }
 0x527   : > { %3777 = vst [vmem:[%s5012_s13 + $0x8] sm:$0xff] %v3769_v48  ;;  %v3595_v23 = vadd.f32 %v3576_v25, %v3423_v12 }
 0x528   : > { %v4301_v36 = vpop.f32.mrf.mxu0 }
 0x529   : > { %v3598_v5 = vadd.f32 %v4301_v36, %v3434_v0 }
 0x52a   : > { %v3579_v8 = vpop.f32.mrf.mxu0 }
 0x52b   : > { %v3596_v52 = vadd.f32 %v3579_v8, %v3426_v35 }
 0x52c   : > { %v4312_v13 = vpop.f32.mrf.mxu1 }
 0x52d   : > { %v3759_v58 = vadd.f32 %v4312_v13, %v3597_v40 }
 0x52e   : > { %v3738_v17 = vpop.f32.mrf.mxu1 }
 0x52f   : > { %v3774_v3 = vadd.f32 %v4040_v11, %v3759_v58  ;;  %v3757_v7 = vadd.f32 %v3738_v17, %v3595_v23 }
 0x530   : > { %v4313_v20 = vpop.f32.mrf.mxu1 }
 0x531   : > { %3782 = vst [vmem:[%s5012_s13 + $0x30] sm:$0xff] %v3774_v3  ;;  %v3772_v15 = vadd.f32 %v4040_v11, %v3757_v7  ;;  %v3760_v38 = vadd.f32 %v4313_v20, %v3598_v5 }
 0x532   : > { %v3741_v50 = vpop.f32.mrf.mxu1 }
 0x533   : > { %3780 = vst [vmem:[%s5012_s13 + $0x20] sm:$0xff] %v3772_v15  ;;  %v3775_v1 = vadd.f32 %v4040_v11, %v3760_v38  ;;  %v3758_v27 = vadd.f32 %v3741_v50, %v3596_v52 }
 0x535   : > { %3783 = vst [vmem:[%s5012_s13 + $0x38] sm:$0xff] %v3775_v1  ;;  %v3773_v46 = vadd.f32 %v4040_v11, %v3758_v27 }
 0x537   : > { %3781 = vst [vmem:[%s5012_s13 + $0x28] sm:$0xff] %v3773_v46 }
 0x538 PF: > { %s4049_s23 = sshll.u32 %s4771_s24, 10  ;;  %s3798_s28 = sshll.u32 %s5012_s13, 4  ;;  %s6348_s28 = int_to_ptr.vmem [resolvable:$true] %s3798_s28 }
 0x539   : > { %s6345_s17 = scalar_lea.hbm %s6412_s5, %s4049_s23  ;;  %s4675_s7 = scalar_lea.vmem %s6348_s28, 1024 }
 0x53a   : > { %p4676_p7 = scmp.ne.s32.totalorder %s6348_s28, %s4675_s7  ;;  %s4789_s19 = smov [#allocation8]  }
 0x53b   : > { %s4679_s10 = sshll.u32 %s4789_s19, 4  ;;  %s4680_s10 = int_to_ptr.vmem [resolvable:$false] %s4679_s10 }
 0x53c   : > { %p4677_p8 = pnand %p4676_p7, %p4914_p12  ;;  %s4681_s24 = scalar_lea.vmem %s4680_s10, 2048 }
 0x53d   : > { %p4682_p10 = scmp.lt.s32.totalorder %s6348_s28, %s4680_s10  ;;  %p4683_p11 = scmp.lt.s32.totalorder %s4681_s24, %s4675_s7 }
 0x53e   : > { %p4678_p9 = pneg %p4677_p8 }
 0x53f   : > { %p4684_p0 = por %p4683_p11, %p4682_p10 }
 0x541   : > { %p4685_p1 = pnand %p4684_p0, %p4678_p9 }
 0x543   : > { %4688 = shalt.err (!%p4685_p1)
}
 0x544   : > { %s4689_s13 = scalar_lea.hbm %s6345_s17, 1024  ;;  %s4693_s12 = scalar_lea.hbm %s6412_s5, 2048 }
 0x545   : > { %p4690_p2 = scmp.ne.s32.totalorder %s6345_s17, %s4689_s13  ;;  %p4694_p5 = scmp.lt.s32.totalorder %s6345_s17, %s6412_s5 }
 0x546   : > { %p4695_p6 = scmp.lt.s32.totalorder %s4693_s12, %s4689_s13 }
 0x547   : > { %p4691_p3 = pnand %p4690_p2, %p4914_p12 }
 0x548   : > { %p4696_p7 = por %p4695_p6, %p4694_p5 }
 0x549   : > { %p4692_p4 = pneg %p4691_p3 }
 0x54b   : > { %p4697_p8 = pnand %p4696_p7, %p4692_p4 }
 0x54d   : > { %4700 = shalt.err (!%p4697_p8)
}
 0x54e   : > { %s4790_s7 = smov 128   ;;  %s4791_s10 = smov 8  }
 0x54f   : > { %s6551_s24 = scalar_lea.sflag [#allocation9], %s5001_s9 }
 0x550   : > { %4330 = dma.vmem_to_hbm [thread:$0]  (%p4914_p12), %s6348_s28, 1024, %s6345_s17, %s6551_s24, %s4790_s7, %s4790_s7, %s4791_s10  }
 0x551 PF: > { %p4336_p9 = scmp.ge.s32.totalorder %s4783_s27, 2  ;;  %s3813_s29 = sand.u32 1, %s4747_s18  }
 0x552   : > { %s3814_s13 = scalar_lea.sflag [#allocation9], %s3813_s29 }
 0x553   : > { %p4333_p10 = pnand %p4336_p9, %p4918_p13 }
 0x555   : > { %p4334_p11 = pneg %p4333_p10 }
 0x557   : > { %4742 = dma.done.wait (%p4334_p11), %s3814_s13, 1024  }
 0x558   : > { %4744 = vsyncadd (%p4334_p11), %s3814_s13, 4294966272  ;;  %s18_s27 = sadd.s32 1, %s4783_s27   ;;  %s6552_s18 = smov %s4759_s21 }
 0x559   : > { %p15_p0 = scmp.ge.s32.totalorder %s18_s27, 6   ;;  %s6553_s19 = smov %s4755_s20 }
 0x55a   : > { %s6554_s20 = smov %s4898_s11  ;;  %s6555_s21 = smov %s4763_s22 }
 0x55b   : > { %s6556_s22 = smov %s4909_s14  ;;  %s6557_s23 = smov %s4775_s25 }
 0x55c   : > { %s6558_s24 = smov %s4779_s26  ;;  %s6559_s25 = smov %s6562_s30 }
 0x55d   : > { %s6560_s26 = smov %s6566_s6  ;;  %17 = sbr.rel (!%p15_p0) target bundleno = 6 (0x6), region = 234 }
 0x562   :  { %3819 = vsyncpa [#allocation9], 1 }
 0x563   :  { %3821 = vsyncpa [#allocation9 + $0x1], 1 }

</bundles_post_ra>
